<compile_context>
chip_gen: v5e
topology: v5e:2x2
jax: 0.10.0
libtpu: 0.0.40
codegen_flags: <defaults>
</compile_context>

<pallas_src>
import math
import jax
import jax.numpy as jnp
from jax import lax
from jax.experimental import pallas as pl
from jax.experimental.pallas import tpu as pltpu

# ---- hyperparameters from the PyTorch module ----
D_MODEL = 128
NHEAD = 8
HEAD_DIM = D_MODEL // NHEAD
DIM_FF = 256
NUM_LAYERS = 4
FC_HIDDEN = 64
OUT_PAD = 128          # lane-dense padding for the scalar head output
LN_EPS = 1e-5          # nn.LayerNorm default


# ---------------------------------------------------------------------------
# In-kernel helpers
# ---------------------------------------------------------------------------
def _layer_norm(x, w, b):
    # x: [S, D], w/b: [1, D]; biased variance (PyTorch LayerNorm semantics)
    mu = jnp.mean(x, axis=-1, keepdims=True)
    var = jnp.mean(jnp.square(x - mu), axis=-1, keepdims=True)
    return (x - mu) * lax.rsqrt(var + LN_EPS) * w + b


# ---------------------------------------------------------------------------
# Single fused kernel: embed + 4 encoder layers + pooling head (per batch row)
# ---------------------------------------------------------------------------
def fused_kernel(x_ref, emb_w_ref, emb_b_ref, pe_ref,
                 wqkv_ref, bqkv_ref, wo_ref, bo_ref,
                 ln1w_ref, ln1b_ref, w1_ref, b1_ref, w2_ref, b2_ref,
                 ln2w_ref, ln2b_ref,
                 fc_w_ref, fc_b_ref, fc2_w_ref, fc2_b_ref,
                 o_ref):
    x = x_ref[0]                                                  # [S, IN]

    # embedding linear + positional encoding
    h = jnp.dot(x, emb_w_ref[...], preferred_element_type=jnp.float32)
    h = h + emb_b_ref[...] + pe_ref[...]
    # TODO(synk): nn.Dropout after positional encoding is identity in eval mode.

    # ---- transformer encoder layers (statically unrolled) ----
    for l in range(NUM_LAYERS):
        # fused QKV projection: [S, D] @ [D, 3D]  (Q part pre-scaled by 1/sqrt(Dh))
        qkv = jnp.dot(h, wqkv_ref[l],
                      preferred_element_type=jnp.float32) + bqkv_ref[l]

        heads = []
        for hd in range(NHEAD):
            lo = hd * HEAD_DIM
            qh = qkv[:, lo:lo + HEAD_DIM]
            kh = qkv[:, D_MODEL + lo:D_MODEL + lo + HEAD_DIM]
            vh = qkv[:, 2 * D_MODEL + lo:2 * D_MODEL + lo + HEAD_DIM]
            s = lax.dot_general(qh, kh, (((1,), (1,)), ((), ())),
                                preferred_element_type=jnp.float32)   # [S, S]
            s = s - jnp.max(s, axis=-1, keepdims=True)
            p = jnp.exp(s)
            p = p * pl.reciprocal(jnp.sum(p, axis=-1, keepdims=True), approx=True)
            heads.append(jnp.dot(p, vh, preferred_element_type=jnp.float32))

        attn = jnp.concatenate(heads, axis=-1)                    # [S, D]
        attn = jnp.dot(attn, wo_ref[l],
                       preferred_element_type=jnp.float32) + bo_ref[l]

        # residual + LayerNorm 1
        h = _layer_norm(h + attn, ln1w_ref[l], ln1b_ref[l])

        # feed-forward (ReLU, PyTorch default)
        f = jnp.dot(h, w1_ref[l], preferred_element_type=jnp.float32) + b1_ref[l]
        f = jnp.maximum(f, 0.0)
        f = jnp.dot(f, w2_ref[l], preferred_element_type=jnp.float32) + b2_ref[l]

        # residual + LayerNorm 2
        h = _layer_norm(h + f, ln2w_ref[l], ln2b_ref[l])

    # ---- pooling head: mean over seq, fc -> ReLU -> fc2 (lane-padded) ----
    m = jnp.sum(h, axis=0, keepdims=True) * (1.0 / h.shape[0])    # [1, D]
    z = jnp.dot(m, fc_w_ref[...], preferred_element_type=jnp.float32) + fc_b_ref[...]
    z = jnp.maximum(z, 0.0)
    y = jnp.dot(z, fc2_w_ref[...], preferred_element_type=jnp.float32) + fc2_b_ref[...]
    o_ref[0] = y                                                  # [1, OUT_PAD]


# ---------------------------------------------------------------------------
# Wrapper (pallas_call plumbing)
# ---------------------------------------------------------------------------
def _bcast_spec(arr):
    nd = arr.ndim
    return pl.BlockSpec(arr.shape, lambda b, nd=nd: (0,) * nd)


def fused_forward(prep, x):
    B, S, IN = x.shape
    operands = (
        x,
        prep["emb_w"], prep["emb_b"], prep["pe"],
        prep["wqkv"], prep["bqkv"], prep["wo"], prep["bo"],
        prep["ln1_w"], prep["ln1_b"], prep["w1"], prep["b1"],
        prep["w2"], prep["b2"], prep["ln2_w"], prep["ln2_b"],
        prep["fc_w"], prep["fc_b"], prep["fc2_w"], prep["fc2_b"],
    )
    in_specs = [pl.BlockSpec((1, S, IN), lambda b: (b, 0, 0))]
    in_specs += [_bcast_spec(w) for w in operands[1:]]

    out = pl.pallas_call(
        fused_kernel,
        out_shape=jax.ShapeDtypeStruct((B, 1, OUT_PAD), jnp.float32),
        grid=(B,),
        in_specs=in_specs,
        out_specs=pl.BlockSpec((1, 1, OUT_PAD), lambda b: (b, 0, 0)),
        compiler_params=pltpu.CompilerParams(dimension_semantics=("parallel",)),
    )(*operands)
    return out[:, 0, :1]                                          # [B, 1]


# ---------------------------------------------------------------------------
# One-time parameter preparation (layout for the TPU kernel)
# ---------------------------------------------------------------------------
def positional_encoding(seq_len, d_model):
    position = jnp.arange(seq_len, dtype=jnp.float32)[:, None]
    div_term = jnp.exp(jnp.arange(0, d_model, 2, dtype=jnp.float32)
                       * (-math.log(10000.0) / d_model))
    pe = jnp.zeros((seq_len, d_model), jnp.float32)
    pe = pe.at[:, 0::2].set(jnp.sin(position * div_term))
    pe = pe.at[:, 1::2].set(jnp.cos(position * div_term))
    return pe


def prepare_params(params, seq_len):
    scale = 1.0 / math.sqrt(HEAD_DIM)
    wqkv, bqkv, wo, bo = [], [], [], []
    ln1w, ln1b, w1, b1, w2, b2, ln2w, ln2b = [], [], [], [], [], [], [], []
    for lp in params["layers"]:
        wq = lp["wq"].T * scale                      # fold 1/sqrt(Dh) into Q
        bq = lp["bq"] * scale
        wqkv.append(jnp.concatenate([wq, lp["wk"].T, lp["wv"].T], axis=1))  # [D, 3D]
        bqkv.append(jnp.concatenate([bq, lp["bk"], lp["bv"]])[None, :])     # [1, 3D]
        wo.append(lp["wo"].T)
        bo.append(lp["bo"][None, :])
        ln1w.append(lp["ln1_w"][None, :]); ln1b.append(lp["ln1_b"][None, :])
        w1.append(lp["w1"].T);             b1.append(lp["b1"][None, :])
        w2.append(lp["w2"].T);             b2.append(lp["b2"][None, :])
        ln2w.append(lp["ln2_w"][None, :]); ln2b.append(lp["ln2_b"][None, :])

    fc2_w_pad = jnp.zeros((FC_HIDDEN, OUT_PAD), jnp.float32)
    fc2_w_pad = fc2_w_pad.at[:, :1].set(params["fc2_w"].T)
    fc2_b_pad = jnp.zeros((1, OUT_PAD), jnp.float32)
    fc2_b_pad = fc2_b_pad.at[:, :1].set(params["fc2_b"][None, :])

    return {
        "emb_w": params["emb_w"].T,                  # [IN, D]
        "emb_b": params["emb_b"][None, :],           # [1, D]
        "pe": positional_encoding(seq_len, D_MODEL),  # [S, D]
        "wqkv": jnp.stack(wqkv), "bqkv": jnp.stack(bqkv),
        "wo": jnp.stack(wo), "bo": jnp.stack(bo),
        "ln1_w": jnp.stack(ln1w), "ln1_b": jnp.stack(ln1b),
        "w1": jnp.stack(w1), "b1": jnp.stack(b1),
        "w2": jnp.stack(w2), "b2": jnp.stack(b2),
        "ln2_w": jnp.stack(ln2w), "ln2_b": jnp.stack(ln2b),
        "fc_w": params["fc_w"].T,                    # [D, 64]
        "fc_b": params["fc_b"][None, :],             # [1, 64]
        "fc2_w": fc2_w_pad,                          # [64, 128] (col 0 real)
        "fc2_b": fc2_b_pad,                          # [1, 128]  (col 0 real)
    }


# ---------------------------------------------------------------------------
# Parameters (deterministic synthetic init, PyTorch [out, in] convention)
# ---------------------------------------------------------------------------
def init_params(key, input_dim):
    keys = iter(jax.random.split(key, 64))

    def nrm(shape, scale=0.05):
        return scale * jax.random.normal(next(keys), shape, jnp.float32)

    params = {
        "emb_w": nrm((D_MODEL, input_dim)),
        "emb_b": nrm((D_MODEL,)),
        "layers": [],
        "fc_w": nrm((FC_HIDDEN, D_MODEL)),
        "fc_b": nrm((FC_HIDDEN,)),
        "fc2_w": nrm((1, FC_HIDDEN)),
        "fc2_b": nrm((1,)),
    }
    for _ in range(NUM_LAYERS):
        params["layers"].append(dict(
            wq=nrm((D_MODEL, D_MODEL)), bq=nrm((D_MODEL,)),
            wk=nrm((D_MODEL, D_MODEL)), bk=nrm((D_MODEL,)),
            wv=nrm((D_MODEL, D_MODEL)), bv=nrm((D_MODEL,)),
            wo=nrm((D_MODEL, D_MODEL)), bo=nrm((D_MODEL,)),
            ln1_w=jnp.ones((D_MODEL,), jnp.float32),
            ln1_b=jnp.zeros((D_MODEL,), jnp.float32),
            w1=nrm((DIM_FF, D_MODEL)), b1=nrm((DIM_FF,)),
            w2=nrm((D_MODEL, DIM_FF)), b2=nrm((D_MODEL,)),
            ln2_w=jnp.ones((D_MODEL,), jnp.float32),
            ln2_b=jnp.zeros((D_MODEL,), jnp.float32),
        ))
    return params


# ---------------------------------------------------------------------------
# Pure-JAX reference (for correctness check)
# ---------------------------------------------------------------------------
def reference_forward(params, x):
    hp = lax.Precision.HIGHEST

    def lin(t, w, b):
        return jnp.dot(t, w.T, precision=hp) + b

    def ln(t, w, b):
        mu = jnp.mean(t, axis=-1, keepdims=True)
        var = jnp.mean(jnp.square(t - mu), axis=-1, keepdims=True)
        return (t - mu) * lax.rsqrt(var + LN_EPS) * w + b

    B, S, _ = x.shape
    h = lin(x, params["emb_w"], params["emb_b"]) + positional_encoding(S, D_MODEL)[None]
    for lp in params["layers"]:
        q = lin(h, lp["wq"], lp["bq"])
        k = lin(h, lp["wk"], lp["bk"])
        v = lin(h, lp["wv"], lp["bv"])

        def split(t):
            return t.reshape(B, S, NHEAD, HEAD_DIM).transpose(0, 2, 1, 3)

        qh, kh, vh = split(q), split(k), split(v)
        s = jnp.einsum("bhqd,bhkd->bhqk", qh, kh, precision=hp) / math.sqrt(HEAD_DIM)
        p = jax.nn.softmax(s, axis=-1)
        o = jnp.einsum("bhqk,bhkd->bhqd", p, vh, precision=hp)
        o = o.transpose(0, 2, 1, 3).reshape(B, S, D_MODEL)
        o = lin(o, lp["wo"], lp["bo"])
        h = ln(h + o, lp["ln1_w"], lp["ln1_b"])
        f = jnp.maximum(lin(h, lp["w1"], lp["b1"]), 0.0)
        f = lin(f, lp["w2"], lp["b2"])
        h = ln(h + f, lp["ln2_w"], lp["ln2_b"])
    m = h.mean(axis=1)
    y = jnp.maximum(lin(m, params["fc_w"], params["fc_b"]), 0.0)
    return lin(y, params["fc2_w"], params["fc2_b"])


# ---------------------------------------------------------------------------
if __name__ == "__main__":
    BATCH, SEQ, INPUT_DIM = 2, 8, 16   # small shapes consistent with the module

    key = jax.random.PRNGKey(0)
    k_param, k_x = jax.random.split(key)
    params = init_params(k_param, INPUT_DIM)
    x = jax.random.normal(k_x, (BATCH, SEQ, INPUT_DIM), jnp.float32)

    prep = prepare_params(params, SEQ)          # one-time weight layout prep
    out = fused_forward(prep, x)
    out = jax.block_until_ready(out)
    assert out.shape == (BATCH, 1), out.shape

    ref = jax.block_until_ready(reference_forward(params, x))
    assert jnp.allclose(out, ref, rtol=2e-2, atol=2e-2), (out, ref)

    print("KERNEL_OK")
</pallas_src>

<mosaic_0001>
module attributes {stable_mosaic.version = 11 : i64} {
  func.func @fused_kernel(%arg0: i32, %arg1: memref<1x8x16xf32, #tpu.memory_space<vmem>>, %arg2: memref<16x128xf32, #tpu.memory_space<vmem>>, %arg3: memref<1x128xf32, #tpu.memory_space<vmem>>, %arg4: memref<8x128xf32, #tpu.memory_space<vmem>>, %arg5: memref<4x128x384xf32, #tpu.memory_space<vmem>>, %arg6: memref<4x1x384xf32, #tpu.memory_space<vmem>>, %arg7: memref<4x128x128xf32, #tpu.memory_space<vmem>>, %arg8: memref<4x1x128xf32, #tpu.memory_space<vmem>>, %arg9: memref<4x1x128xf32, #tpu.memory_space<vmem>>, %arg10: memref<4x1x128xf32, #tpu.memory_space<vmem>>, %arg11: memref<4x128x256xf32, #tpu.memory_space<vmem>>, %arg12: memref<4x1x256xf32, #tpu.memory_space<vmem>>, %arg13: memref<4x256x128xf32, #tpu.memory_space<vmem>>, %arg14: memref<4x1x128xf32, #tpu.memory_space<vmem>>, %arg15: memref<4x1x128xf32, #tpu.memory_space<vmem>>, %arg16: memref<4x1x128xf32, #tpu.memory_space<vmem>>, %arg17: memref<128x64xf32, #tpu.memory_space<vmem>>, %arg18: memref<1x64xf32, #tpu.memory_space<vmem>>, %arg19: memref<64x128xf32, #tpu.memory_space<vmem>>, %arg20: memref<1x128xf32, #tpu.memory_space<vmem>>, %arg21: memref<1x1x128xf32, #tpu.memory_space<vmem>>) attributes {dimension_semantics = [#tpu.dimension_semantics<parallel>], iteration_bounds = array<i64: 2>, scalar_prefetch = 0 : i64, scratch_operands = 0 : i64, tpu.core_type = #tpu.core_type<tc>, window_params = [{transform_indices = @transform_0, window_bounds = array<i64: 1, 8, 16>}, {pipeline_mode = #tpu.pipeline_mode<synchronous>, transform_indices = @transform_1, window_bounds = array<i64: 16, 128>}, {pipeline_mode = #tpu.pipeline_mode<synchronous>, transform_indices = @transform_2, window_bounds = array<i64: 1, 128>}, {pipeline_mode = #tpu.pipeline_mode<synchronous>, transform_indices = @transform_3, window_bounds = array<i64: 8, 128>}, {pipeline_mode = #tpu.pipeline_mode<synchronous>, transform_indices = @transform_4, window_bounds = array<i64: 4, 128, 384>}, {pipeline_mode = #tpu.pipeline_mode<synchronous>, transform_indices = @transform_5, window_bounds = array<i64: 4, 1, 384>}, {pipeline_mode = #tpu.pipeline_mode<synchronous>, transform_indices = @transform_6, window_bounds = array<i64: 4, 128, 128>}, {pipeline_mode = #tpu.pipeline_mode<synchronous>, transform_indices = @transform_7, window_bounds = array<i64: 4, 1, 128>}, {pipeline_mode = #tpu.pipeline_mode<synchronous>, transform_indices = @transform_8, window_bounds = array<i64: 4, 1, 128>}, {pipeline_mode = #tpu.pipeline_mode<synchronous>, transform_indices = @transform_9, window_bounds = array<i64: 4, 1, 128>}, {pipeline_mode = #tpu.pipeline_mode<synchronous>, transform_indices = @transform_10, window_bounds = array<i64: 4, 128, 256>}, {pipeline_mode = #tpu.pipeline_mode<synchronous>, transform_indices = @transform_11, window_bounds = array<i64: 4, 1, 256>}, {pipeline_mode = #tpu.pipeline_mode<synchronous>, transform_indices = @transform_12, window_bounds = array<i64: 4, 256, 128>}, {pipeline_mode = #tpu.pipeline_mode<synchronous>, transform_indices = @transform_13, window_bounds = array<i64: 4, 1, 128>}, {pipeline_mode = #tpu.pipeline_mode<synchronous>, transform_indices = @transform_14, window_bounds = array<i64: 4, 1, 128>}, {pipeline_mode = #tpu.pipeline_mode<synchronous>, transform_indices = @transform_15, window_bounds = array<i64: 4, 1, 128>}, {pipeline_mode = #tpu.pipeline_mode<synchronous>, transform_indices = @transform_16, window_bounds = array<i64: 128, 64>}, {pipeline_mode = #tpu.pipeline_mode<synchronous>, transform_indices = @transform_17, window_bounds = array<i64: 1, 64>}, {pipeline_mode = #tpu.pipeline_mode<synchronous>, transform_indices = @transform_18, window_bounds = array<i64: 64, 128>}, {pipeline_mode = #tpu.pipeline_mode<synchronous>, transform_indices = @transform_19, window_bounds = array<i64: 1, 128>}, {transform_indices = @transform_20, window_bounds = array<i64: 1, 1, 128>}]} {
    %c0 = arith.constant 0 : index
    %c0_0 = arith.constant 0 : index
    %c0_1 = arith.constant 0 : index
    %0 = vector.load %arg1[%c0, %c0_0, %c0_1] : memref<1x8x16xf32, #tpu.memory_space<vmem>>, vector<1x8x16xf32>
    %1 = vector.shape_cast %0 : vector<1x8x16xf32> to vector<8x16xf32>
    %c0_2 = arith.constant 0 : index
    %c0_3 = arith.constant 0 : index
    %2 = vector.load %arg2[%c0_2, %c0_3] : memref<16x128xf32, #tpu.memory_space<vmem>>, vector<16x128xf32>
    %cst = arith.constant dense<0.000000e+00> : vector<8x128xf32>
    %3 = tpu.matmul %1, %2, %cst {dimension_numbers = #tpu.dot_dimension_numbers<[1], [0], [0], [1], [0, 0, 1, 1], [], []>} : vector<8x16xf32>, vector<16x128xf32>, vector<8x128xf32> -> vector<8x128xf32>
    %c0_4 = arith.constant 0 : index
    %c0_5 = arith.constant 0 : index
    %4 = vector.load %arg3[%c0_4, %c0_5] : memref<1x128xf32, #tpu.memory_space<vmem>>, vector<1x128xf32>
    %5 = vector.broadcast %4 : vector<1x128xf32> to vector<8x128xf32>
    %6 = arith.addf %3, %5 : vector<8x128xf32>
    %c0_6 = arith.constant 0 : index
    %c0_7 = arith.constant 0 : index
    %7 = vector.load %arg4[%c0_6, %c0_7] : memref<8x128xf32, #tpu.memory_space<vmem>>, vector<8x128xf32>
    %8 = arith.addf %6, %7 : vector<8x128xf32>
    %c0_8 = arith.constant 0 : index
    %c0_9 = arith.constant 0 : index
    %c0_10 = arith.constant 0 : index
    %9 = vector.load %arg5[%c0_8, %c0_9, %c0_10] : memref<4x128x384xf32, #tpu.memory_space<vmem>>, vector<1x128x384xf32>
    %10 = vector.shape_cast %9 : vector<1x128x384xf32> to vector<128x384xf32>
    %cst_11 = arith.constant dense<0.000000e+00> : vector<8x384xf32>
    %11 = tpu.matmul %8, %10, %cst_11 {dimension_numbers = #tpu.dot_dimension_numbers<[1], [0], [0], [1], [0, 0, 1, 1], [], []>} : vector<8x128xf32>, vector<128x384xf32>, vector<8x384xf32> -> vector<8x384xf32>
    %c0_12 = arith.constant 0 : index
    %c0_13 = arith.constant 0 : index
    %c0_14 = arith.constant 0 : index
    %12 = vector.load %arg6[%c0_12, %c0_13, %c0_14] : memref<4x1x384xf32, #tpu.memory_space<vmem>>, vector<1x1x384xf32>
    %13 = vector.shape_cast %12 : vector<1x1x384xf32> to vector<1x384xf32>
    %14 = vector.broadcast %13 : vector<1x384xf32> to vector<8x384xf32>
    %15 = arith.addf %11, %14 : vector<8x384xf32>
    %16 = vector.extract_strided_slice %15 {offsets = [0, 0], sizes = [8, 16], strides = [1, 1]} : vector<8x384xf32> to vector<8x16xf32>
    %17 = vector.extract_strided_slice %15 {offsets = [0, 128], sizes = [8, 16], strides = [1, 1]} : vector<8x384xf32> to vector<8x16xf32>
    %18 = vector.extract_strided_slice %15 {offsets = [0, 256], sizes = [8, 16], strides = [1, 1]} : vector<8x384xf32> to vector<8x16xf32>
    %cst_15 = arith.constant dense<0.000000e+00> : vector<8x8xf32>
    %19 = tpu.matmul %16, %17, %cst_15 {dimension_numbers = #tpu.dot_dimension_numbers<[1], [1], [0], [0], [0, 0, 1, 0], [], []>} : vector<8x16xf32>, vector<8x16xf32>, vector<8x8xf32> -> vector<8x8xf32>
    %cst_16 = arith.constant dense<0xFF800000> : vector<8xf32>
    %20 = vector.multi_reduction <maximumf>, %19, %cst_16 [1] : vector<8x8xf32> to vector<8xf32>
    %21 = vector.shape_cast %20 : vector<8xf32> to vector<8x1xf32>
    %22 = vector.broadcast %21 : vector<8x1xf32> to vector<8x8xf32>
    %23 = arith.subf %19, %22 : vector<8x8xf32>
    %24 = math.exp %23 : vector<8x8xf32>
    %cst_17 = arith.constant dense<0.000000e+00> : vector<8xf32>
    %25 = vector.multi_reduction <add>, %24, %cst_17 [1] : vector<8x8xf32> to vector<8xf32>
    %26 = vector.shape_cast %25 : vector<8xf32> to vector<8x1xf32>
    %27 = tpu.reciprocal %26 {approx = true} : vector<8x1xf32> -> vector<8x1xf32>
    %28 = vector.broadcast %27 : vector<8x1xf32> to vector<8x8xf32>
    %29 = arith.mulf %24, %28 : vector<8x8xf32>
    %cst_18 = arith.constant dense<0.000000e+00> : vector<8x16xf32>
    %30 = tpu.matmul %29, %18, %cst_18 {dimension_numbers = #tpu.dot_dimension_numbers<[1], [0], [0], [1], [0, 0, 1, 1], [], []>} : vector<8x8xf32>, vector<8x16xf32>, vector<8x16xf32> -> vector<8x16xf32>
    %31 = vector.extract_strided_slice %15 {offsets = [0, 16], sizes = [8, 16], strides = [1, 1]} : vector<8x384xf32> to vector<8x16xf32>
    %32 = vector.extract_strided_slice %15 {offsets = [0, 144], sizes = [8, 16], strides = [1, 1]} : vector<8x384xf32> to vector<8x16xf32>
    %33 = vector.extract_strided_slice %15 {offsets = [0, 272], sizes = [8, 16], strides = [1, 1]} : vector<8x384xf32> to vector<8x16xf32>
    %cst_19 = arith.constant dense<0.000000e+00> : vector<8x8xf32>
    %34 = tpu.matmul %31, %32, %cst_19 {dimension_numbers = #tpu.dot_dimension_numbers<[1], [1], [0], [0], [0, 0, 1, 0], [], []>} : vector<8x16xf32>, vector<8x16xf32>, vector<8x8xf32> -> vector<8x8xf32>
    %cst_20 = arith.constant dense<0xFF800000> : vector<8xf32>
    %35 = vector.multi_reduction <maximumf>, %34, %cst_20 [1] : vector<8x8xf32> to vector<8xf32>
    %36 = vector.shape_cast %35 : vector<8xf32> to vector<8x1xf32>
    %37 = vector.broadcast %36 : vector<8x1xf32> to vector<8x8xf32>
    %38 = arith.subf %34, %37 : vector<8x8xf32>
    %39 = math.exp %38 : vector<8x8xf32>
    %cst_21 = arith.constant dense<0.000000e+00> : vector<8xf32>
    %40 = vector.multi_reduction <add>, %39, %cst_21 [1] : vector<8x8xf32> to vector<8xf32>
    %41 = vector.shape_cast %40 : vector<8xf32> to vector<8x1xf32>
    %42 = tpu.reciprocal %41 {approx = true} : vector<8x1xf32> -> vector<8x1xf32>
    %43 = vector.broadcast %42 : vector<8x1xf32> to vector<8x8xf32>
    %44 = arith.mulf %39, %43 : vector<8x8xf32>
    %cst_22 = arith.constant dense<0.000000e+00> : vector<8x16xf32>
    %45 = tpu.matmul %44, %33, %cst_22 {dimension_numbers = #tpu.dot_dimension_numbers<[1], [0], [0], [1], [0, 0, 1, 1], [], []>} : vector<8x8xf32>, vector<8x16xf32>, vector<8x16xf32> -> vector<8x16xf32>
    %46 = vector.extract_strided_slice %15 {offsets = [0, 32], sizes = [8, 16], strides = [1, 1]} : vector<8x384xf32> to vector<8x16xf32>
    %47 = vector.extract_strided_slice %15 {offsets = [0, 160], sizes = [8, 16], strides = [1, 1]} : vector<8x384xf32> to vector<8x16xf32>
    %48 = vector.extract_strided_slice %15 {offsets = [0, 288], sizes = [8, 16], strides = [1, 1]} : vector<8x384xf32> to vector<8x16xf32>
    %cst_23 = arith.constant dense<0.000000e+00> : vector<8x8xf32>
    %49 = tpu.matmul %46, %47, %cst_23 {dimension_numbers = #tpu.dot_dimension_numbers<[1], [1], [0], [0], [0, 0, 1, 0], [], []>} : vector<8x16xf32>, vector<8x16xf32>, vector<8x8xf32> -> vector<8x8xf32>
    %cst_24 = arith.constant dense<0xFF800000> : vector<8xf32>
    %50 = vector.multi_reduction <maximumf>, %49, %cst_24 [1] : vector<8x8xf32> to vector<8xf32>
    %51 = vector.shape_cast %50 : vector<8xf32> to vector<8x1xf32>
    %52 = vector.broadcast %51 : vector<8x1xf32> to vector<8x8xf32>
    %53 = arith.subf %49, %52 : vector<8x8xf32>
    %54 = math.exp %53 : vector<8x8xf32>
    %cst_25 = arith.constant dense<0.000000e+00> : vector<8xf32>
    %55 = vector.multi_reduction <add>, %54, %cst_25 [1] : vector<8x8xf32> to vector<8xf32>
    %56 = vector.shape_cast %55 : vector<8xf32> to vector<8x1xf32>
    %57 = tpu.reciprocal %56 {approx = true} : vector<8x1xf32> -> vector<8x1xf32>
    %58 = vector.broadcast %57 : vector<8x1xf32> to vector<8x8xf32>
    %59 = arith.mulf %54, %58 : vector<8x8xf32>
    %cst_26 = arith.constant dense<0.000000e+00> : vector<8x16xf32>
    %60 = tpu.matmul %59, %48, %cst_26 {dimension_numbers = #tpu.dot_dimension_numbers<[1], [0], [0], [1], [0, 0, 1, 1], [], []>} : vector<8x8xf32>, vector<8x16xf32>, vector<8x16xf32> -> vector<8x16xf32>
    %61 = vector.extract_strided_slice %15 {offsets = [0, 48], sizes = [8, 16], strides = [1, 1]} : vector<8x384xf32> to vector<8x16xf32>
    %62 = vector.extract_strided_slice %15 {offsets = [0, 176], sizes = [8, 16], strides = [1, 1]} : vector<8x384xf32> to vector<8x16xf32>
    %63 = vector.extract_strided_slice %15 {offsets = [0, 304], sizes = [8, 16], strides = [1, 1]} : vector<8x384xf32> to vector<8x16xf32>
    %cst_27 = arith.constant dense<0.000000e+00> : vector<8x8xf32>
    %64 = tpu.matmul %61, %62, %cst_27 {dimension_numbers = #tpu.dot_dimension_numbers<[1], [1], [0], [0], [0, 0, 1, 0], [], []>} : vector<8x16xf32>, vector<8x16xf32>, vector<8x8xf32> -> vector<8x8xf32>
    %cst_28 = arith.constant dense<0xFF800000> : vector<8xf32>
    %65 = vector.multi_reduction <maximumf>, %64, %cst_28 [1] : vector<8x8xf32> to vector<8xf32>
    %66 = vector.shape_cast %65 : vector<8xf32> to vector<8x1xf32>
    %67 = vector.broadcast %66 : vector<8x1xf32> to vector<8x8xf32>
    %68 = arith.subf %64, %67 : vector<8x8xf32>
    %69 = math.exp %68 : vector<8x8xf32>
    %cst_29 = arith.constant dense<0.000000e+00> : vector<8xf32>
    %70 = vector.multi_reduction <add>, %69, %cst_29 [1] : vector<8x8xf32> to vector<8xf32>
    %71 = vector.shape_cast %70 : vector<8xf32> to vector<8x1xf32>
    %72 = tpu.reciprocal %71 {approx = true} : vector<8x1xf32> -> vector<8x1xf32>
    %73 = vector.broadcast %72 : vector<8x1xf32> to vector<8x8xf32>
    %74 = arith.mulf %69, %73 : vector<8x8xf32>
    %cst_30 = arith.constant dense<0.000000e+00> : vector<8x16xf32>
    %75 = tpu.matmul %74, %63, %cst_30 {dimension_numbers = #tpu.dot_dimension_numbers<[1], [0], [0], [1], [0, 0, 1, 1], [], []>} : vector<8x8xf32>, vector<8x16xf32>, vector<8x16xf32> -> vector<8x16xf32>
    %76 = vector.extract_strided_slice %15 {offsets = [0, 64], sizes = [8, 16], strides = [1, 1]} : vector<8x384xf32> to vector<8x16xf32>
    %77 = vector.extract_strided_slice %15 {offsets = [0, 192], sizes = [8, 16], strides = [1, 1]} : vector<8x384xf32> to vector<8x16xf32>
    %78 = vector.extract_strided_slice %15 {offsets = [0, 320], sizes = [8, 16], strides = [1, 1]} : vector<8x384xf32> to vector<8x16xf32>
    %cst_31 = arith.constant dense<0.000000e+00> : vector<8x8xf32>
    %79 = tpu.matmul %76, %77, %cst_31 {dimension_numbers = #tpu.dot_dimension_numbers<[1], [1], [0], [0], [0, 0, 1, 0], [], []>} : vector<8x16xf32>, vector<8x16xf32>, vector<8x8xf32> -> vector<8x8xf32>
    %cst_32 = arith.constant dense<0xFF800000> : vector<8xf32>
    %80 = vector.multi_reduction <maximumf>, %79, %cst_32 [1] : vector<8x8xf32> to vector<8xf32>
    %81 = vector.shape_cast %80 : vector<8xf32> to vector<8x1xf32>
    %82 = vector.broadcast %81 : vector<8x1xf32> to vector<8x8xf32>
    %83 = arith.subf %79, %82 : vector<8x8xf32>
    %84 = math.exp %83 : vector<8x8xf32>
    %cst_33 = arith.constant dense<0.000000e+00> : vector<8xf32>
    %85 = vector.multi_reduction <add>, %84, %cst_33 [1] : vector<8x8xf32> to vector<8xf32>
    %86 = vector.shape_cast %85 : vector<8xf32> to vector<8x1xf32>
    %87 = tpu.reciprocal %86 {approx = true} : vector<8x1xf32> -> vector<8x1xf32>
    %88 = vector.broadcast %87 : vector<8x1xf32> to vector<8x8xf32>
    %89 = arith.mulf %84, %88 : vector<8x8xf32>
    %cst_34 = arith.constant dense<0.000000e+00> : vector<8x16xf32>
    %90 = tpu.matmul %89, %78, %cst_34 {dimension_numbers = #tpu.dot_dimension_numbers<[1], [0], [0], [1], [0, 0, 1, 1], [], []>} : vector<8x8xf32>, vector<8x16xf32>, vector<8x16xf32> -> vector<8x16xf32>
    %91 = vector.extract_strided_slice %15 {offsets = [0, 80], sizes = [8, 16], strides = [1, 1]} : vector<8x384xf32> to vector<8x16xf32>
    %92 = vector.extract_strided_slice %15 {offsets = [0, 208], sizes = [8, 16], strides = [1, 1]} : vector<8x384xf32> to vector<8x16xf32>
    %93 = vector.extract_strided_slice %15 {offsets = [0, 336], sizes = [8, 16], strides = [1, 1]} : vector<8x384xf32> to vector<8x16xf32>
    %cst_35 = arith.constant dense<0.000000e+00> : vector<8x8xf32>
    %94 = tpu.matmul %91, %92, %cst_35 {dimension_numbers = #tpu.dot_dimension_numbers<[1], [1], [0], [0], [0, 0, 1, 0], [], []>} : vector<8x16xf32>, vector<8x16xf32>, vector<8x8xf32> -> vector<8x8xf32>
    %cst_36 = arith.constant dense<0xFF800000> : vector<8xf32>
    %95 = vector.multi_reduction <maximumf>, %94, %cst_36 [1] : vector<8x8xf32> to vector<8xf32>
    %96 = vector.shape_cast %95 : vector<8xf32> to vector<8x1xf32>
    %97 = vector.broadcast %96 : vector<8x1xf32> to vector<8x8xf32>
    %98 = arith.subf %94, %97 : vector<8x8xf32>
    %99 = math.exp %98 : vector<8x8xf32>
    %cst_37 = arith.constant dense<0.000000e+00> : vector<8xf32>
    %100 = vector.multi_reduction <add>, %99, %cst_37 [1] : vector<8x8xf32> to vector<8xf32>
    %101 = vector.shape_cast %100 : vector<8xf32> to vector<8x1xf32>
    %102 = tpu.reciprocal %101 {approx = true} : vector<8x1xf32> -> vector<8x1xf32>
    %103 = vector.broadcast %102 : vector<8x1xf32> to vector<8x8xf32>
    %104 = arith.mulf %99, %103 : vector<8x8xf32>
    %cst_38 = arith.constant dense<0.000000e+00> : vector<8x16xf32>
    %105 = tpu.matmul %104, %93, %cst_38 {dimension_numbers = #tpu.dot_dimension_numbers<[1], [0], [0], [1], [0, 0, 1, 1], [], []>} : vector<8x8xf32>, vector<8x16xf32>, vector<8x16xf32> -> vector<8x16xf32>
    %106 = vector.extract_strided_slice %15 {offsets = [0, 96], sizes = [8, 16], strides = [1, 1]} : vector<8x384xf32> to vector<8x16xf32>
    %107 = vector.extract_strided_slice %15 {offsets = [0, 224], sizes = [8, 16], strides = [1, 1]} : vector<8x384xf32> to vector<8x16xf32>
    %108 = vector.extract_strided_slice %15 {offsets = [0, 352], sizes = [8, 16], strides = [1, 1]} : vector<8x384xf32> to vector<8x16xf32>
    %cst_39 = arith.constant dense<0.000000e+00> : vector<8x8xf32>
    %109 = tpu.matmul %106, %107, %cst_39 {dimension_numbers = #tpu.dot_dimension_numbers<[1], [1], [0], [0], [0, 0, 1, 0], [], []>} : vector<8x16xf32>, vector<8x16xf32>, vector<8x8xf32> -> vector<8x8xf32>
    %cst_40 = arith.constant dense<0xFF800000> : vector<8xf32>
    %110 = vector.multi_reduction <maximumf>, %109, %cst_40 [1] : vector<8x8xf32> to vector<8xf32>
    %111 = vector.shape_cast %110 : vector<8xf32> to vector<8x1xf32>
    %112 = vector.broadcast %111 : vector<8x1xf32> to vector<8x8xf32>
    %113 = arith.subf %109, %112 : vector<8x8xf32>
    %114 = math.exp %113 : vector<8x8xf32>
    %cst_41 = arith.constant dense<0.000000e+00> : vector<8xf32>
    %115 = vector.multi_reduction <add>, %114, %cst_41 [1] : vector<8x8xf32> to vector<8xf32>
    %116 = vector.shape_cast %115 : vector<8xf32> to vector<8x1xf32>
    %117 = tpu.reciprocal %116 {approx = true} : vector<8x1xf32> -> vector<8x1xf32>
    %118 = vector.broadcast %117 : vector<8x1xf32> to vector<8x8xf32>
    %119 = arith.mulf %114, %118 : vector<8x8xf32>
    %cst_42 = arith.constant dense<0.000000e+00> : vector<8x16xf32>
    %120 = tpu.matmul %119, %108, %cst_42 {dimension_numbers = #tpu.dot_dimension_numbers<[1], [0], [0], [1], [0, 0, 1, 1], [], []>} : vector<8x8xf32>, vector<8x16xf32>, vector<8x16xf32> -> vector<8x16xf32>
    %121 = vector.extract_strided_slice %15 {offsets = [0, 112], sizes = [8, 16], strides = [1, 1]} : vector<8x384xf32> to vector<8x16xf32>
    %122 = vector.extract_strided_slice %15 {offsets = [0, 240], sizes = [8, 16], strides = [1, 1]} : vector<8x384xf32> to vector<8x16xf32>
    %123 = vector.extract_strided_slice %15 {offsets = [0, 368], sizes = [8, 16], strides = [1, 1]} : vector<8x384xf32> to vector<8x16xf32>
    %cst_43 = arith.constant dense<0.000000e+00> : vector<8x8xf32>
    %124 = tpu.matmul %121, %122, %cst_43 {dimension_numbers = #tpu.dot_dimension_numbers<[1], [1], [0], [0], [0, 0, 1, 0], [], []>} : vector<8x16xf32>, vector<8x16xf32>, vector<8x8xf32> -> vector<8x8xf32>
    %cst_44 = arith.constant dense<0xFF800000> : vector<8xf32>
    %125 = vector.multi_reduction <maximumf>, %124, %cst_44 [1] : vector<8x8xf32> to vector<8xf32>
    %126 = vector.shape_cast %125 : vector<8xf32> to vector<8x1xf32>
    %127 = vector.broadcast %126 : vector<8x1xf32> to vector<8x8xf32>
    %128 = arith.subf %124, %127 : vector<8x8xf32>
    %129 = math.exp %128 : vector<8x8xf32>
    %cst_45 = arith.constant dense<0.000000e+00> : vector<8xf32>
    %130 = vector.multi_reduction <add>, %129, %cst_45 [1] : vector<8x8xf32> to vector<8xf32>
    %131 = vector.shape_cast %130 : vector<8xf32> to vector<8x1xf32>
    %132 = tpu.reciprocal %131 {approx = true} : vector<8x1xf32> -> vector<8x1xf32>
    %133 = vector.broadcast %132 : vector<8x1xf32> to vector<8x8xf32>
    %134 = arith.mulf %129, %133 : vector<8x8xf32>
    %cst_46 = arith.constant dense<0.000000e+00> : vector<8x16xf32>
    %135 = tpu.matmul %134, %123, %cst_46 {dimension_numbers = #tpu.dot_dimension_numbers<[1], [0], [0], [1], [0, 0, 1, 1], [], []>} : vector<8x8xf32>, vector<8x16xf32>, vector<8x16xf32> -> vector<8x16xf32>
    %136 = tpu.concatenate %30, %45, %60, %75, %90, %105, %120, %135 in 1 : vector<8x16xf32>, vector<8x16xf32>, vector<8x16xf32>, vector<8x16xf32>, vector<8x16xf32>, vector<8x16xf32>, vector<8x16xf32>, vector<8x16xf32> -> vector<8x128xf32>
    %c0_47 = arith.constant 0 : index
    %c0_48 = arith.constant 0 : index
    %c0_49 = arith.constant 0 : index
    %137 = vector.load %arg7[%c0_47, %c0_48, %c0_49] : memref<4x128x128xf32, #tpu.memory_space<vmem>>, vector<1x128x128xf32>
    %138 = vector.shape_cast %137 : vector<1x128x128xf32> to vector<128x128xf32>
    %cst_50 = arith.constant dense<0.000000e+00> : vector<8x128xf32>
    %139 = tpu.matmul %136, %138, %cst_50 {dimension_numbers = #tpu.dot_dimension_numbers<[1], [0], [0], [1], [0, 0, 1, 1], [], []>} : vector<8x128xf32>, vector<128x128xf32>, vector<8x128xf32> -> vector<8x128xf32>
    %c0_51 = arith.constant 0 : index
    %c0_52 = arith.constant 0 : index
    %c0_53 = arith.constant 0 : index
    %140 = vector.load %arg8[%c0_51, %c0_52, %c0_53] : memref<4x1x128xf32, #tpu.memory_space<vmem>>, vector<1x1x128xf32>
    %141 = vector.shape_cast %140 : vector<1x1x128xf32> to vector<1x128xf32>
    %142 = vector.broadcast %141 : vector<1x128xf32> to vector<8x128xf32>
    %143 = arith.addf %139, %142 : vector<8x128xf32>
    %144 = arith.addf %8, %143 : vector<8x128xf32>
    %c0_54 = arith.constant 0 : index
    %c0_55 = arith.constant 0 : index
    %c0_56 = arith.constant 0 : index
    %145 = vector.load %arg9[%c0_54, %c0_55, %c0_56] : memref<4x1x128xf32, #tpu.memory_space<vmem>>, vector<1x1x128xf32>
    %146 = vector.shape_cast %145 : vector<1x1x128xf32> to vector<1x128xf32>
    %c0_57 = arith.constant 0 : index
    %c0_58 = arith.constant 0 : index
    %c0_59 = arith.constant 0 : index
    %147 = vector.load %arg10[%c0_57, %c0_58, %c0_59] : memref<4x1x128xf32, #tpu.memory_space<vmem>>, vector<1x1x128xf32>
    %148 = vector.shape_cast %147 : vector<1x1x128xf32> to vector<1x128xf32>
    %cst_60 = arith.constant dense<0.000000e+00> : vector<8xf32>
    %149 = vector.multi_reduction <add>, %144, %cst_60 [1] : vector<8x128xf32> to vector<8xf32>
    %150 = vector.shape_cast %149 : vector<8xf32> to vector<8x1xf32>
    %cst_61 = arith.constant 1.280000e+02 : f32
    %151 = vector.broadcast %cst_61 : f32 to vector<8x1xf32>
    %152 = arith.divf %150, %151 : vector<8x1xf32>
    %153 = vector.broadcast %152 : vector<8x1xf32> to vector<8x128xf32>
    %154 = arith.subf %144, %153 : vector<8x128xf32>
    %155 = arith.mulf %154, %154 : vector<8x128xf32>
    %cst_62 = arith.constant dense<0.000000e+00> : vector<8xf32>
    %156 = vector.multi_reduction <add>, %155, %cst_62 [1] : vector<8x128xf32> to vector<8xf32>
    %157 = vector.shape_cast %156 : vector<8xf32> to vector<8x1xf32>
    %cst_63 = arith.constant 1.280000e+02 : f32
    %158 = vector.broadcast %cst_63 : f32 to vector<8x1xf32>
    %159 = arith.divf %157, %158 : vector<8x1xf32>
    %160 = vector.broadcast %152 : vector<8x1xf32> to vector<8x128xf32>
    %161 = arith.subf %144, %160 : vector<8x128xf32>
    %cst_64 = arith.constant 9.99999974E-6 : f32
    %162 = vector.broadcast %cst_64 : f32 to vector<8x1xf32>
    %163 = arith.addf %159, %162 : vector<8x1xf32>
    %164 = math.rsqrt %163 : vector<8x1xf32>
    %165 = vector.broadcast %164 : vector<8x1xf32> to vector<8x128xf32>
    %166 = arith.mulf %161, %165 : vector<8x128xf32>
    %167 = vector.broadcast %146 : vector<1x128xf32> to vector<8x128xf32>
    %168 = arith.mulf %166, %167 : vector<8x128xf32>
    %169 = vector.broadcast %148 : vector<1x128xf32> to vector<8x128xf32>
    %170 = arith.addf %168, %169 : vector<8x128xf32>
    %c0_65 = arith.constant 0 : index
    %c0_66 = arith.constant 0 : index
    %c0_67 = arith.constant 0 : index
    %171 = vector.load %arg11[%c0_65, %c0_66, %c0_67] : memref<4x128x256xf32, #tpu.memory_space<vmem>>, vector<1x128x256xf32>
    %172 = vector.shape_cast %171 : vector<1x128x256xf32> to vector<128x256xf32>
    %cst_68 = arith.constant dense<0.000000e+00> : vector<8x256xf32>
    %173 = tpu.matmul %170, %172, %cst_68 {dimension_numbers = #tpu.dot_dimension_numbers<[1], [0], [0], [1], [0, 0, 1, 1], [], []>} : vector<8x128xf32>, vector<128x256xf32>, vector<8x256xf32> -> vector<8x256xf32>
    %c0_69 = arith.constant 0 : index
    %c0_70 = arith.constant 0 : index
    %c0_71 = arith.constant 0 : index
    %174 = vector.load %arg12[%c0_69, %c0_70, %c0_71] : memref<4x1x256xf32, #tpu.memory_space<vmem>>, vector<1x1x256xf32>
    %175 = vector.shape_cast %174 : vector<1x1x256xf32> to vector<1x256xf32>
    %176 = vector.broadcast %175 : vector<1x256xf32> to vector<8x256xf32>
    %177 = arith.addf %173, %176 : vector<8x256xf32>
    %cst_72 = arith.constant 0.000000e+00 : f32
    %178 = vector.broadcast %cst_72 : f32 to vector<8x256xf32>
    %179 = arith.maximumf %177, %178 : vector<8x256xf32>
    %c0_73 = arith.constant 0 : index
    %c0_74 = arith.constant 0 : index
    %c0_75 = arith.constant 0 : index
    %180 = vector.load %arg13[%c0_73, %c0_74, %c0_75] : memref<4x256x128xf32, #tpu.memory_space<vmem>>, vector<1x256x128xf32>
    %181 = vector.shape_cast %180 : vector<1x256x128xf32> to vector<256x128xf32>
    %cst_76 = arith.constant dense<0.000000e+00> : vector<8x128xf32>
    %182 = tpu.matmul %179, %181, %cst_76 {dimension_numbers = #tpu.dot_dimension_numbers<[1], [0], [0], [1], [0, 0, 1, 1], [], []>} : vector<8x256xf32>, vector<256x128xf32>, vector<8x128xf32> -> vector<8x128xf32>
    %c0_77 = arith.constant 0 : index
    %c0_78 = arith.constant 0 : index
    %c0_79 = arith.constant 0 : index
    %183 = vector.load %arg14[%c0_77, %c0_78, %c0_79] : memref<4x1x128xf32, #tpu.memory_space<vmem>>, vector<1x1x128xf32>
    %184 = vector.shape_cast %183 : vector<1x1x128xf32> to vector<1x128xf32>
    %185 = vector.broadcast %184 : vector<1x128xf32> to vector<8x128xf32>
    %186 = arith.addf %182, %185 : vector<8x128xf32>
    %187 = arith.addf %170, %186 : vector<8x128xf32>
    %c0_80 = arith.constant 0 : index
    %c0_81 = arith.constant 0 : index
    %c0_82 = arith.constant 0 : index
    %188 = vector.load %arg15[%c0_80, %c0_81, %c0_82] : memref<4x1x128xf32, #tpu.memory_space<vmem>>, vector<1x1x128xf32>
    %189 = vector.shape_cast %188 : vector<1x1x128xf32> to vector<1x128xf32>
    %c0_83 = arith.constant 0 : index
    %c0_84 = arith.constant 0 : index
    %c0_85 = arith.constant 0 : index
    %190 = vector.load %arg16[%c0_83, %c0_84, %c0_85] : memref<4x1x128xf32, #tpu.memory_space<vmem>>, vector<1x1x128xf32>
    %191 = vector.shape_cast %190 : vector<1x1x128xf32> to vector<1x128xf32>
    %cst_86 = arith.constant dense<0.000000e+00> : vector<8xf32>
    %192 = vector.multi_reduction <add>, %187, %cst_86 [1] : vector<8x128xf32> to vector<8xf32>
    %193 = vector.shape_cast %192 : vector<8xf32> to vector<8x1xf32>
    %cst_87 = arith.constant 1.280000e+02 : f32
    %194 = vector.broadcast %cst_87 : f32 to vector<8x1xf32>
    %195 = arith.divf %193, %194 : vector<8x1xf32>
    %196 = vector.broadcast %195 : vector<8x1xf32> to vector<8x128xf32>
    %197 = arith.subf %187, %196 : vector<8x128xf32>
    %198 = arith.mulf %197, %197 : vector<8x128xf32>
    %cst_88 = arith.constant dense<0.000000e+00> : vector<8xf32>
    %199 = vector.multi_reduction <add>, %198, %cst_88 [1] : vector<8x128xf32> to vector<8xf32>
    %200 = vector.shape_cast %199 : vector<8xf32> to vector<8x1xf32>
    %cst_89 = arith.constant 1.280000e+02 : f32
    %201 = vector.broadcast %cst_89 : f32 to vector<8x1xf32>
    %202 = arith.divf %200, %201 : vector<8x1xf32>
    %203 = vector.broadcast %195 : vector<8x1xf32> to vector<8x128xf32>
    %204 = arith.subf %187, %203 : vector<8x128xf32>
    %cst_90 = arith.constant 9.99999974E-6 : f32
    %205 = vector.broadcast %cst_90 : f32 to vector<8x1xf32>
    %206 = arith.addf %202, %205 : vector<8x1xf32>
    %207 = math.rsqrt %206 : vector<8x1xf32>
    %208 = vector.broadcast %207 : vector<8x1xf32> to vector<8x128xf32>
    %209 = arith.mulf %204, %208 : vector<8x128xf32>
    %210 = vector.broadcast %189 : vector<1x128xf32> to vector<8x128xf32>
    %211 = arith.mulf %209, %210 : vector<8x128xf32>
    %212 = vector.broadcast %191 : vector<1x128xf32> to vector<8x128xf32>
    %213 = arith.addf %211, %212 : vector<8x128xf32>
    %c1 = arith.constant 1 : index
    %c0_91 = arith.constant 0 : index
    %c0_92 = arith.constant 0 : index
    %214 = vector.load %arg5[%c1, %c0_91, %c0_92] : memref<4x128x384xf32, #tpu.memory_space<vmem>>, vector<1x128x384xf32>
    %215 = vector.shape_cast %214 : vector<1x128x384xf32> to vector<128x384xf32>
    %cst_93 = arith.constant dense<0.000000e+00> : vector<8x384xf32>
    %216 = tpu.matmul %213, %215, %cst_93 {dimension_numbers = #tpu.dot_dimension_numbers<[1], [0], [0], [1], [0, 0, 1, 1], [], []>} : vector<8x128xf32>, vector<128x384xf32>, vector<8x384xf32> -> vector<8x384xf32>
    %c1_94 = arith.constant 1 : index
    %c0_95 = arith.constant 0 : index
    %c0_96 = arith.constant 0 : index
    %217 = vector.load %arg6[%c1_94, %c0_95, %c0_96] : memref<4x1x384xf32, #tpu.memory_space<vmem>>, vector<1x1x384xf32>
    %218 = vector.shape_cast %217 : vector<1x1x384xf32> to vector<1x384xf32>
    %219 = vector.broadcast %218 : vector<1x384xf32> to vector<8x384xf32>
    %220 = arith.addf %216, %219 : vector<8x384xf32>
    %221 = vector.extract_strided_slice %220 {offsets = [0, 0], sizes = [8, 16], strides = [1, 1]} : vector<8x384xf32> to vector<8x16xf32>
    %222 = vector.extract_strided_slice %220 {offsets = [0, 128], sizes = [8, 16], strides = [1, 1]} : vector<8x384xf32> to vector<8x16xf32>
    %223 = vector.extract_strided_slice %220 {offsets = [0, 256], sizes = [8, 16], strides = [1, 1]} : vector<8x384xf32> to vector<8x16xf32>
    %cst_97 = arith.constant dense<0.000000e+00> : vector<8x8xf32>
    %224 = tpu.matmul %221, %222, %cst_97 {dimension_numbers = #tpu.dot_dimension_numbers<[1], [1], [0], [0], [0, 0, 1, 0], [], []>} : vector<8x16xf32>, vector<8x16xf32>, vector<8x8xf32> -> vector<8x8xf32>
    %cst_98 = arith.constant dense<0xFF800000> : vector<8xf32>
    %225 = vector.multi_reduction <maximumf>, %224, %cst_98 [1] : vector<8x8xf32> to vector<8xf32>
    %226 = vector.shape_cast %225 : vector<8xf32> to vector<8x1xf32>
    %227 = vector.broadcast %226 : vector<8x1xf32> to vector<8x8xf32>
    %228 = arith.subf %224, %227 : vector<8x8xf32>
    %229 = math.exp %228 : vector<8x8xf32>
    %cst_99 = arith.constant dense<0.000000e+00> : vector<8xf32>
    %230 = vector.multi_reduction <add>, %229, %cst_99 [1] : vector<8x8xf32> to vector<8xf32>
    %231 = vector.shape_cast %230 : vector<8xf32> to vector<8x1xf32>
    %232 = tpu.reciprocal %231 {approx = true} : vector<8x1xf32> -> vector<8x1xf32>
    %233 = vector.broadcast %232 : vector<8x1xf32> to vector<8x8xf32>
    %234 = arith.mulf %229, %233 : vector<8x8xf32>
    %cst_100 = arith.constant dense<0.000000e+00> : vector<8x16xf32>
    %235 = tpu.matmul %234, %223, %cst_100 {dimension_numbers = #tpu.dot_dimension_numbers<[1], [0], [0], [1], [0, 0, 1, 1], [], []>} : vector<8x8xf32>, vector<8x16xf32>, vector<8x16xf32> -> vector<8x16xf32>
    %236 = vector.extract_strided_slice %220 {offsets = [0, 16], sizes = [8, 16], strides = [1, 1]} : vector<8x384xf32> to vector<8x16xf32>
    %237 = vector.extract_strided_slice %220 {offsets = [0, 144], sizes = [8, 16], strides = [1, 1]} : vector<8x384xf32> to vector<8x16xf32>
    %238 = vector.extract_strided_slice %220 {offsets = [0, 272], sizes = [8, 16], strides = [1, 1]} : vector<8x384xf32> to vector<8x16xf32>
    %cst_101 = arith.constant dense<0.000000e+00> : vector<8x8xf32>
    %239 = tpu.matmul %236, %237, %cst_101 {dimension_numbers = #tpu.dot_dimension_numbers<[1], [1], [0], [0], [0, 0, 1, 0], [], []>} : vector<8x16xf32>, vector<8x16xf32>, vector<8x8xf32> -> vector<8x8xf32>
    %cst_102 = arith.constant dense<0xFF800000> : vector<8xf32>
    %240 = vector.multi_reduction <maximumf>, %239, %cst_102 [1] : vector<8x8xf32> to vector<8xf32>
    %241 = vector.shape_cast %240 : vector<8xf32> to vector<8x1xf32>
    %242 = vector.broadcast %241 : vector<8x1xf32> to vector<8x8xf32>
    %243 = arith.subf %239, %242 : vector<8x8xf32>
    %244 = math.exp %243 : vector<8x8xf32>
    %cst_103 = arith.constant dense<0.000000e+00> : vector<8xf32>
    %245 = vector.multi_reduction <add>, %244, %cst_103 [1] : vector<8x8xf32> to vector<8xf32>
    %246 = vector.shape_cast %245 : vector<8xf32> to vector<8x1xf32>
    %247 = tpu.reciprocal %246 {approx = true} : vector<8x1xf32> -> vector<8x1xf32>
    %248 = vector.broadcast %247 : vector<8x1xf32> to vector<8x8xf32>
    %249 = arith.mulf %244, %248 : vector<8x8xf32>
    %cst_104 = arith.constant dense<0.000000e+00> : vector<8x16xf32>
    %250 = tpu.matmul %249, %238, %cst_104 {dimension_numbers = #tpu.dot_dimension_numbers<[1], [0], [0], [1], [0, 0, 1, 1], [], []>} : vector<8x8xf32>, vector<8x16xf32>, vector<8x16xf32> -> vector<8x16xf32>
    %251 = vector.extract_strided_slice %220 {offsets = [0, 32], sizes = [8, 16], strides = [1, 1]} : vector<8x384xf32> to vector<8x16xf32>
    %252 = vector.extract_strided_slice %220 {offsets = [0, 160], sizes = [8, 16], strides = [1, 1]} : vector<8x384xf32> to vector<8x16xf32>
    %253 = vector.extract_strided_slice %220 {offsets = [0, 288], sizes = [8, 16], strides = [1, 1]} : vector<8x384xf32> to vector<8x16xf32>
    %cst_105 = arith.constant dense<0.000000e+00> : vector<8x8xf32>
    %254 = tpu.matmul %251, %252, %cst_105 {dimension_numbers = #tpu.dot_dimension_numbers<[1], [1], [0], [0], [0, 0, 1, 0], [], []>} : vector<8x16xf32>, vector<8x16xf32>, vector<8x8xf32> -> vector<8x8xf32>
    %cst_106 = arith.constant dense<0xFF800000> : vector<8xf32>
    %255 = vector.multi_reduction <maximumf>, %254, %cst_106 [1] : vector<8x8xf32> to vector<8xf32>
    %256 = vector.shape_cast %255 : vector<8xf32> to vector<8x1xf32>
    %257 = vector.broadcast %256 : vector<8x1xf32> to vector<8x8xf32>
    %258 = arith.subf %254, %257 : vector<8x8xf32>
    %259 = math.exp %258 : vector<8x8xf32>
    %cst_107 = arith.constant dense<0.000000e+00> : vector<8xf32>
    %260 = vector.multi_reduction <add>, %259, %cst_107 [1] : vector<8x8xf32> to vector<8xf32>
    %261 = vector.shape_cast %260 : vector<8xf32> to vector<8x1xf32>
    %262 = tpu.reciprocal %261 {approx = true} : vector<8x1xf32> -> vector<8x1xf32>
    %263 = vector.broadcast %262 : vector<8x1xf32> to vector<8x8xf32>
    %264 = arith.mulf %259, %263 : vector<8x8xf32>
    %cst_108 = arith.constant dense<0.000000e+00> : vector<8x16xf32>
    %265 = tpu.matmul %264, %253, %cst_108 {dimension_numbers = #tpu.dot_dimension_numbers<[1], [0], [0], [1], [0, 0, 1, 1], [], []>} : vector<8x8xf32>, vector<8x16xf32>, vector<8x16xf32> -> vector<8x16xf32>
    %266 = vector.extract_strided_slice %220 {offsets = [0, 48], sizes = [8, 16], strides = [1, 1]} : vector<8x384xf32> to vector<8x16xf32>
    %267 = vector.extract_strided_slice %220 {offsets = [0, 176], sizes = [8, 16], strides = [1, 1]} : vector<8x384xf32> to vector<8x16xf32>
    %268 = vector.extract_strided_slice %220 {offsets = [0, 304], sizes = [8, 16], strides = [1, 1]} : vector<8x384xf32> to vector<8x16xf32>
    %cst_109 = arith.constant dense<0.000000e+00> : vector<8x8xf32>
    %269 = tpu.matmul %266, %267, %cst_109 {dimension_numbers = #tpu.dot_dimension_numbers<[1], [1], [0], [0], [0, 0, 1, 0], [], []>} : vector<8x16xf32>, vector<8x16xf32>, vector<8x8xf32> -> vector<8x8xf32>
    %cst_110 = arith.constant dense<0xFF800000> : vector<8xf32>
    %270 = vector.multi_reduction <maximumf>, %269, %cst_110 [1] : vector<8x8xf32> to vector<8xf32>
    %271 = vector.shape_cast %270 : vector<8xf32> to vector<8x1xf32>
    %272 = vector.broadcast %271 : vector<8x1xf32> to vector<8x8xf32>
    %273 = arith.subf %269, %272 : vector<8x8xf32>
    %274 = math.exp %273 : vector<8x8xf32>
    %cst_111 = arith.constant dense<0.000000e+00> : vector<8xf32>
    %275 = vector.multi_reduction <add>, %274, %cst_111 [1] : vector<8x8xf32> to vector<8xf32>
    %276 = vector.shape_cast %275 : vector<8xf32> to vector<8x1xf32>
    %277 = tpu.reciprocal %276 {approx = true} : vector<8x1xf32> -> vector<8x1xf32>
    %278 = vector.broadcast %277 : vector<8x1xf32> to vector<8x8xf32>
    %279 = arith.mulf %274, %278 : vector<8x8xf32>
    %cst_112 = arith.constant dense<0.000000e+00> : vector<8x16xf32>
    %280 = tpu.matmul %279, %268, %cst_112 {dimension_numbers = #tpu.dot_dimension_numbers<[1], [0], [0], [1], [0, 0, 1, 1], [], []>} : vector<8x8xf32>, vector<8x16xf32>, vector<8x16xf32> -> vector<8x16xf32>
    %281 = vector.extract_strided_slice %220 {offsets = [0, 64], sizes = [8, 16], strides = [1, 1]} : vector<8x384xf32> to vector<8x16xf32>
    %282 = vector.extract_strided_slice %220 {offsets = [0, 192], sizes = [8, 16], strides = [1, 1]} : vector<8x384xf32> to vector<8x16xf32>
    %283 = vector.extract_strided_slice %220 {offsets = [0, 320], sizes = [8, 16], strides = [1, 1]} : vector<8x384xf32> to vector<8x16xf32>
    %cst_113 = arith.constant dense<0.000000e+00> : vector<8x8xf32>
    %284 = tpu.matmul %281, %282, %cst_113 {dimension_numbers = #tpu.dot_dimension_numbers<[1], [1], [0], [0], [0, 0, 1, 0], [], []>} : vector<8x16xf32>, vector<8x16xf32>, vector<8x8xf32> -> vector<8x8xf32>
    %cst_114 = arith.constant dense<0xFF800000> : vector<8xf32>
    %285 = vector.multi_reduction <maximumf>, %284, %cst_114 [1] : vector<8x8xf32> to vector<8xf32>
    %286 = vector.shape_cast %285 : vector<8xf32> to vector<8x1xf32>
    %287 = vector.broadcast %286 : vector<8x1xf32> to vector<8x8xf32>
    %288 = arith.subf %284, %287 : vector<8x8xf32>
    %289 = math.exp %288 : vector<8x8xf32>
    %cst_115 = arith.constant dense<0.000000e+00> : vector<8xf32>
    %290 = vector.multi_reduction <add>, %289, %cst_115 [1] : vector<8x8xf32> to vector<8xf32>
    %291 = vector.shape_cast %290 : vector<8xf32> to vector<8x1xf32>
    %292 = tpu.reciprocal %291 {approx = true} : vector<8x1xf32> -> vector<8x1xf32>
    %293 = vector.broadcast %292 : vector<8x1xf32> to vector<8x8xf32>
    %294 = arith.mulf %289, %293 : vector<8x8xf32>
    %cst_116 = arith.constant dense<0.000000e+00> : vector<8x16xf32>
    %295 = tpu.matmul %294, %283, %cst_116 {dimension_numbers = #tpu.dot_dimension_numbers<[1], [0], [0], [1], [0, 0, 1, 1], [], []>} : vector<8x8xf32>, vector<8x16xf32>, vector<8x16xf32> -> vector<8x16xf32>
    %296 = vector.extract_strided_slice %220 {offsets = [0, 80], sizes = [8, 16], strides = [1, 1]} : vector<8x384xf32> to vector<8x16xf32>
    %297 = vector.extract_strided_slice %220 {offsets = [0, 208], sizes = [8, 16], strides = [1, 1]} : vector<8x384xf32> to vector<8x16xf32>
    %298 = vector.extract_strided_slice %220 {offsets = [0, 336], sizes = [8, 16], strides = [1, 1]} : vector<8x384xf32> to vector<8x16xf32>
    %cst_117 = arith.constant dense<0.000000e+00> : vector<8x8xf32>
    %299 = tpu.matmul %296, %297, %cst_117 {dimension_numbers = #tpu.dot_dimension_numbers<[1], [1], [0], [0], [0, 0, 1, 0], [], []>} : vector<8x16xf32>, vector<8x16xf32>, vector<8x8xf32> -> vector<8x8xf32>
    %cst_118 = arith.constant dense<0xFF800000> : vector<8xf32>
    %300 = vector.multi_reduction <maximumf>, %299, %cst_118 [1] : vector<8x8xf32> to vector<8xf32>
    %301 = vector.shape_cast %300 : vector<8xf32> to vector<8x1xf32>
    %302 = vector.broadcast %301 : vector<8x1xf32> to vector<8x8xf32>
    %303 = arith.subf %299, %302 : vector<8x8xf32>
    %304 = math.exp %303 : vector<8x8xf32>
    %cst_119 = arith.constant dense<0.000000e+00> : vector<8xf32>
    %305 = vector.multi_reduction <add>, %304, %cst_119 [1] : vector<8x8xf32> to vector<8xf32>
    %306 = vector.shape_cast %305 : vector<8xf32> to vector<8x1xf32>
    %307 = tpu.reciprocal %306 {approx = true} : vector<8x1xf32> -> vector<8x1xf32>
    %308 = vector.broadcast %307 : vector<8x1xf32> to vector<8x8xf32>
    %309 = arith.mulf %304, %308 : vector<8x8xf32>
    %cst_120 = arith.constant dense<0.000000e+00> : vector<8x16xf32>
    %310 = tpu.matmul %309, %298, %cst_120 {dimension_numbers = #tpu.dot_dimension_numbers<[1], [0], [0], [1], [0, 0, 1, 1], [], []>} : vector<8x8xf32>, vector<8x16xf32>, vector<8x16xf32> -> vector<8x16xf32>
    %311 = vector.extract_strided_slice %220 {offsets = [0, 96], sizes = [8, 16], strides = [1, 1]} : vector<8x384xf32> to vector<8x16xf32>
    %312 = vector.extract_strided_slice %220 {offsets = [0, 224], sizes = [8, 16], strides = [1, 1]} : vector<8x384xf32> to vector<8x16xf32>
    %313 = vector.extract_strided_slice %220 {offsets = [0, 352], sizes = [8, 16], strides = [1, 1]} : vector<8x384xf32> to vector<8x16xf32>
    %cst_121 = arith.constant dense<0.000000e+00> : vector<8x8xf32>
    %314 = tpu.matmul %311, %312, %cst_121 {dimension_numbers = #tpu.dot_dimension_numbers<[1], [1], [0], [0], [0, 0, 1, 0], [], []>} : vector<8x16xf32>, vector<8x16xf32>, vector<8x8xf32> -> vector<8x8xf32>
    %cst_122 = arith.constant dense<0xFF800000> : vector<8xf32>
    %315 = vector.multi_reduction <maximumf>, %314, %cst_122 [1] : vector<8x8xf32> to vector<8xf32>
    %316 = vector.shape_cast %315 : vector<8xf32> to vector<8x1xf32>
    %317 = vector.broadcast %316 : vector<8x1xf32> to vector<8x8xf32>
    %318 = arith.subf %314, %317 : vector<8x8xf32>
    %319 = math.exp %318 : vector<8x8xf32>
    %cst_123 = arith.constant dense<0.000000e+00> : vector<8xf32>
    %320 = vector.multi_reduction <add>, %319, %cst_123 [1] : vector<8x8xf32> to vector<8xf32>
    %321 = vector.shape_cast %320 : vector<8xf32> to vector<8x1xf32>
    %322 = tpu.reciprocal %321 {approx = true} : vector<8x1xf32> -> vector<8x1xf32>
    %323 = vector.broadcast %322 : vector<8x1xf32> to vector<8x8xf32>
    %324 = arith.mulf %319, %323 : vector<8x8xf32>
    %cst_124 = arith.constant dense<0.000000e+00> : vector<8x16xf32>
    %325 = tpu.matmul %324, %313, %cst_124 {dimension_numbers = #tpu.dot_dimension_numbers<[1], [0], [0], [1], [0, 0, 1, 1], [], []>} : vector<8x8xf32>, vector<8x16xf32>, vector<8x16xf32> -> vector<8x16xf32>
    %326 = vector.extract_strided_slice %220 {offsets = [0, 112], sizes = [8, 16], strides = [1, 1]} : vector<8x384xf32> to vector<8x16xf32>
    %327 = vector.extract_strided_slice %220 {offsets = [0, 240], sizes = [8, 16], strides = [1, 1]} : vector<8x384xf32> to vector<8x16xf32>
    %328 = vector.extract_strided_slice %220 {offsets = [0, 368], sizes = [8, 16], strides = [1, 1]} : vector<8x384xf32> to vector<8x16xf32>
    %cst_125 = arith.constant dense<0.000000e+00> : vector<8x8xf32>
    %329 = tpu.matmul %326, %327, %cst_125 {dimension_numbers = #tpu.dot_dimension_numbers<[1], [1], [0], [0], [0, 0, 1, 0], [], []>} : vector<8x16xf32>, vector<8x16xf32>, vector<8x8xf32> -> vector<8x8xf32>
    %cst_126 = arith.constant dense<0xFF800000> : vector<8xf32>
    %330 = vector.multi_reduction <maximumf>, %329, %cst_126 [1] : vector<8x8xf32> to vector<8xf32>
    %331 = vector.shape_cast %330 : vector<8xf32> to vector<8x1xf32>
    %332 = vector.broadcast %331 : vector<8x1xf32> to vector<8x8xf32>
    %333 = arith.subf %329, %332 : vector<8x8xf32>
    %334 = math.exp %333 : vector<8x8xf32>
    %cst_127 = arith.constant dense<0.000000e+00> : vector<8xf32>
    %335 = vector.multi_reduction <add>, %334, %cst_127 [1] : vector<8x8xf32> to vector<8xf32>
    %336 = vector.shape_cast %335 : vector<8xf32> to vector<8x1xf32>
    %337 = tpu.reciprocal %336 {approx = true} : vector<8x1xf32> -> vector<8x1xf32>
    %338 = vector.broadcast %337 : vector<8x1xf32> to vector<8x8xf32>
    %339 = arith.mulf %334, %338 : vector<8x8xf32>
    %cst_128 = arith.constant dense<0.000000e+00> : vector<8x16xf32>
    %340 = tpu.matmul %339, %328, %cst_128 {dimension_numbers = #tpu.dot_dimension_numbers<[1], [0], [0], [1], [0, 0, 1, 1], [], []>} : vector<8x8xf32>, vector<8x16xf32>, vector<8x16xf32> -> vector<8x16xf32>
    %341 = tpu.concatenate %235, %250, %265, %280, %295, %310, %325, %340 in 1 : vector<8x16xf32>, vector<8x16xf32>, vector<8x16xf32>, vector<8x16xf32>, vector<8x16xf32>, vector<8x16xf32>, vector<8x16xf32>, vector<8x16xf32> -> vector<8x128xf32>
    %c1_129 = arith.constant 1 : index
    %c0_130 = arith.constant 0 : index
    %c0_131 = arith.constant 0 : index
    %342 = vector.load %arg7[%c1_129, %c0_130, %c0_131] : memref<4x128x128xf32, #tpu.memory_space<vmem>>, vector<1x128x128xf32>
    %343 = vector.shape_cast %342 : vector<1x128x128xf32> to vector<128x128xf32>
    %cst_132 = arith.constant dense<0.000000e+00> : vector<8x128xf32>
    %344 = tpu.matmul %341, %343, %cst_132 {dimension_numbers = #tpu.dot_dimension_numbers<[1], [0], [0], [1], [0, 0, 1, 1], [], []>} : vector<8x128xf32>, vector<128x128xf32>, vector<8x128xf32> -> vector<8x128xf32>
    %c1_133 = arith.constant 1 : index
    %c0_134 = arith.constant 0 : index
    %c0_135 = arith.constant 0 : index
    %345 = vector.load %arg8[%c1_133, %c0_134, %c0_135] : memref<4x1x128xf32, #tpu.memory_space<vmem>>, vector<1x1x128xf32>
    %346 = vector.shape_cast %345 : vector<1x1x128xf32> to vector<1x128xf32>
    %347 = vector.broadcast %346 : vector<1x128xf32> to vector<8x128xf32>
    %348 = arith.addf %344, %347 : vector<8x128xf32>
    %349 = arith.addf %213, %348 : vector<8x128xf32>
    %c1_136 = arith.constant 1 : index
    %c0_137 = arith.constant 0 : index
    %c0_138 = arith.constant 0 : index
    %350 = vector.load %arg9[%c1_136, %c0_137, %c0_138] : memref<4x1x128xf32, #tpu.memory_space<vmem>>, vector<1x1x128xf32>
    %351 = vector.shape_cast %350 : vector<1x1x128xf32> to vector<1x128xf32>
    %c1_139 = arith.constant 1 : index
    %c0_140 = arith.constant 0 : index
    %c0_141 = arith.constant 0 : index
    %352 = vector.load %arg10[%c1_139, %c0_140, %c0_141] : memref<4x1x128xf32, #tpu.memory_space<vmem>>, vector<1x1x128xf32>
    %353 = vector.shape_cast %352 : vector<1x1x128xf32> to vector<1x128xf32>
    %cst_142 = arith.constant dense<0.000000e+00> : vector<8xf32>
    %354 = vector.multi_reduction <add>, %349, %cst_142 [1] : vector<8x128xf32> to vector<8xf32>
    %355 = vector.shape_cast %354 : vector<8xf32> to vector<8x1xf32>
    %cst_143 = arith.constant 1.280000e+02 : f32
    %356 = vector.broadcast %cst_143 : f32 to vector<8x1xf32>
    %357 = arith.divf %355, %356 : vector<8x1xf32>
    %358 = vector.broadcast %357 : vector<8x1xf32> to vector<8x128xf32>
    %359 = arith.subf %349, %358 : vector<8x128xf32>
    %360 = arith.mulf %359, %359 : vector<8x128xf32>
    %cst_144 = arith.constant dense<0.000000e+00> : vector<8xf32>
    %361 = vector.multi_reduction <add>, %360, %cst_144 [1] : vector<8x128xf32> to vector<8xf32>
    %362 = vector.shape_cast %361 : vector<8xf32> to vector<8x1xf32>
    %cst_145 = arith.constant 1.280000e+02 : f32
    %363 = vector.broadcast %cst_145 : f32 to vector<8x1xf32>
    %364 = arith.divf %362, %363 : vector<8x1xf32>
    %365 = vector.broadcast %357 : vector<8x1xf32> to vector<8x128xf32>
    %366 = arith.subf %349, %365 : vector<8x128xf32>
    %cst_146 = arith.constant 9.99999974E-6 : f32
    %367 = vector.broadcast %cst_146 : f32 to vector<8x1xf32>
    %368 = arith.addf %364, %367 : vector<8x1xf32>
    %369 = math.rsqrt %368 : vector<8x1xf32>
    %370 = vector.broadcast %369 : vector<8x1xf32> to vector<8x128xf32>
    %371 = arith.mulf %366, %370 : vector<8x128xf32>
    %372 = vector.broadcast %351 : vector<1x128xf32> to vector<8x128xf32>
    %373 = arith.mulf %371, %372 : vector<8x128xf32>
    %374 = vector.broadcast %353 : vector<1x128xf32> to vector<8x128xf32>
    %375 = arith.addf %373, %374 : vector<8x128xf32>
    %c1_147 = arith.constant 1 : index
    %c0_148 = arith.constant 0 : index
    %c0_149 = arith.constant 0 : index
    %376 = vector.load %arg11[%c1_147, %c0_148, %c0_149] : memref<4x128x256xf32, #tpu.memory_space<vmem>>, vector<1x128x256xf32>
    %377 = vector.shape_cast %376 : vector<1x128x256xf32> to vector<128x256xf32>
    %cst_150 = arith.constant dense<0.000000e+00> : vector<8x256xf32>
    %378 = tpu.matmul %375, %377, %cst_150 {dimension_numbers = #tpu.dot_dimension_numbers<[1], [0], [0], [1], [0, 0, 1, 1], [], []>} : vector<8x128xf32>, vector<128x256xf32>, vector<8x256xf32> -> vector<8x256xf32>
    %c1_151 = arith.constant 1 : index
    %c0_152 = arith.constant 0 : index
    %c0_153 = arith.constant 0 : index
    %379 = vector.load %arg12[%c1_151, %c0_152, %c0_153] : memref<4x1x256xf32, #tpu.memory_space<vmem>>, vector<1x1x256xf32>
    %380 = vector.shape_cast %379 : vector<1x1x256xf32> to vector<1x256xf32>
    %381 = vector.broadcast %380 : vector<1x256xf32> to vector<8x256xf32>
    %382 = arith.addf %378, %381 : vector<8x256xf32>
    %cst_154 = arith.constant 0.000000e+00 : f32
    %383 = vector.broadcast %cst_154 : f32 to vector<8x256xf32>
    %384 = arith.maximumf %382, %383 : vector<8x256xf32>
    %c1_155 = arith.constant 1 : index
    %c0_156 = arith.constant 0 : index
    %c0_157 = arith.constant 0 : index
    %385 = vector.load %arg13[%c1_155, %c0_156, %c0_157] : memref<4x256x128xf32, #tpu.memory_space<vmem>>, vector<1x256x128xf32>
    %386 = vector.shape_cast %385 : vector<1x256x128xf32> to vector<256x128xf32>
    %cst_158 = arith.constant dense<0.000000e+00> : vector<8x128xf32>
    %387 = tpu.matmul %384, %386, %cst_158 {dimension_numbers = #tpu.dot_dimension_numbers<[1], [0], [0], [1], [0, 0, 1, 1], [], []>} : vector<8x256xf32>, vector<256x128xf32>, vector<8x128xf32> -> vector<8x128xf32>
    %c1_159 = arith.constant 1 : index
    %c0_160 = arith.constant 0 : index
    %c0_161 = arith.constant 0 : index
    %388 = vector.load %arg14[%c1_159, %c0_160, %c0_161] : memref<4x1x128xf32, #tpu.memory_space<vmem>>, vector<1x1x128xf32>
    %389 = vector.shape_cast %388 : vector<1x1x128xf32> to vector<1x128xf32>
    %390 = vector.broadcast %389 : vector<1x128xf32> to vector<8x128xf32>
    %391 = arith.addf %387, %390 : vector<8x128xf32>
    %392 = arith.addf %375, %391 : vector<8x128xf32>
    %c1_162 = arith.constant 1 : index
    %c0_163 = arith.constant 0 : index
    %c0_164 = arith.constant 0 : index
    %393 = vector.load %arg15[%c1_162, %c0_163, %c0_164] : memref<4x1x128xf32, #tpu.memory_space<vmem>>, vector<1x1x128xf32>
    %394 = vector.shape_cast %393 : vector<1x1x128xf32> to vector<1x128xf32>
    %c1_165 = arith.constant 1 : index
    %c0_166 = arith.constant 0 : index
    %c0_167 = arith.constant 0 : index
    %395 = vector.load %arg16[%c1_165, %c0_166, %c0_167] : memref<4x1x128xf32, #tpu.memory_space<vmem>>, vector<1x1x128xf32>
    %396 = vector.shape_cast %395 : vector<1x1x128xf32> to vector<1x128xf32>
    %cst_168 = arith.constant dense<0.000000e+00> : vector<8xf32>
    %397 = vector.multi_reduction <add>, %392, %cst_168 [1] : vector<8x128xf32> to vector<8xf32>
    %398 = vector.shape_cast %397 : vector<8xf32> to vector<8x1xf32>
    %cst_169 = arith.constant 1.280000e+02 : f32
    %399 = vector.broadcast %cst_169 : f32 to vector<8x1xf32>
    %400 = arith.divf %398, %399 : vector<8x1xf32>
    %401 = vector.broadcast %400 : vector<8x1xf32> to vector<8x128xf32>
    %402 = arith.subf %392, %401 : vector<8x128xf32>
    %403 = arith.mulf %402, %402 : vector<8x128xf32>
    %cst_170 = arith.constant dense<0.000000e+00> : vector<8xf32>
    %404 = vector.multi_reduction <add>, %403, %cst_170 [1] : vector<8x128xf32> to vector<8xf32>
    %405 = vector.shape_cast %404 : vector<8xf32> to vector<8x1xf32>
    %cst_171 = arith.constant 1.280000e+02 : f32
    %406 = vector.broadcast %cst_171 : f32 to vector<8x1xf32>
    %407 = arith.divf %405, %406 : vector<8x1xf32>
    %408 = vector.broadcast %400 : vector<8x1xf32> to vector<8x128xf32>
    %409 = arith.subf %392, %408 : vector<8x128xf32>
    %cst_172 = arith.constant 9.99999974E-6 : f32
    %410 = vector.broadcast %cst_172 : f32 to vector<8x1xf32>
    %411 = arith.addf %407, %410 : vector<8x1xf32>
    %412 = math.rsqrt %411 : vector<8x1xf32>
    %413 = vector.broadcast %412 : vector<8x1xf32> to vector<8x128xf32>
    %414 = arith.mulf %409, %413 : vector<8x128xf32>
    %415 = vector.broadcast %394 : vector<1x128xf32> to vector<8x128xf32>
    %416 = arith.mulf %414, %415 : vector<8x128xf32>
    %417 = vector.broadcast %396 : vector<1x128xf32> to vector<8x128xf32>
    %418 = arith.addf %416, %417 : vector<8x128xf32>
    %c2 = arith.constant 2 : index
    %c0_173 = arith.constant 0 : index
    %c0_174 = arith.constant 0 : index
    %419 = vector.load %arg5[%c2, %c0_173, %c0_174] : memref<4x128x384xf32, #tpu.memory_space<vmem>>, vector<1x128x384xf32>
    %420 = vector.shape_cast %419 : vector<1x128x384xf32> to vector<128x384xf32>
    %cst_175 = arith.constant dense<0.000000e+00> : vector<8x384xf32>
    %421 = tpu.matmul %418, %420, %cst_175 {dimension_numbers = #tpu.dot_dimension_numbers<[1], [0], [0], [1], [0, 0, 1, 1], [], []>} : vector<8x128xf32>, vector<128x384xf32>, vector<8x384xf32> -> vector<8x384xf32>
    %c2_176 = arith.constant 2 : index
    %c0_177 = arith.constant 0 : index
    %c0_178 = arith.constant 0 : index
    %422 = vector.load %arg6[%c2_176, %c0_177, %c0_178] : memref<4x1x384xf32, #tpu.memory_space<vmem>>, vector<1x1x384xf32>
    %423 = vector.shape_cast %422 : vector<1x1x384xf32> to vector<1x384xf32>
    %424 = vector.broadcast %423 : vector<1x384xf32> to vector<8x384xf32>
    %425 = arith.addf %421, %424 : vector<8x384xf32>
    %426 = vector.extract_strided_slice %425 {offsets = [0, 0], sizes = [8, 16], strides = [1, 1]} : vector<8x384xf32> to vector<8x16xf32>
    %427 = vector.extract_strided_slice %425 {offsets = [0, 128], sizes = [8, 16], strides = [1, 1]} : vector<8x384xf32> to vector<8x16xf32>
    %428 = vector.extract_strided_slice %425 {offsets = [0, 256], sizes = [8, 16], strides = [1, 1]} : vector<8x384xf32> to vector<8x16xf32>
    %cst_179 = arith.constant dense<0.000000e+00> : vector<8x8xf32>
    %429 = tpu.matmul %426, %427, %cst_179 {dimension_numbers = #tpu.dot_dimension_numbers<[1], [1], [0], [0], [0, 0, 1, 0], [], []>} : vector<8x16xf32>, vector<8x16xf32>, vector<8x8xf32> -> vector<8x8xf32>
    %cst_180 = arith.constant dense<0xFF800000> : vector<8xf32>
    %430 = vector.multi_reduction <maximumf>, %429, %cst_180 [1] : vector<8x8xf32> to vector<8xf32>
    %431 = vector.shape_cast %430 : vector<8xf32> to vector<8x1xf32>
    %432 = vector.broadcast %431 : vector<8x1xf32> to vector<8x8xf32>
    %433 = arith.subf %429, %432 : vector<8x8xf32>
    %434 = math.exp %433 : vector<8x8xf32>
    %cst_181 = arith.constant dense<0.000000e+00> : vector<8xf32>
    %435 = vector.multi_reduction <add>, %434, %cst_181 [1] : vector<8x8xf32> to vector<8xf32>
    %436 = vector.shape_cast %435 : vector<8xf32> to vector<8x1xf32>
    %437 = tpu.reciprocal %436 {approx = true} : vector<8x1xf32> -> vector<8x1xf32>
    %438 = vector.broadcast %437 : vector<8x1xf32> to vector<8x8xf32>
    %439 = arith.mulf %434, %438 : vector<8x8xf32>
    %cst_182 = arith.constant dense<0.000000e+00> : vector<8x16xf32>
    %440 = tpu.matmul %439, %428, %cst_182 {dimension_numbers = #tpu.dot_dimension_numbers<[1], [0], [0], [1], [0, 0, 1, 1], [], []>} : vector<8x8xf32>, vector<8x16xf32>, vector<8x16xf32> -> vector<8x16xf32>
    %441 = vector.extract_strided_slice %425 {offsets = [0, 16], sizes = [8, 16], strides = [1, 1]} : vector<8x384xf32> to vector<8x16xf32>
    %442 = vector.extract_strided_slice %425 {offsets = [0, 144], sizes = [8, 16], strides = [1, 1]} : vector<8x384xf32> to vector<8x16xf32>
    %443 = vector.extract_strided_slice %425 {offsets = [0, 272], sizes = [8, 16], strides = [1, 1]} : vector<8x384xf32> to vector<8x16xf32>
    %cst_183 = arith.constant dense<0.000000e+00> : vector<8x8xf32>
    %444 = tpu.matmul %441, %442, %cst_183 {dimension_numbers = #tpu.dot_dimension_numbers<[1], [1], [0], [0], [0, 0, 1, 0], [], []>} : vector<8x16xf32>, vector<8x16xf32>, vector<8x8xf32> -> vector<8x8xf32>
    %cst_184 = arith.constant dense<0xFF800000> : vector<8xf32>
    %445 = vector.multi_reduction <maximumf>, %444, %cst_184 [1] : vector<8x8xf32> to vector<8xf32>
    %446 = vector.shape_cast %445 : vector<8xf32> to vector<8x1xf32>
    %447 = vector.broadcast %446 : vector<8x1xf32> to vector<8x8xf32>
    %448 = arith.subf %444, %447 : vector<8x8xf32>
    %449 = math.exp %448 : vector<8x8xf32>
    %cst_185 = arith.constant dense<0.000000e+00> : vector<8xf32>
    %450 = vector.multi_reduction <add>, %449, %cst_185 [1] : vector<8x8xf32> to vector<8xf32>
    %451 = vector.shape_cast %450 : vector<8xf32> to vector<8x1xf32>
    %452 = tpu.reciprocal %451 {approx = true} : vector<8x1xf32> -> vector<8x1xf32>
    %453 = vector.broadcast %452 : vector<8x1xf32> to vector<8x8xf32>
    %454 = arith.mulf %449, %453 : vector<8x8xf32>
    %cst_186 = arith.constant dense<0.000000e+00> : vector<8x16xf32>
    %455 = tpu.matmul %454, %443, %cst_186 {dimension_numbers = #tpu.dot_dimension_numbers<[1], [0], [0], [1], [0, 0, 1, 1], [], []>} : vector<8x8xf32>, vector<8x16xf32>, vector<8x16xf32> -> vector<8x16xf32>
    %456 = vector.extract_strided_slice %425 {offsets = [0, 32], sizes = [8, 16], strides = [1, 1]} : vector<8x384xf32> to vector<8x16xf32>
    %457 = vector.extract_strided_slice %425 {offsets = [0, 160], sizes = [8, 16], strides = [1, 1]} : vector<8x384xf32> to vector<8x16xf32>
    %458 = vector.extract_strided_slice %425 {offsets = [0, 288], sizes = [8, 16], strides = [1, 1]} : vector<8x384xf32> to vector<8x16xf32>
    %cst_187 = arith.constant dense<0.000000e+00> : vector<8x8xf32>
    %459 = tpu.matmul %456, %457, %cst_187 {dimension_numbers = #tpu.dot_dimension_numbers<[1], [1], [0], [0], [0, 0, 1, 0], [], []>} : vector<8x16xf32>, vector<8x16xf32>, vector<8x8xf32> -> vector<8x8xf32>
    %cst_188 = arith.constant dense<0xFF800000> : vector<8xf32>
    %460 = vector.multi_reduction <maximumf>, %459, %cst_188 [1] : vector<8x8xf32> to vector<8xf32>
    %461 = vector.shape_cast %460 : vector<8xf32> to vector<8x1xf32>
    %462 = vector.broadcast %461 : vector<8x1xf32> to vector<8x8xf32>
    %463 = arith.subf %459, %462 : vector<8x8xf32>
    %464 = math.exp %463 : vector<8x8xf32>
    %cst_189 = arith.constant dense<0.000000e+00> : vector<8xf32>
    %465 = vector.multi_reduction <add>, %464, %cst_189 [1] : vector<8x8xf32> to vector<8xf32>
    %466 = vector.shape_cast %465 : vector<8xf32> to vector<8x1xf32>
    %467 = tpu.reciprocal %466 {approx = true} : vector<8x1xf32> -> vector<8x1xf32>
    %468 = vector.broadcast %467 : vector<8x1xf32> to vector<8x8xf32>
    %469 = arith.mulf %464, %468 : vector<8x8xf32>
    %cst_190 = arith.constant dense<0.000000e+00> : vector<8x16xf32>
    %470 = tpu.matmul %469, %458, %cst_190 {dimension_numbers = #tpu.dot_dimension_numbers<[1], [0], [0], [1], [0, 0, 1, 1], [], []>} : vector<8x8xf32>, vector<8x16xf32>, vector<8x16xf32> -> vector<8x16xf32>
    %471 = vector.extract_strided_slice %425 {offsets = [0, 48], sizes = [8, 16], strides = [1, 1]} : vector<8x384xf32> to vector<8x16xf32>
    %472 = vector.extract_strided_slice %425 {offsets = [0, 176], sizes = [8, 16], strides = [1, 1]} : vector<8x384xf32> to vector<8x16xf32>
    %473 = vector.extract_strided_slice %425 {offsets = [0, 304], sizes = [8, 16], strides = [1, 1]} : vector<8x384xf32> to vector<8x16xf32>
    %cst_191 = arith.constant dense<0.000000e+00> : vector<8x8xf32>
    %474 = tpu.matmul %471, %472, %cst_191 {dimension_numbers = #tpu.dot_dimension_numbers<[1], [1], [0], [0], [0, 0, 1, 0], [], []>} : vector<8x16xf32>, vector<8x16xf32>, vector<8x8xf32> -> vector<8x8xf32>
    %cst_192 = arith.constant dense<0xFF800000> : vector<8xf32>
    %475 = vector.multi_reduction <maximumf>, %474, %cst_192 [1] : vector<8x8xf32> to vector<8xf32>
    %476 = vector.shape_cast %475 : vector<8xf32> to vector<8x1xf32>
    %477 = vector.broadcast %476 : vector<8x1xf32> to vector<8x8xf32>
    %478 = arith.subf %474, %477 : vector<8x8xf32>
    %479 = math.exp %478 : vector<8x8xf32>
    %cst_193 = arith.constant dense<0.000000e+00> : vector<8xf32>
    %480 = vector.multi_reduction <add>, %479, %cst_193 [1] : vector<8x8xf32> to vector<8xf32>
    %481 = vector.shape_cast %480 : vector<8xf32> to vector<8x1xf32>
    %482 = tpu.reciprocal %481 {approx = true} : vector<8x1xf32> -> vector<8x1xf32>
    %483 = vector.broadcast %482 : vector<8x1xf32> to vector<8x8xf32>
    %484 = arith.mulf %479, %483 : vector<8x8xf32>
    %cst_194 = arith.constant dense<0.000000e+00> : vector<8x16xf32>
    %485 = tpu.matmul %484, %473, %cst_194 {dimension_numbers = #tpu.dot_dimension_numbers<[1], [0], [0], [1], [0, 0, 1, 1], [], []>} : vector<8x8xf32>, vector<8x16xf32>, vector<8x16xf32> -> vector<8x16xf32>
    %486 = vector.extract_strided_slice %425 {offsets = [0, 64], sizes = [8, 16], strides = [1, 1]} : vector<8x384xf32> to vector<8x16xf32>
    %487 = vector.extract_strided_slice %425 {offsets = [0, 192], sizes = [8, 16], strides = [1, 1]} : vector<8x384xf32> to vector<8x16xf32>
    %488 = vector.extract_strided_slice %425 {offsets = [0, 320], sizes = [8, 16], strides = [1, 1]} : vector<8x384xf32> to vector<8x16xf32>
    %cst_195 = arith.constant dense<0.000000e+00> : vector<8x8xf32>
    %489 = tpu.matmul %486, %487, %cst_195 {dimension_numbers = #tpu.dot_dimension_numbers<[1], [1], [0], [0], [0, 0, 1, 0], [], []>} : vector<8x16xf32>, vector<8x16xf32>, vector<8x8xf32> -> vector<8x8xf32>
    %cst_196 = arith.constant dense<0xFF800000> : vector<8xf32>
    %490 = vector.multi_reduction <maximumf>, %489, %cst_196 [1] : vector<8x8xf32> to vector<8xf32>
    %491 = vector.shape_cast %490 : vector<8xf32> to vector<8x1xf32>
    %492 = vector.broadcast %491 : vector<8x1xf32> to vector<8x8xf32>
    %493 = arith.subf %489, %492 : vector<8x8xf32>
    %494 = math.exp %493 : vector<8x8xf32>
    %cst_197 = arith.constant dense<0.000000e+00> : vector<8xf32>
    %495 = vector.multi_reduction <add>, %494, %cst_197 [1] : vector<8x8xf32> to vector<8xf32>
    %496 = vector.shape_cast %495 : vector<8xf32> to vector<8x1xf32>
    %497 = tpu.reciprocal %496 {approx = true} : vector<8x1xf32> -> vector<8x1xf32>
    %498 = vector.broadcast %497 : vector<8x1xf32> to vector<8x8xf32>
    %499 = arith.mulf %494, %498 : vector<8x8xf32>
    %cst_198 = arith.constant dense<0.000000e+00> : vector<8x16xf32>
    %500 = tpu.matmul %499, %488, %cst_198 {dimension_numbers = #tpu.dot_dimension_numbers<[1], [0], [0], [1], [0, 0, 1, 1], [], []>} : vector<8x8xf32>, vector<8x16xf32>, vector<8x16xf32> -> vector<8x16xf32>
    %501 = vector.extract_strided_slice %425 {offsets = [0, 80], sizes = [8, 16], strides = [1, 1]} : vector<8x384xf32> to vector<8x16xf32>
    %502 = vector.extract_strided_slice %425 {offsets = [0, 208], sizes = [8, 16], strides = [1, 1]} : vector<8x384xf32> to vector<8x16xf32>
    %503 = vector.extract_strided_slice %425 {offsets = [0, 336], sizes = [8, 16], strides = [1, 1]} : vector<8x384xf32> to vector<8x16xf32>
    %cst_199 = arith.constant dense<0.000000e+00> : vector<8x8xf32>
    %504 = tpu.matmul %501, %502, %cst_199 {dimension_numbers = #tpu.dot_dimension_numbers<[1], [1], [0], [0], [0, 0, 1, 0], [], []>} : vector<8x16xf32>, vector<8x16xf32>, vector<8x8xf32> -> vector<8x8xf32>
    %cst_200 = arith.constant dense<0xFF800000> : vector<8xf32>
    %505 = vector.multi_reduction <maximumf>, %504, %cst_200 [1] : vector<8x8xf32> to vector<8xf32>
    %506 = vector.shape_cast %505 : vector<8xf32> to vector<8x1xf32>
    %507 = vector.broadcast %506 : vector<8x1xf32> to vector<8x8xf32>
    %508 = arith.subf %504, %507 : vector<8x8xf32>
    %509 = math.exp %508 : vector<8x8xf32>
    %cst_201 = arith.constant dense<0.000000e+00> : vector<8xf32>
    %510 = vector.multi_reduction <add>, %509, %cst_201 [1] : vector<8x8xf32> to vector<8xf32>
    %511 = vector.shape_cast %510 : vector<8xf32> to vector<8x1xf32>
    %512 = tpu.reciprocal %511 {approx = true} : vector<8x1xf32> -> vector<8x1xf32>
    %513 = vector.broadcast %512 : vector<8x1xf32> to vector<8x8xf32>
    %514 = arith.mulf %509, %513 : vector<8x8xf32>
    %cst_202 = arith.constant dense<0.000000e+00> : vector<8x16xf32>
    %515 = tpu.matmul %514, %503, %cst_202 {dimension_numbers = #tpu.dot_dimension_numbers<[1], [0], [0], [1], [0, 0, 1, 1], [], []>} : vector<8x8xf32>, vector<8x16xf32>, vector<8x16xf32> -> vector<8x16xf32>
    %516 = vector.extract_strided_slice %425 {offsets = [0, 96], sizes = [8, 16], strides = [1, 1]} : vector<8x384xf32> to vector<8x16xf32>
    %517 = vector.extract_strided_slice %425 {offsets = [0, 224], sizes = [8, 16], strides = [1, 1]} : vector<8x384xf32> to vector<8x16xf32>
    %518 = vector.extract_strided_slice %425 {offsets = [0, 352], sizes = [8, 16], strides = [1, 1]} : vector<8x384xf32> to vector<8x16xf32>
    %cst_203 = arith.constant dense<0.000000e+00> : vector<8x8xf32>
    %519 = tpu.matmul %516, %517, %cst_203 {dimension_numbers = #tpu.dot_dimension_numbers<[1], [1], [0], [0], [0, 0, 1, 0], [], []>} : vector<8x16xf32>, vector<8x16xf32>, vector<8x8xf32> -> vector<8x8xf32>
    %cst_204 = arith.constant dense<0xFF800000> : vector<8xf32>
    %520 = vector.multi_reduction <maximumf>, %519, %cst_204 [1] : vector<8x8xf32> to vector<8xf32>
    %521 = vector.shape_cast %520 : vector<8xf32> to vector<8x1xf32>
    %522 = vector.broadcast %521 : vector<8x1xf32> to vector<8x8xf32>
    %523 = arith.subf %519, %522 : vector<8x8xf32>
    %524 = math.exp %523 : vector<8x8xf32>
    %cst_205 = arith.constant dense<0.000000e+00> : vector<8xf32>
    %525 = vector.multi_reduction <add>, %524, %cst_205 [1] : vector<8x8xf32> to vector<8xf32>
    %526 = vector.shape_cast %525 : vector<8xf32> to vector<8x1xf32>
    %527 = tpu.reciprocal %526 {approx = true} : vector<8x1xf32> -> vector<8x1xf32>
    %528 = vector.broadcast %527 : vector<8x1xf32> to vector<8x8xf32>
    %529 = arith.mulf %524, %528 : vector<8x8xf32>
    %cst_206 = arith.constant dense<0.000000e+00> : vector<8x16xf32>
    %530 = tpu.matmul %529, %518, %cst_206 {dimension_numbers = #tpu.dot_dimension_numbers<[1], [0], [0], [1], [0, 0, 1, 1], [], []>} : vector<8x8xf32>, vector<8x16xf32>, vector<8x16xf32> -> vector<8x16xf32>
    %531 = vector.extract_strided_slice %425 {offsets = [0, 112], sizes = [8, 16], strides = [1, 1]} : vector<8x384xf32> to vector<8x16xf32>
    %532 = vector.extract_strided_slice %425 {offsets = [0, 240], sizes = [8, 16], strides = [1, 1]} : vector<8x384xf32> to vector<8x16xf32>
    %533 = vector.extract_strided_slice %425 {offsets = [0, 368], sizes = [8, 16], strides = [1, 1]} : vector<8x384xf32> to vector<8x16xf32>
    %cst_207 = arith.constant dense<0.000000e+00> : vector<8x8xf32>
    %534 = tpu.matmul %531, %532, %cst_207 {dimension_numbers = #tpu.dot_dimension_numbers<[1], [1], [0], [0], [0, 0, 1, 0], [], []>} : vector<8x16xf32>, vector<8x16xf32>, vector<8x8xf32> -> vector<8x8xf32>
    %cst_208 = arith.constant dense<0xFF800000> : vector<8xf32>
    %535 = vector.multi_reduction <maximumf>, %534, %cst_208 [1] : vector<8x8xf32> to vector<8xf32>
    %536 = vector.shape_cast %535 : vector<8xf32> to vector<8x1xf32>
    %537 = vector.broadcast %536 : vector<8x1xf32> to vector<8x8xf32>
    %538 = arith.subf %534, %537 : vector<8x8xf32>
    %539 = math.exp %538 : vector<8x8xf32>
    %cst_209 = arith.constant dense<0.000000e+00> : vector<8xf32>
    %540 = vector.multi_reduction <add>, %539, %cst_209 [1] : vector<8x8xf32> to vector<8xf32>
    %541 = vector.shape_cast %540 : vector<8xf32> to vector<8x1xf32>
    %542 = tpu.reciprocal %541 {approx = true} : vector<8x1xf32> -> vector<8x1xf32>
    %543 = vector.broadcast %542 : vector<8x1xf32> to vector<8x8xf32>
    %544 = arith.mulf %539, %543 : vector<8x8xf32>
    %cst_210 = arith.constant dense<0.000000e+00> : vector<8x16xf32>
    %545 = tpu.matmul %544, %533, %cst_210 {dimension_numbers = #tpu.dot_dimension_numbers<[1], [0], [0], [1], [0, 0, 1, 1], [], []>} : vector<8x8xf32>, vector<8x16xf32>, vector<8x16xf32> -> vector<8x16xf32>
    %546 = tpu.concatenate %440, %455, %470, %485, %500, %515, %530, %545 in 1 : vector<8x16xf32>, vector<8x16xf32>, vector<8x16xf32>, vector<8x16xf32>, vector<8x16xf32>, vector<8x16xf32>, vector<8x16xf32>, vector<8x16xf32> -> vector<8x128xf32>
    %c2_211 = arith.constant 2 : index
    %c0_212 = arith.constant 0 : index
    %c0_213 = arith.constant 0 : index
    %547 = vector.load %arg7[%c2_211, %c0_212, %c0_213] : memref<4x128x128xf32, #tpu.memory_space<vmem>>, vector<1x128x128xf32>
    %548 = vector.shape_cast %547 : vector<1x128x128xf32> to vector<128x128xf32>
    %cst_214 = arith.constant dense<0.000000e+00> : vector<8x128xf32>
    %549 = tpu.matmul %546, %548, %cst_214 {dimension_numbers = #tpu.dot_dimension_numbers<[1], [0], [0], [1], [0, 0, 1, 1], [], []>} : vector<8x128xf32>, vector<128x128xf32>, vector<8x128xf32> -> vector<8x128xf32>
    %c2_215 = arith.constant 2 : index
    %c0_216 = arith.constant 0 : index
    %c0_217 = arith.constant 0 : index
    %550 = vector.load %arg8[%c2_215, %c0_216, %c0_217] : memref<4x1x128xf32, #tpu.memory_space<vmem>>, vector<1x1x128xf32>
    %551 = vector.shape_cast %550 : vector<1x1x128xf32> to vector<1x128xf32>
    %552 = vector.broadcast %551 : vector<1x128xf32> to vector<8x128xf32>
    %553 = arith.addf %549, %552 : vector<8x128xf32>
    %554 = arith.addf %418, %553 : vector<8x128xf32>
    %c2_218 = arith.constant 2 : index
    %c0_219 = arith.constant 0 : index
    %c0_220 = arith.constant 0 : index
    %555 = vector.load %arg9[%c2_218, %c0_219, %c0_220] : memref<4x1x128xf32, #tpu.memory_space<vmem>>, vector<1x1x128xf32>
    %556 = vector.shape_cast %555 : vector<1x1x128xf32> to vector<1x128xf32>
    %c2_221 = arith.constant 2 : index
    %c0_222 = arith.constant 0 : index
    %c0_223 = arith.constant 0 : index
    %557 = vector.load %arg10[%c2_221, %c0_222, %c0_223] : memref<4x1x128xf32, #tpu.memory_space<vmem>>, vector<1x1x128xf32>
    %558 = vector.shape_cast %557 : vector<1x1x128xf32> to vector<1x128xf32>
    %cst_224 = arith.constant dense<0.000000e+00> : vector<8xf32>
    %559 = vector.multi_reduction <add>, %554, %cst_224 [1] : vector<8x128xf32> to vector<8xf32>
    %560 = vector.shape_cast %559 : vector<8xf32> to vector<8x1xf32>
    %cst_225 = arith.constant 1.280000e+02 : f32
    %561 = vector.broadcast %cst_225 : f32 to vector<8x1xf32>
    %562 = arith.divf %560, %561 : vector<8x1xf32>
    %563 = vector.broadcast %562 : vector<8x1xf32> to vector<8x128xf32>
    %564 = arith.subf %554, %563 : vector<8x128xf32>
    %565 = arith.mulf %564, %564 : vector<8x128xf32>
    %cst_226 = arith.constant dense<0.000000e+00> : vector<8xf32>
    %566 = vector.multi_reduction <add>, %565, %cst_226 [1] : vector<8x128xf32> to vector<8xf32>
    %567 = vector.shape_cast %566 : vector<8xf32> to vector<8x1xf32>
    %cst_227 = arith.constant 1.280000e+02 : f32
    %568 = vector.broadcast %cst_227 : f32 to vector<8x1xf32>
    %569 = arith.divf %567, %568 : vector<8x1xf32>
    %570 = vector.broadcast %562 : vector<8x1xf32> to vector<8x128xf32>
    %571 = arith.subf %554, %570 : vector<8x128xf32>
    %cst_228 = arith.constant 9.99999974E-6 : f32
    %572 = vector.broadcast %cst_228 : f32 to vector<8x1xf32>
    %573 = arith.addf %569, %572 : vector<8x1xf32>
    %574 = math.rsqrt %573 : vector<8x1xf32>
    %575 = vector.broadcast %574 : vector<8x1xf32> to vector<8x128xf32>
    %576 = arith.mulf %571, %575 : vector<8x128xf32>
    %577 = vector.broadcast %556 : vector<1x128xf32> to vector<8x128xf32>
    %578 = arith.mulf %576, %577 : vector<8x128xf32>
    %579 = vector.broadcast %558 : vector<1x128xf32> to vector<8x128xf32>
    %580 = arith.addf %578, %579 : vector<8x128xf32>
    %c2_229 = arith.constant 2 : index
    %c0_230 = arith.constant 0 : index
    %c0_231 = arith.constant 0 : index
    %581 = vector.load %arg11[%c2_229, %c0_230, %c0_231] : memref<4x128x256xf32, #tpu.memory_space<vmem>>, vector<1x128x256xf32>
    %582 = vector.shape_cast %581 : vector<1x128x256xf32> to vector<128x256xf32>
    %cst_232 = arith.constant dense<0.000000e+00> : vector<8x256xf32>
    %583 = tpu.matmul %580, %582, %cst_232 {dimension_numbers = #tpu.dot_dimension_numbers<[1], [0], [0], [1], [0, 0, 1, 1], [], []>} : vector<8x128xf32>, vector<128x256xf32>, vector<8x256xf32> -> vector<8x256xf32>
    %c2_233 = arith.constant 2 : index
    %c0_234 = arith.constant 0 : index
    %c0_235 = arith.constant 0 : index
    %584 = vector.load %arg12[%c2_233, %c0_234, %c0_235] : memref<4x1x256xf32, #tpu.memory_space<vmem>>, vector<1x1x256xf32>
    %585 = vector.shape_cast %584 : vector<1x1x256xf32> to vector<1x256xf32>
    %586 = vector.broadcast %585 : vector<1x256xf32> to vector<8x256xf32>
    %587 = arith.addf %583, %586 : vector<8x256xf32>
    %cst_236 = arith.constant 0.000000e+00 : f32
    %588 = vector.broadcast %cst_236 : f32 to vector<8x256xf32>
    %589 = arith.maximumf %587, %588 : vector<8x256xf32>
    %c2_237 = arith.constant 2 : index
    %c0_238 = arith.constant 0 : index
    %c0_239 = arith.constant 0 : index
    %590 = vector.load %arg13[%c2_237, %c0_238, %c0_239] : memref<4x256x128xf32, #tpu.memory_space<vmem>>, vector<1x256x128xf32>
    %591 = vector.shape_cast %590 : vector<1x256x128xf32> to vector<256x128xf32>
    %cst_240 = arith.constant dense<0.000000e+00> : vector<8x128xf32>
    %592 = tpu.matmul %589, %591, %cst_240 {dimension_numbers = #tpu.dot_dimension_numbers<[1], [0], [0], [1], [0, 0, 1, 1], [], []>} : vector<8x256xf32>, vector<256x128xf32>, vector<8x128xf32> -> vector<8x128xf32>
    %c2_241 = arith.constant 2 : index
    %c0_242 = arith.constant 0 : index
    %c0_243 = arith.constant 0 : index
    %593 = vector.load %arg14[%c2_241, %c0_242, %c0_243] : memref<4x1x128xf32, #tpu.memory_space<vmem>>, vector<1x1x128xf32>
    %594 = vector.shape_cast %593 : vector<1x1x128xf32> to vector<1x128xf32>
    %595 = vector.broadcast %594 : vector<1x128xf32> to vector<8x128xf32>
    %596 = arith.addf %592, %595 : vector<8x128xf32>
    %597 = arith.addf %580, %596 : vector<8x128xf32>
    %c2_244 = arith.constant 2 : index
    %c0_245 = arith.constant 0 : index
    %c0_246 = arith.constant 0 : index
    %598 = vector.load %arg15[%c2_244, %c0_245, %c0_246] : memref<4x1x128xf32, #tpu.memory_space<vmem>>, vector<1x1x128xf32>
    %599 = vector.shape_cast %598 : vector<1x1x128xf32> to vector<1x128xf32>
    %c2_247 = arith.constant 2 : index
    %c0_248 = arith.constant 0 : index
    %c0_249 = arith.constant 0 : index
    %600 = vector.load %arg16[%c2_247, %c0_248, %c0_249] : memref<4x1x128xf32, #tpu.memory_space<vmem>>, vector<1x1x128xf32>
    %601 = vector.shape_cast %600 : vector<1x1x128xf32> to vector<1x128xf32>
    %cst_250 = arith.constant dense<0.000000e+00> : vector<8xf32>
    %602 = vector.multi_reduction <add>, %597, %cst_250 [1] : vector<8x128xf32> to vector<8xf32>
    %603 = vector.shape_cast %602 : vector<8xf32> to vector<8x1xf32>
    %cst_251 = arith.constant 1.280000e+02 : f32
    %604 = vector.broadcast %cst_251 : f32 to vector<8x1xf32>
    %605 = arith.divf %603, %604 : vector<8x1xf32>
    %606 = vector.broadcast %605 : vector<8x1xf32> to vector<8x128xf32>
    %607 = arith.subf %597, %606 : vector<8x128xf32>
    %608 = arith.mulf %607, %607 : vector<8x128xf32>
    %cst_252 = arith.constant dense<0.000000e+00> : vector<8xf32>
    %609 = vector.multi_reduction <add>, %608, %cst_252 [1] : vector<8x128xf32> to vector<8xf32>
    %610 = vector.shape_cast %609 : vector<8xf32> to vector<8x1xf32>
    %cst_253 = arith.constant 1.280000e+02 : f32
    %611 = vector.broadcast %cst_253 : f32 to vector<8x1xf32>
    %612 = arith.divf %610, %611 : vector<8x1xf32>
    %613 = vector.broadcast %605 : vector<8x1xf32> to vector<8x128xf32>
    %614 = arith.subf %597, %613 : vector<8x128xf32>
    %cst_254 = arith.constant 9.99999974E-6 : f32
    %615 = vector.broadcast %cst_254 : f32 to vector<8x1xf32>
    %616 = arith.addf %612, %615 : vector<8x1xf32>
    %617 = math.rsqrt %616 : vector<8x1xf32>
    %618 = vector.broadcast %617 : vector<8x1xf32> to vector<8x128xf32>
    %619 = arith.mulf %614, %618 : vector<8x128xf32>
    %620 = vector.broadcast %599 : vector<1x128xf32> to vector<8x128xf32>
    %621 = arith.mulf %619, %620 : vector<8x128xf32>
    %622 = vector.broadcast %601 : vector<1x128xf32> to vector<8x128xf32>
    %623 = arith.addf %621, %622 : vector<8x128xf32>
    %c3 = arith.constant 3 : index
    %c0_255 = arith.constant 0 : index
    %c0_256 = arith.constant 0 : index
    %624 = vector.load %arg5[%c3, %c0_255, %c0_256] : memref<4x128x384xf32, #tpu.memory_space<vmem>>, vector<1x128x384xf32>
    %625 = vector.shape_cast %624 : vector<1x128x384xf32> to vector<128x384xf32>
    %cst_257 = arith.constant dense<0.000000e+00> : vector<8x384xf32>
    %626 = tpu.matmul %623, %625, %cst_257 {dimension_numbers = #tpu.dot_dimension_numbers<[1], [0], [0], [1], [0, 0, 1, 1], [], []>} : vector<8x128xf32>, vector<128x384xf32>, vector<8x384xf32> -> vector<8x384xf32>
    %c3_258 = arith.constant 3 : index
    %c0_259 = arith.constant 0 : index
    %c0_260 = arith.constant 0 : index
    %627 = vector.load %arg6[%c3_258, %c0_259, %c0_260] : memref<4x1x384xf32, #tpu.memory_space<vmem>>, vector<1x1x384xf32>
    %628 = vector.shape_cast %627 : vector<1x1x384xf32> to vector<1x384xf32>
    %629 = vector.broadcast %628 : vector<1x384xf32> to vector<8x384xf32>
    %630 = arith.addf %626, %629 : vector<8x384xf32>
    %631 = vector.extract_strided_slice %630 {offsets = [0, 0], sizes = [8, 16], strides = [1, 1]} : vector<8x384xf32> to vector<8x16xf32>
    %632 = vector.extract_strided_slice %630 {offsets = [0, 128], sizes = [8, 16], strides = [1, 1]} : vector<8x384xf32> to vector<8x16xf32>
    %633 = vector.extract_strided_slice %630 {offsets = [0, 256], sizes = [8, 16], strides = [1, 1]} : vector<8x384xf32> to vector<8x16xf32>
    %cst_261 = arith.constant dense<0.000000e+00> : vector<8x8xf32>
    %634 = tpu.matmul %631, %632, %cst_261 {dimension_numbers = #tpu.dot_dimension_numbers<[1], [1], [0], [0], [0, 0, 1, 0], [], []>} : vector<8x16xf32>, vector<8x16xf32>, vector<8x8xf32> -> vector<8x8xf32>
    %cst_262 = arith.constant dense<0xFF800000> : vector<8xf32>
    %635 = vector.multi_reduction <maximumf>, %634, %cst_262 [1] : vector<8x8xf32> to vector<8xf32>
    %636 = vector.shape_cast %635 : vector<8xf32> to vector<8x1xf32>
    %637 = vector.broadcast %636 : vector<8x1xf32> to vector<8x8xf32>
    %638 = arith.subf %634, %637 : vector<8x8xf32>
    %639 = math.exp %638 : vector<8x8xf32>
    %cst_263 = arith.constant dense<0.000000e+00> : vector<8xf32>
    %640 = vector.multi_reduction <add>, %639, %cst_263 [1] : vector<8x8xf32> to vector<8xf32>
    %641 = vector.shape_cast %640 : vector<8xf32> to vector<8x1xf32>
    %642 = tpu.reciprocal %641 {approx = true} : vector<8x1xf32> -> vector<8x1xf32>
    %643 = vector.broadcast %642 : vector<8x1xf32> to vector<8x8xf32>
    %644 = arith.mulf %639, %643 : vector<8x8xf32>
    %cst_264 = arith.constant dense<0.000000e+00> : vector<8x16xf32>
    %645 = tpu.matmul %644, %633, %cst_264 {dimension_numbers = #tpu.dot_dimension_numbers<[1], [0], [0], [1], [0, 0, 1, 1], [], []>} : vector<8x8xf32>, vector<8x16xf32>, vector<8x16xf32> -> vector<8x16xf32>
    %646 = vector.extract_strided_slice %630 {offsets = [0, 16], sizes = [8, 16], strides = [1, 1]} : vector<8x384xf32> to vector<8x16xf32>
    %647 = vector.extract_strided_slice %630 {offsets = [0, 144], sizes = [8, 16], strides = [1, 1]} : vector<8x384xf32> to vector<8x16xf32>
    %648 = vector.extract_strided_slice %630 {offsets = [0, 272], sizes = [8, 16], strides = [1, 1]} : vector<8x384xf32> to vector<8x16xf32>
    %cst_265 = arith.constant dense<0.000000e+00> : vector<8x8xf32>
    %649 = tpu.matmul %646, %647, %cst_265 {dimension_numbers = #tpu.dot_dimension_numbers<[1], [1], [0], [0], [0, 0, 1, 0], [], []>} : vector<8x16xf32>, vector<8x16xf32>, vector<8x8xf32> -> vector<8x8xf32>
    %cst_266 = arith.constant dense<0xFF800000> : vector<8xf32>
    %650 = vector.multi_reduction <maximumf>, %649, %cst_266 [1] : vector<8x8xf32> to vector<8xf32>
    %651 = vector.shape_cast %650 : vector<8xf32> to vector<8x1xf32>
    %652 = vector.broadcast %651 : vector<8x1xf32> to vector<8x8xf32>
    %653 = arith.subf %649, %652 : vector<8x8xf32>
    %654 = math.exp %653 : vector<8x8xf32>
    %cst_267 = arith.constant dense<0.000000e+00> : vector<8xf32>
    %655 = vector.multi_reduction <add>, %654, %cst_267 [1] : vector<8x8xf32> to vector<8xf32>
    %656 = vector.shape_cast %655 : vector<8xf32> to vector<8x1xf32>
    %657 = tpu.reciprocal %656 {approx = true} : vector<8x1xf32> -> vector<8x1xf32>
    %658 = vector.broadcast %657 : vector<8x1xf32> to vector<8x8xf32>
    %659 = arith.mulf %654, %658 : vector<8x8xf32>
    %cst_268 = arith.constant dense<0.000000e+00> : vector<8x16xf32>
    %660 = tpu.matmul %659, %648, %cst_268 {dimension_numbers = #tpu.dot_dimension_numbers<[1], [0], [0], [1], [0, 0, 1, 1], [], []>} : vector<8x8xf32>, vector<8x16xf32>, vector<8x16xf32> -> vector<8x16xf32>
    %661 = vector.extract_strided_slice %630 {offsets = [0, 32], sizes = [8, 16], strides = [1, 1]} : vector<8x384xf32> to vector<8x16xf32>
    %662 = vector.extract_strided_slice %630 {offsets = [0, 160], sizes = [8, 16], strides = [1, 1]} : vector<8x384xf32> to vector<8x16xf32>
    %663 = vector.extract_strided_slice %630 {offsets = [0, 288], sizes = [8, 16], strides = [1, 1]} : vector<8x384xf32> to vector<8x16xf32>
    %cst_269 = arith.constant dense<0.000000e+00> : vector<8x8xf32>
    %664 = tpu.matmul %661, %662, %cst_269 {dimension_numbers = #tpu.dot_dimension_numbers<[1], [1], [0], [0], [0, 0, 1, 0], [], []>} : vector<8x16xf32>, vector<8x16xf32>, vector<8x8xf32> -> vector<8x8xf32>
    %cst_270 = arith.constant dense<0xFF800000> : vector<8xf32>
    %665 = vector.multi_reduction <maximumf>, %664, %cst_270 [1] : vector<8x8xf32> to vector<8xf32>
    %666 = vector.shape_cast %665 : vector<8xf32> to vector<8x1xf32>
    %667 = vector.broadcast %666 : vector<8x1xf32> to vector<8x8xf32>
    %668 = arith.subf %664, %667 : vector<8x8xf32>
    %669 = math.exp %668 : vector<8x8xf32>
    %cst_271 = arith.constant dense<0.000000e+00> : vector<8xf32>
    %670 = vector.multi_reduction <add>, %669, %cst_271 [1] : vector<8x8xf32> to vector<8xf32>
    %671 = vector.shape_cast %670 : vector<8xf32> to vector<8x1xf32>
    %672 = tpu.reciprocal %671 {approx = true} : vector<8x1xf32> -> vector<8x1xf32>
    %673 = vector.broadcast %672 : vector<8x1xf32> to vector<8x8xf32>
    %674 = arith.mulf %669, %673 : vector<8x8xf32>
    %cst_272 = arith.constant dense<0.000000e+00> : vector<8x16xf32>
    %675 = tpu.matmul %674, %663, %cst_272 {dimension_numbers = #tpu.dot_dimension_numbers<[1], [0], [0], [1], [0, 0, 1, 1], [], []>} : vector<8x8xf32>, vector<8x16xf32>, vector<8x16xf32> -> vector<8x16xf32>
    %676 = vector.extract_strided_slice %630 {offsets = [0, 48], sizes = [8, 16], strides = [1, 1]} : vector<8x384xf32> to vector<8x16xf32>
    %677 = vector.extract_strided_slice %630 {offsets = [0, 176], sizes = [8, 16], strides = [1, 1]} : vector<8x384xf32> to vector<8x16xf32>
    %678 = vector.extract_strided_slice %630 {offsets = [0, 304], sizes = [8, 16], strides = [1, 1]} : vector<8x384xf32> to vector<8x16xf32>
    %cst_273 = arith.constant dense<0.000000e+00> : vector<8x8xf32>
    %679 = tpu.matmul %676, %677, %cst_273 {dimension_numbers = #tpu.dot_dimension_numbers<[1], [1], [0], [0], [0, 0, 1, 0], [], []>} : vector<8x16xf32>, vector<8x16xf32>, vector<8x8xf32> -> vector<8x8xf32>
    %cst_274 = arith.constant dense<0xFF800000> : vector<8xf32>
    %680 = vector.multi_reduction <maximumf>, %679, %cst_274 [1] : vector<8x8xf32> to vector<8xf32>
    %681 = vector.shape_cast %680 : vector<8xf32> to vector<8x1xf32>
    %682 = vector.broadcast %681 : vector<8x1xf32> to vector<8x8xf32>
    %683 = arith.subf %679, %682 : vector<8x8xf32>
    %684 = math.exp %683 : vector<8x8xf32>
    %cst_275 = arith.constant dense<0.000000e+00> : vector<8xf32>
    %685 = vector.multi_reduction <add>, %684, %cst_275 [1] : vector<8x8xf32> to vector<8xf32>
    %686 = vector.shape_cast %685 : vector<8xf32> to vector<8x1xf32>
    %687 = tpu.reciprocal %686 {approx = true} : vector<8x1xf32> -> vector<8x1xf32>
    %688 = vector.broadcast %687 : vector<8x1xf32> to vector<8x8xf32>
    %689 = arith.mulf %684, %688 : vector<8x8xf32>
    %cst_276 = arith.constant dense<0.000000e+00> : vector<8x16xf32>
    %690 = tpu.matmul %689, %678, %cst_276 {dimension_numbers = #tpu.dot_dimension_numbers<[1], [0], [0], [1], [0, 0, 1, 1], [], []>} : vector<8x8xf32>, vector<8x16xf32>, vector<8x16xf32> -> vector<8x16xf32>
    %691 = vector.extract_strided_slice %630 {offsets = [0, 64], sizes = [8, 16], strides = [1, 1]} : vector<8x384xf32> to vector<8x16xf32>
    %692 = vector.extract_strided_slice %630 {offsets = [0, 192], sizes = [8, 16], strides = [1, 1]} : vector<8x384xf32> to vector<8x16xf32>
    %693 = vector.extract_strided_slice %630 {offsets = [0, 320], sizes = [8, 16], strides = [1, 1]} : vector<8x384xf32> to vector<8x16xf32>
    %cst_277 = arith.constant dense<0.000000e+00> : vector<8x8xf32>
    %694 = tpu.matmul %691, %692, %cst_277 {dimension_numbers = #tpu.dot_dimension_numbers<[1], [1], [0], [0], [0, 0, 1, 0], [], []>} : vector<8x16xf32>, vector<8x16xf32>, vector<8x8xf32> -> vector<8x8xf32>
    %cst_278 = arith.constant dense<0xFF800000> : vector<8xf32>
    %695 = vector.multi_reduction <maximumf>, %694, %cst_278 [1] : vector<8x8xf32> to vector<8xf32>
    %696 = vector.shape_cast %695 : vector<8xf32> to vector<8x1xf32>
    %697 = vector.broadcast %696 : vector<8x1xf32> to vector<8x8xf32>
    %698 = arith.subf %694, %697 : vector<8x8xf32>
    %699 = math.exp %698 : vector<8x8xf32>
    %cst_279 = arith.constant dense<0.000000e+00> : vector<8xf32>
    %700 = vector.multi_reduction <add>, %699, %cst_279 [1] : vector<8x8xf32> to vector<8xf32>
    %701 = vector.shape_cast %700 : vector<8xf32> to vector<8x1xf32>
    %702 = tpu.reciprocal %701 {approx = true} : vector<8x1xf32> -> vector<8x1xf32>
    %703 = vector.broadcast %702 : vector<8x1xf32> to vector<8x8xf32>
    %704 = arith.mulf %699, %703 : vector<8x8xf32>
    %cst_280 = arith.constant dense<0.000000e+00> : vector<8x16xf32>
    %705 = tpu.matmul %704, %693, %cst_280 {dimension_numbers = #tpu.dot_dimension_numbers<[1], [0], [0], [1], [0, 0, 1, 1], [], []>} : vector<8x8xf32>, vector<8x16xf32>, vector<8x16xf32> -> vector<8x16xf32>
    %706 = vector.extract_strided_slice %630 {offsets = [0, 80], sizes = [8, 16], strides = [1, 1]} : vector<8x384xf32> to vector<8x16xf32>
    %707 = vector.extract_strided_slice %630 {offsets = [0, 208], sizes = [8, 16], strides = [1, 1]} : vector<8x384xf32> to vector<8x16xf32>
    %708 = vector.extract_strided_slice %630 {offsets = [0, 336], sizes = [8, 16], strides = [1, 1]} : vector<8x384xf32> to vector<8x16xf32>
    %cst_281 = arith.constant dense<0.000000e+00> : vector<8x8xf32>
    %709 = tpu.matmul %706, %707, %cst_281 {dimension_numbers = #tpu.dot_dimension_numbers<[1], [1], [0], [0], [0, 0, 1, 0], [], []>} : vector<8x16xf32>, vector<8x16xf32>, vector<8x8xf32> -> vector<8x8xf32>
    %cst_282 = arith.constant dense<0xFF800000> : vector<8xf32>
    %710 = vector.multi_reduction <maximumf>, %709, %cst_282 [1] : vector<8x8xf32> to vector<8xf32>
    %711 = vector.shape_cast %710 : vector<8xf32> to vector<8x1xf32>
    %712 = vector.broadcast %711 : vector<8x1xf32> to vector<8x8xf32>
    %713 = arith.subf %709, %712 : vector<8x8xf32>
    %714 = math.exp %713 : vector<8x8xf32>
    %cst_283 = arith.constant dense<0.000000e+00> : vector<8xf32>
    %715 = vector.multi_reduction <add>, %714, %cst_283 [1] : vector<8x8xf32> to vector<8xf32>
    %716 = vector.shape_cast %715 : vector<8xf32> to vector<8x1xf32>
    %717 = tpu.reciprocal %716 {approx = true} : vector<8x1xf32> -> vector<8x1xf32>
    %718 = vector.broadcast %717 : vector<8x1xf32> to vector<8x8xf32>
    %719 = arith.mulf %714, %718 : vector<8x8xf32>
    %cst_284 = arith.constant dense<0.000000e+00> : vector<8x16xf32>
    %720 = tpu.matmul %719, %708, %cst_284 {dimension_numbers = #tpu.dot_dimension_numbers<[1], [0], [0], [1], [0, 0, 1, 1], [], []>} : vector<8x8xf32>, vector<8x16xf32>, vector<8x16xf32> -> vector<8x16xf32>
    %721 = vector.extract_strided_slice %630 {offsets = [0, 96], sizes = [8, 16], strides = [1, 1]} : vector<8x384xf32> to vector<8x16xf32>
    %722 = vector.extract_strided_slice %630 {offsets = [0, 224], sizes = [8, 16], strides = [1, 1]} : vector<8x384xf32> to vector<8x16xf32>
    %723 = vector.extract_strided_slice %630 {offsets = [0, 352], sizes = [8, 16], strides = [1, 1]} : vector<8x384xf32> to vector<8x16xf32>
    %cst_285 = arith.constant dense<0.000000e+00> : vector<8x8xf32>
    %724 = tpu.matmul %721, %722, %cst_285 {dimension_numbers = #tpu.dot_dimension_numbers<[1], [1], [0], [0], [0, 0, 1, 0], [], []>} : vector<8x16xf32>, vector<8x16xf32>, vector<8x8xf32> -> vector<8x8xf32>
    %cst_286 = arith.constant dense<0xFF800000> : vector<8xf32>
    %725 = vector.multi_reduction <maximumf>, %724, %cst_286 [1] : vector<8x8xf32> to vector<8xf32>
    %726 = vector.shape_cast %725 : vector<8xf32> to vector<8x1xf32>
    %727 = vector.broadcast %726 : vector<8x1xf32> to vector<8x8xf32>
    %728 = arith.subf %724, %727 : vector<8x8xf32>
    %729 = math.exp %728 : vector<8x8xf32>
    %cst_287 = arith.constant dense<0.000000e+00> : vector<8xf32>
    %730 = vector.multi_reduction <add>, %729, %cst_287 [1] : vector<8x8xf32> to vector<8xf32>
    %731 = vector.shape_cast %730 : vector<8xf32> to vector<8x1xf32>
    %732 = tpu.reciprocal %731 {approx = true} : vector<8x1xf32> -> vector<8x1xf32>
    %733 = vector.broadcast %732 : vector<8x1xf32> to vector<8x8xf32>
    %734 = arith.mulf %729, %733 : vector<8x8xf32>
    %cst_288 = arith.constant dense<0.000000e+00> : vector<8x16xf32>
    %735 = tpu.matmul %734, %723, %cst_288 {dimension_numbers = #tpu.dot_dimension_numbers<[1], [0], [0], [1], [0, 0, 1, 1], [], []>} : vector<8x8xf32>, vector<8x16xf32>, vector<8x16xf32> -> vector<8x16xf32>
    %736 = vector.extract_strided_slice %630 {offsets = [0, 112], sizes = [8, 16], strides = [1, 1]} : vector<8x384xf32> to vector<8x16xf32>
    %737 = vector.extract_strided_slice %630 {offsets = [0, 240], sizes = [8, 16], strides = [1, 1]} : vector<8x384xf32> to vector<8x16xf32>
    %738 = vector.extract_strided_slice %630 {offsets = [0, 368], sizes = [8, 16], strides = [1, 1]} : vector<8x384xf32> to vector<8x16xf32>
    %cst_289 = arith.constant dense<0.000000e+00> : vector<8x8xf32>
    %739 = tpu.matmul %736, %737, %cst_289 {dimension_numbers = #tpu.dot_dimension_numbers<[1], [1], [0], [0], [0, 0, 1, 0], [], []>} : vector<8x16xf32>, vector<8x16xf32>, vector<8x8xf32> -> vector<8x8xf32>
    %cst_290 = arith.constant dense<0xFF800000> : vector<8xf32>
    %740 = vector.multi_reduction <maximumf>, %739, %cst_290 [1] : vector<8x8xf32> to vector<8xf32>
    %741 = vector.shape_cast %740 : vector<8xf32> to vector<8x1xf32>
    %742 = vector.broadcast %741 : vector<8x1xf32> to vector<8x8xf32>
    %743 = arith.subf %739, %742 : vector<8x8xf32>
    %744 = math.exp %743 : vector<8x8xf32>
    %cst_291 = arith.constant dense<0.000000e+00> : vector<8xf32>
    %745 = vector.multi_reduction <add>, %744, %cst_291 [1] : vector<8x8xf32> to vector<8xf32>
    %746 = vector.shape_cast %745 : vector<8xf32> to vector<8x1xf32>
    %747 = tpu.reciprocal %746 {approx = true} : vector<8x1xf32> -> vector<8x1xf32>
    %748 = vector.broadcast %747 : vector<8x1xf32> to vector<8x8xf32>
    %749 = arith.mulf %744, %748 : vector<8x8xf32>
    %cst_292 = arith.constant dense<0.000000e+00> : vector<8x16xf32>
    %750 = tpu.matmul %749, %738, %cst_292 {dimension_numbers = #tpu.dot_dimension_numbers<[1], [0], [0], [1], [0, 0, 1, 1], [], []>} : vector<8x8xf32>, vector<8x16xf32>, vector<8x16xf32> -> vector<8x16xf32>
    %751 = tpu.concatenate %645, %660, %675, %690, %705, %720, %735, %750 in 1 : vector<8x16xf32>, vector<8x16xf32>, vector<8x16xf32>, vector<8x16xf32>, vector<8x16xf32>, vector<8x16xf32>, vector<8x16xf32>, vector<8x16xf32> -> vector<8x128xf32>
    %c3_293 = arith.constant 3 : index
    %c0_294 = arith.constant 0 : index
    %c0_295 = arith.constant 0 : index
    %752 = vector.load %arg7[%c3_293, %c0_294, %c0_295] : memref<4x128x128xf32, #tpu.memory_space<vmem>>, vector<1x128x128xf32>
    %753 = vector.shape_cast %752 : vector<1x128x128xf32> to vector<128x128xf32>
    %cst_296 = arith.constant dense<0.000000e+00> : vector<8x128xf32>
    %754 = tpu.matmul %751, %753, %cst_296 {dimension_numbers = #tpu.dot_dimension_numbers<[1], [0], [0], [1], [0, 0, 1, 1], [], []>} : vector<8x128xf32>, vector<128x128xf32>, vector<8x128xf32> -> vector<8x128xf32>
    %c3_297 = arith.constant 3 : index
    %c0_298 = arith.constant 0 : index
    %c0_299 = arith.constant 0 : index
    %755 = vector.load %arg8[%c3_297, %c0_298, %c0_299] : memref<4x1x128xf32, #tpu.memory_space<vmem>>, vector<1x1x128xf32>
    %756 = vector.shape_cast %755 : vector<1x1x128xf32> to vector<1x128xf32>
    %757 = vector.broadcast %756 : vector<1x128xf32> to vector<8x128xf32>
    %758 = arith.addf %754, %757 : vector<8x128xf32>
    %759 = arith.addf %623, %758 : vector<8x128xf32>
    %c3_300 = arith.constant 3 : index
    %c0_301 = arith.constant 0 : index
    %c0_302 = arith.constant 0 : index
    %760 = vector.load %arg9[%c3_300, %c0_301, %c0_302] : memref<4x1x128xf32, #tpu.memory_space<vmem>>, vector<1x1x128xf32>
    %761 = vector.shape_cast %760 : vector<1x1x128xf32> to vector<1x128xf32>
    %c3_303 = arith.constant 3 : index
    %c0_304 = arith.constant 0 : index
    %c0_305 = arith.constant 0 : index
    %762 = vector.load %arg10[%c3_303, %c0_304, %c0_305] : memref<4x1x128xf32, #tpu.memory_space<vmem>>, vector<1x1x128xf32>
    %763 = vector.shape_cast %762 : vector<1x1x128xf32> to vector<1x128xf32>
    %cst_306 = arith.constant dense<0.000000e+00> : vector<8xf32>
    %764 = vector.multi_reduction <add>, %759, %cst_306 [1] : vector<8x128xf32> to vector<8xf32>
    %765 = vector.shape_cast %764 : vector<8xf32> to vector<8x1xf32>
    %cst_307 = arith.constant 1.280000e+02 : f32
    %766 = vector.broadcast %cst_307 : f32 to vector<8x1xf32>
    %767 = arith.divf %765, %766 : vector<8x1xf32>
    %768 = vector.broadcast %767 : vector<8x1xf32> to vector<8x128xf32>
    %769 = arith.subf %759, %768 : vector<8x128xf32>
    %770 = arith.mulf %769, %769 : vector<8x128xf32>
    %cst_308 = arith.constant dense<0.000000e+00> : vector<8xf32>
    %771 = vector.multi_reduction <add>, %770, %cst_308 [1] : vector<8x128xf32> to vector<8xf32>
    %772 = vector.shape_cast %771 : vector<8xf32> to vector<8x1xf32>
    %cst_309 = arith.constant 1.280000e+02 : f32
    %773 = vector.broadcast %cst_309 : f32 to vector<8x1xf32>
    %774 = arith.divf %772, %773 : vector<8x1xf32>
    %775 = vector.broadcast %767 : vector<8x1xf32> to vector<8x128xf32>
    %776 = arith.subf %759, %775 : vector<8x128xf32>
    %cst_310 = arith.constant 9.99999974E-6 : f32
    %777 = vector.broadcast %cst_310 : f32 to vector<8x1xf32>
    %778 = arith.addf %774, %777 : vector<8x1xf32>
    %779 = math.rsqrt %778 : vector<8x1xf32>
    %780 = vector.broadcast %779 : vector<8x1xf32> to vector<8x128xf32>
    %781 = arith.mulf %776, %780 : vector<8x128xf32>
    %782 = vector.broadcast %761 : vector<1x128xf32> to vector<8x128xf32>
    %783 = arith.mulf %781, %782 : vector<8x128xf32>
    %784 = vector.broadcast %763 : vector<1x128xf32> to vector<8x128xf32>
    %785 = arith.addf %783, %784 : vector<8x128xf32>
    %c3_311 = arith.constant 3 : index
    %c0_312 = arith.constant 0 : index
    %c0_313 = arith.constant 0 : index
    %786 = vector.load %arg11[%c3_311, %c0_312, %c0_313] : memref<4x128x256xf32, #tpu.memory_space<vmem>>, vector<1x128x256xf32>
    %787 = vector.shape_cast %786 : vector<1x128x256xf32> to vector<128x256xf32>
    %cst_314 = arith.constant dense<0.000000e+00> : vector<8x256xf32>
    %788 = tpu.matmul %785, %787, %cst_314 {dimension_numbers = #tpu.dot_dimension_numbers<[1], [0], [0], [1], [0, 0, 1, 1], [], []>} : vector<8x128xf32>, vector<128x256xf32>, vector<8x256xf32> -> vector<8x256xf32>
    %c3_315 = arith.constant 3 : index
    %c0_316 = arith.constant 0 : index
    %c0_317 = arith.constant 0 : index
    %789 = vector.load %arg12[%c3_315, %c0_316, %c0_317] : memref<4x1x256xf32, #tpu.memory_space<vmem>>, vector<1x1x256xf32>
    %790 = vector.shape_cast %789 : vector<1x1x256xf32> to vector<1x256xf32>
    %791 = vector.broadcast %790 : vector<1x256xf32> to vector<8x256xf32>
    %792 = arith.addf %788, %791 : vector<8x256xf32>
    %cst_318 = arith.constant 0.000000e+00 : f32
    %793 = vector.broadcast %cst_318 : f32 to vector<8x256xf32>
    %794 = arith.maximumf %792, %793 : vector<8x256xf32>
    %c3_319 = arith.constant 3 : index
    %c0_320 = arith.constant 0 : index
    %c0_321 = arith.constant 0 : index
    %795 = vector.load %arg13[%c3_319, %c0_320, %c0_321] : memref<4x256x128xf32, #tpu.memory_space<vmem>>, vector<1x256x128xf32>
    %796 = vector.shape_cast %795 : vector<1x256x128xf32> to vector<256x128xf32>
    %cst_322 = arith.constant dense<0.000000e+00> : vector<8x128xf32>
    %797 = tpu.matmul %794, %796, %cst_322 {dimension_numbers = #tpu.dot_dimension_numbers<[1], [0], [0], [1], [0, 0, 1, 1], [], []>} : vector<8x256xf32>, vector<256x128xf32>, vector<8x128xf32> -> vector<8x128xf32>
    %c3_323 = arith.constant 3 : index
    %c0_324 = arith.constant 0 : index
    %c0_325 = arith.constant 0 : index
    %798 = vector.load %arg14[%c3_323, %c0_324, %c0_325] : memref<4x1x128xf32, #tpu.memory_space<vmem>>, vector<1x1x128xf32>
    %799 = vector.shape_cast %798 : vector<1x1x128xf32> to vector<1x128xf32>
    %800 = vector.broadcast %799 : vector<1x128xf32> to vector<8x128xf32>
    %801 = arith.addf %797, %800 : vector<8x128xf32>
    %802 = arith.addf %785, %801 : vector<8x128xf32>
    %c3_326 = arith.constant 3 : index
    %c0_327 = arith.constant 0 : index
    %c0_328 = arith.constant 0 : index
    %803 = vector.load %arg15[%c3_326, %c0_327, %c0_328] : memref<4x1x128xf32, #tpu.memory_space<vmem>>, vector<1x1x128xf32>
    %804 = vector.shape_cast %803 : vector<1x1x128xf32> to vector<1x128xf32>
    %c3_329 = arith.constant 3 : index
    %c0_330 = arith.constant 0 : index
    %c0_331 = arith.constant 0 : index
    %805 = vector.load %arg16[%c3_329, %c0_330, %c0_331] : memref<4x1x128xf32, #tpu.memory_space<vmem>>, vector<1x1x128xf32>
    %806 = vector.shape_cast %805 : vector<1x1x128xf32> to vector<1x128xf32>
    %cst_332 = arith.constant dense<0.000000e+00> : vector<8xf32>
    %807 = vector.multi_reduction <add>, %802, %cst_332 [1] : vector<8x128xf32> to vector<8xf32>
    %808 = vector.shape_cast %807 : vector<8xf32> to vector<8x1xf32>
    %cst_333 = arith.constant 1.280000e+02 : f32
    %809 = vector.broadcast %cst_333 : f32 to vector<8x1xf32>
    %810 = arith.divf %808, %809 : vector<8x1xf32>
    %811 = vector.broadcast %810 : vector<8x1xf32> to vector<8x128xf32>
    %812 = arith.subf %802, %811 : vector<8x128xf32>
    %813 = arith.mulf %812, %812 : vector<8x128xf32>
    %cst_334 = arith.constant dense<0.000000e+00> : vector<8xf32>
    %814 = vector.multi_reduction <add>, %813, %cst_334 [1] : vector<8x128xf32> to vector<8xf32>
    %815 = vector.shape_cast %814 : vector<8xf32> to vector<8x1xf32>
    %cst_335 = arith.constant 1.280000e+02 : f32
    %816 = vector.broadcast %cst_335 : f32 to vector<8x1xf32>
    %817 = arith.divf %815, %816 : vector<8x1xf32>
    %818 = vector.broadcast %810 : vector<8x1xf32> to vector<8x128xf32>
    %819 = arith.subf %802, %818 : vector<8x128xf32>
    %cst_336 = arith.constant 9.99999974E-6 : f32
    %820 = vector.broadcast %cst_336 : f32 to vector<8x1xf32>
    %821 = arith.addf %817, %820 : vector<8x1xf32>
    %822 = math.rsqrt %821 : vector<8x1xf32>
    %823 = vector.broadcast %822 : vector<8x1xf32> to vector<8x128xf32>
    %824 = arith.mulf %819, %823 : vector<8x128xf32>
    %825 = vector.broadcast %804 : vector<1x128xf32> to vector<8x128xf32>
    %826 = arith.mulf %824, %825 : vector<8x128xf32>
    %827 = vector.broadcast %806 : vector<1x128xf32> to vector<8x128xf32>
    %828 = arith.addf %826, %827 : vector<8x128xf32>
    %cst_337 = arith.constant dense<0.000000e+00> : vector<128xf32>
    %829 = vector.multi_reduction <add>, %828, %cst_337 [0] : vector<8x128xf32> to vector<128xf32>
    %830 = vector.shape_cast %829 : vector<128xf32> to vector<1x128xf32>
    %cst_338 = arith.constant 1.250000e-01 : f32
    %831 = vector.broadcast %cst_338 : f32 to vector<1x128xf32>
    %832 = arith.mulf %830, %831 : vector<1x128xf32>
    %c0_339 = arith.constant 0 : index
    %c0_340 = arith.constant 0 : index
    %833 = vector.load %arg17[%c0_339, %c0_340] : memref<128x64xf32, #tpu.memory_space<vmem>>, vector<128x64xf32>
    %cst_341 = arith.constant dense<0.000000e+00> : vector<1x64xf32>
    %834 = tpu.matmul %832, %833, %cst_341 {dimension_numbers = #tpu.dot_dimension_numbers<[1], [0], [0], [1], [0, 0, 1, 1], [], []>} : vector<1x128xf32>, vector<128x64xf32>, vector<1x64xf32> -> vector<1x64xf32>
    %c0_342 = arith.constant 0 : index
    %c0_343 = arith.constant 0 : index
    %835 = vector.load %arg18[%c0_342, %c0_343] : memref<1x64xf32, #tpu.memory_space<vmem>>, vector<1x64xf32>
    %836 = arith.addf %834, %835 : vector<1x64xf32>
    %cst_344 = arith.constant 0.000000e+00 : f32
    %837 = vector.broadcast %cst_344 : f32 to vector<1x64xf32>
    %838 = arith.maximumf %836, %837 : vector<1x64xf32>
    %c0_345 = arith.constant 0 : index
    %c0_346 = arith.constant 0 : index
    %839 = vector.load %arg19[%c0_345, %c0_346] : memref<64x128xf32, #tpu.memory_space<vmem>>, vector<64x128xf32>
    %cst_347 = arith.constant dense<0.000000e+00> : vector<1x128xf32>
    %840 = tpu.matmul %838, %839, %cst_347 {dimension_numbers = #tpu.dot_dimension_numbers<[1], [0], [0], [1], [0, 0, 1, 1], [], []>} : vector<1x64xf32>, vector<64x128xf32>, vector<1x128xf32> -> vector<1x128xf32>
    %c0_348 = arith.constant 0 : index
    %c0_349 = arith.constant 0 : index
    %841 = vector.load %arg20[%c0_348, %c0_349] : memref<1x128xf32, #tpu.memory_space<vmem>>, vector<1x128xf32>
    %842 = arith.addf %840, %841 : vector<1x128xf32>
    %c0_350 = arith.constant 0 : index
    %c0_351 = arith.constant 0 : index
    %c0_352 = arith.constant 0 : index
    %843 = vector.load %arg21[%c0_350, %c0_351, %c0_352] : memref<1x1x128xf32, #tpu.memory_space<vmem>>, vector<1x1x128xf32>
    %844 = vector.shape_cast %843 : vector<1x1x128xf32> to vector<1x128xf32>
    %845 = vector.shape_cast %842 : vector<1x128xf32> to vector<1x1x128xf32>
    tpu.vector_store %arg21[%c0_350, %c0_351, %c0_352], %845 {strides = array<i32>} : memref<1x1x128xf32, #tpu.memory_space<vmem>>, vector<1x1x128xf32>,
    return
  }
  func.func @transform_0(%arg0: i32) -> (i32, i32, i32) {
    %c0_i32 = arith.constant 0 : i32
    %c0_i32_0 = arith.constant 0 : i32
    %c0_i32_1 = arith.constant 0 : i32
    return %arg0, %c0_i32, %c0_i32_0 : i32, i32, i32
  }
  func.func @transform_1(%arg0: i32) -> (i32, i32) {
    %c0_i32 = arith.constant 0 : i32
    %c0_i32_0 = arith.constant 0 : i32
    %c0_i32_1 = arith.constant 0 : i32
    return %c0_i32, %c0_i32_0 : i32, i32
  }
  func.func @transform_2(%arg0: i32) -> (i32, i32) {
    %c0_i32 = arith.constant 0 : i32
    %c0_i32_0 = arith.constant 0 : i32
    %c0_i32_1 = arith.constant 0 : i32
    return %c0_i32, %c0_i32_0 : i32, i32
  }
  func.func @transform_3(%arg0: i32) -> (i32, i32) {
    %c0_i32 = arith.constant 0 : i32
    %c0_i32_0 = arith.constant 0 : i32
    %c0_i32_1 = arith.constant 0 : i32
    return %c0_i32, %c0_i32_0 : i32, i32
  }
  func.func @transform_4(%arg0: i32) -> (i32, i32, i32) {
    %c0_i32 = arith.constant 0 : i32
    %c0_i32_0 = arith.constant 0 : i32
    %c0_i32_1 = arith.constant 0 : i32
    %c0_i32_2 = arith.constant 0 : i32
    return %c0_i32, %c0_i32_0, %c0_i32_1 : i32, i32, i32
  }
  func.func @transform_5(%arg0: i32) -> (i32, i32, i32) {
    %c0_i32 = arith.constant 0 : i32
    %c0_i32_0 = arith.constant 0 : i32
    %c0_i32_1 = arith.constant 0 : i32
    %c0_i32_2 = arith.constant 0 : i32
    return %c0_i32, %c0_i32_0, %c0_i32_1 : i32, i32, i32
  }
  func.func @transform_6(%arg0: i32) -> (i32, i32, i32) {
    %c0_i32 = arith.constant 0 : i32
    %c0_i32_0 = arith.constant 0 : i32
    %c0_i32_1 = arith.constant 0 : i32
    %c0_i32_2 = arith.constant 0 : i32
    return %c0_i32, %c0_i32_0, %c0_i32_1 : i32, i32, i32
  }
  func.func @transform_7(%arg0: i32) -> (i32, i32, i32) {
    %c0_i32 = arith.constant 0 : i32
    %c0_i32_0 = arith.constant 0 : i32
    %c0_i32_1 = arith.constant 0 : i32
    %c0_i32_2 = arith.constant 0 : i32
    return %c0_i32, %c0_i32_0, %c0_i32_1 : i32, i32, i32
  }
  func.func @transform_8(%arg0: i32) -> (i32, i32, i32) {
    %c0_i32 = arith.constant 0 : i32
    %c0_i32_0 = arith.constant 0 : i32
    %c0_i32_1 = arith.constant 0 : i32
    %c0_i32_2 = arith.constant 0 : i32
    return %c0_i32, %c0_i32_0, %c0_i32_1 : i32, i32, i32
  }
  func.func @transform_9(%arg0: i32) -> (i32, i32, i32) {
    %c0_i32 = arith.constant 0 : i32
    %c0_i32_0 = arith.constant 0 : i32
    %c0_i32_1 = arith.constant 0 : i32
    %c0_i32_2 = arith.constant 0 : i32
    return %c0_i32, %c0_i32_0, %c0_i32_1 : i32, i32, i32
  }
  func.func @transform_10(%arg0: i32) -> (i32, i32, i32) {
    %c0_i32 = arith.constant 0 : i32
    %c0_i32_0 = arith.constant 0 : i32
    %c0_i32_1 = arith.constant 0 : i32
    %c0_i32_2 = arith.constant 0 : i32
    return %c0_i32, %c0_i32_0, %c0_i32_1 : i32, i32, i32
  }
  func.func @transform_11(%arg0: i32) -> (i32, i32, i32) {
    %c0_i32 = arith.constant 0 : i32
    %c0_i32_0 = arith.constant 0 : i32
    %c0_i32_1 = arith.constant 0 : i32
    %c0_i32_2 = arith.constant 0 : i32
    return %c0_i32, %c0_i32_0, %c0_i32_1 : i32, i32, i32
  }
  func.func @transform_12(%arg0: i32) -> (i32, i32, i32) {
    %c0_i32 = arith.constant 0 : i32
    %c0_i32_0 = arith.constant 0 : i32
    %c0_i32_1 = arith.constant 0 : i32
    %c0_i32_2 = arith.constant 0 : i32
    return %c0_i32, %c0_i32_0, %c0_i32_1 : i32, i32, i32
  }
  func.func @transform_13(%arg0: i32) -> (i32, i32, i32) {
    %c0_i32 = arith.constant 0 : i32
    %c0_i32_0 = arith.constant 0 : i32
    %c0_i32_1 = arith.constant 0 : i32
    %c0_i32_2 = arith.constant 0 : i32
    return %c0_i32, %c0_i32_0, %c0_i32_1 : i32, i32, i32
  }
  func.func @transform_14(%arg0: i32) -> (i32, i32, i32) {
    %c0_i32 = arith.constant 0 : i32
    %c0_i32_0 = arith.constant 0 : i32
    %c0_i32_1 = arith.constant 0 : i32
    %c0_i32_2 = arith.constant 0 : i32
    return %c0_i32, %c0_i32_0, %c0_i32_1 : i32, i32, i32
  }
  func.func @transform_15(%arg0: i32) -> (i32, i32, i32) {
    %c0_i32 = arith.constant 0 : i32
    %c0_i32_0 = arith.constant 0 : i32
    %c0_i32_1 = arith.constant 0 : i32
    %c0_i32_2 = arith.constant 0 : i32
    return %c0_i32, %c0_i32_0, %c0_i32_1 : i32, i32, i32
  }
  func.func @transform_16(%arg0: i32) -> (i32, i32) {
    %c0_i32 = arith.constant 0 : i32
    %c0_i32_0 = arith.constant 0 : i32
    %c0_i32_1 = arith.constant 0 : i32
    return %c0_i32, %c0_i32_0 : i32, i32
  }
  func.func @transform_17(%arg0: i32) -> (i32, i32) {
    %c0_i32 = arith.constant 0 : i32
    %c0_i32_0 = arith.constant 0 : i32
    %c0_i32_1 = arith.constant 0 : i32
    return %c0_i32, %c0_i32_0 : i32, i32
  }
  func.func @transform_18(%arg0: i32) -> (i32, i32) {
    %c0_i32 = arith.constant 0 : i32
    %c0_i32_0 = arith.constant 0 : i32
    %c0_i32_1 = arith.constant 0 : i32
    return %c0_i32, %c0_i32_0 : i32, i32
  }
  func.func @transform_19(%arg0: i32) -> (i32, i32) {
    %c0_i32 = arith.constant 0 : i32
    %c0_i32_0 = arith.constant 0 : i32
    %c0_i32_1 = arith.constant 0 : i32
    return %c0_i32, %c0_i32_0 : i32, i32
  }
  func.func @transform_20(%arg0: i32) -> (i32, i32, i32) {
    %c0_i32 = arith.constant 0 : i32
    %c0_i32_0 = arith.constant 0 : i32
    %c0_i32_1 = arith.constant 0 : i32
    return %arg0, %c0_i32, %c0_i32_0 : i32, i32, i32
  }
}

</mosaic_0001>

<bundles_post_ra>
// kernel: tpu_custom_call.1
= control target key start
LH: loop header
LB: loop body
LE: loop exit
PB: predicated region body
PF: predicated region fallthrough
CT: control target
= control target key end

     0   :  { %s6147_s0 = inlined_call_operand.vmem [shape: f32[2,8,16], index: 0, kind: input, shape index: {}]   ;;  %s6148_s1 = inlined_call_operand.vmem [shape: f32[16,128], index: 1, kind: input, shape index: {}]   ;;  %s6149_s2 = inlined_call_operand.vmem [shape: f32[1,128], index: 2, kind: input, shape index: {}]   ;;  %s6150_s3 = inlined_call_operand.vmem [shape: f32[8,128], index: 3, kind: input, shape index: {}]   ;;  %s6151_s4 = inlined_call_operand.hbm [shape: f32[4,128,384], index: 4, kind: input, shape index: {}]   ;;  %s6152_s5 = inlined_call_operand.vmem [shape: f32[4,1,384], index: 5, kind: input, shape index: {}]   ;;  %s6153_s6 = inlined_call_operand.hbm [shape: f32[4,128,128], index: 6, kind: input, shape index: {}]   ;;  %s6154_s7 = inlined_call_operand.vmem [shape: f32[4,1,128], index: 7, kind: input, shape index: {}]   ;;  %s6155_s8 = inlined_call_operand.vmem [shape: f32[4,1,128], index: 8, kind: input, shape index: {}]   ;;  %s6156_s9 = inlined_call_operand.vmem [shape: f32[4,1,128], index: 9, kind: input, shape index: {}]   ;;  %s6157_s10 = inlined_call_operand.hbm [shape: f32[4,128,256], index: 10, kind: input, shape index: {}]   ;;  %s6158_s11 = inlined_call_operand.vmem [shape: f32[4,1,256], index: 11, kind: input, shape index: {}]   ;;  %s6159_s12 = inlined_call_operand.hbm [shape: f32[4,256,128], index: 12, kind: input, shape index: {}]   ;;  %s6160_s13 = inlined_call_operand.vmem [shape: f32[4,1,128], index: 13, kind: input, shape index: {}]   ;;  %s6161_s14 = inlined_call_operand.vmem [shape: f32[4,1,128], index: 14, kind: input, shape index: {}]   ;;  %s6162_s15 = inlined_call_operand.vmem [shape: f32[4,1,128], index: 15, kind: input, shape index: {}]   ;;  %s6163_s16 = inlined_call_operand.vmem [shape: f32[128,64], index: 16, kind: input, shape index: {}]   ;;  %s6164_s17 = inlined_call_operand.vmem [shape: f32[1,64], index: 17, kind: input, shape index: {}]   ;;  %s6165_s18 = inlined_call_operand.vmem [shape: f32[64,128], index: 18, kind: input, shape index: {}]   ;;  %s6166_s19 = inlined_call_operand.vmem [shape: f32[1,128], index: 19, kind: input, shape index: {}]   ;;  %s6167_s20 = inlined_call_operand.hbm [shape: f32[2,1,128], index: 20, kind: output, shape index: {}]  }
   0x1   :  { %6181 = sst [smem:[#allocation23_spill]] %s6147_s0 }
   0x2   :  { %6182 = sst [smem:[#allocation24_spill]] %s6148_s1 }
   0x3   :  { %6183 = sst [smem:[#allocation25_spill]] %s6149_s2 }
   0x4   :  { %6184 = sst [smem:[#allocation26_spill]] %s6150_s3 }
   0x5   :  { %6185 = sst [smem:[#allocation27_spill]] %s6151_s4 }
   0x6   :  { %6186 = sst [smem:[#allocation28_spill]] %s6153_s6 }
   0x7   :  { %6187 = sst [smem:[#allocation29_spill]] %s6163_s16 }
   0x8   :  { %6188 = sst [smem:[#allocation30_spill]] %s6164_s17 }
   0x9   :  { %6189 = sst [smem:[#allocation31_spill]] %s6165_s18 }
   0xa   :  { %6190 = sst [smem:[#allocation32_spill]] %s6166_s19 }
   0xb   :  { %6191 = sst [smem:[#allocation33_spill]] %s6167_s20 }
   0xc   :  { %25 = vsyncpa [#allocation3], 0 }
   0xd   :  { %26 = vsyncpa [#allocation6], 0 }
   0xe   :  { %27 = vsyncpa [#allocation9], 0 }
   0xf   :  { %28 = vsyncpa [#allocation4], 0 }
  0x10   :  { %30 = vsyncpa [#allocation4 + $0x1], 0  ;;  %s5382_s1 = smov 0   ;;  %s5384_s22 = smov 0  }
  0x11   :  { %s5386_s23 = smov 0   ;;  %s5388_s24 = smov 0  }
  0x12 LB: > { %6192 = sst [smem:[#allocation15_spill]] %s5245_s1  ;;  %s5403_s2 = sadd.s32 4294967295, %s5257_s24   ;;  %s5257_s24 = sphi %s5388_s24, %s6221_s24   ;;  %s5253_s23 = sphi %s5386_s23, %s6224_s23   ;;  %s5249_s22 = sphi %s5384_s22, %s6223_s22   ;;  %s5245_s1 = sphi %s5382_s1, %s6222_s1  }
  0x13   : > { %6193 = sst [smem:[#allocation16_spill]] %s5249_s22  ;;  %s4661_s25 = sadd.s32 4294967294, %s5257_s24  }
  0x14   : > { %6194 = sst [smem:[#allocation17_spill]] %s5253_s23  ;;  %s5407_s3 = sadd.s32 1, %s5257_s24  }
  0x15   : > { %6195 = sst [smem:[#allocation18_spill]] %s5257_s24  ;;  %s468_s26 = sadd.s32 1, %s5253_s23 }
  0x16   : > { %6196 = sst [smem:[#allocation19_spill]] %s5407_s3  ;;  %s465_s27 = ssub.s32 %s5257_s24, %s5407_s3 }
  0x17   : > { %p478_p0 = scmp.ne.s32.totalorder %s5253_s23, %s5249_s22  ;;  %p466_p1 = scmp.eq.s32.totalorder %s465_s27, 0 }
  0x18   : > { %p479_p2 = scmp.eq.s32.totalorder %s5403_s2, 1  ;;  %p484_p3 = scmp.ne.s32.totalorder %s5249_s22, %s5245_s1 }
  0x19   : > { %p485_p4 = scmp.eq.s32.totalorder %s4661_s25, 1  ;;  %p4662_p7 = scmp.ge.s32.totalorder %s5257_s24, 1 }
  0x1a   : > { %s5418_s28 = scalar_select %p466_p1, %s5253_s23, %s468_s26  }
  0x1b   : > { %p5420_p5 = por %p479_p2, %p478_p0  ;;  %p5424_p6 = por %p485_p4, %p484_p3 }
  0x1c   : > { %6197 = sst [smem:[#allocation20_spill]] %s5418_s28  ;;  %p492_p8 = scmp.lt.s32.totalorder %s5257_s24, 3 }
  0x1d   : > { %s6198_s4 = scalar_select %p5420_p5, 1, 0 }
  0x1e   : > { %s6200_s29 = scalar_select %p5424_p6, 1, 0 }
  0x1f   : > { %6199 = sst [smem:[#allocation21_spill]] %s6198_s4  ;;  %p4833_p9 = scmp.eq.s32.totalorder %s5403_s2, 0 }
  0x20   : > { %6201 = sst [smem:[#allocation22_spill]] %s6200_s29  ;;  %p5431_p10 = pnand %p4662_p7, %p492_p8 }
  0x21   : > { %s6203_s6 = sld [smem:[#allocation28_spill]]  ;;  %s5259_s26 = smov [#allocation5]  }
  0x22   : > { %p4816_p11 = pneg %p5431_p10  ;;  %s531_s27 = sshll.u32 %s5259_s26, 4  ;;  %s532_s27 = int_to_ptr.vmem [resolvable:$true] %s531_s27 }
  0x23   : > { %s6205_s29 = sld [smem:[#allocation27_spill]]  ;;  %s5260_s0 = smov 128  }
  0x24   : > { %p5442_p12 = pnand %p4833_p9, %p4816_p11  ;;  %s5261_s21 = smov 8  }
  0x25   : > { %s5263_s24 = smov 384   ;;  %s5264_s19 = smov 24  }
  0x26   : > { %s552_s23 = sshll.u32 %s6157_s10, 4  ;;  %s5265_s3 = smov [#allocation7]   ;;  %s553_s23 = int_to_ptr.hbm [resolvable:$true] %s552_s23 }
  0x27   : > { %s529_s25 = sshll.u32 %s6203_s6, 4  ;;  %s5262_s6 = smov [#allocation2]   ;;  %s530_s25 = int_to_ptr.hbm [resolvable:$true] %s529_s25 }
  0x28   : > { %4822 = dma.hbm_to_vmem [thread:$0]  (!%p5442_p12), %s530_s25, 8192, %s532_s27, [#allocation6], %s5260_s0, %s5260_s0, %s5261_s21  }
  0x29   : > { %s512_s1 = sshll.u32 %s6205_s29, 4  ;;  %s514_s26 = sshll.u32 %s5262_s6, 4  ;;  %s513_s1 = int_to_ptr.hbm [resolvable:$true] %s512_s1  ;;  %s515_s26 = int_to_ptr.vmem [resolvable:$true] %s514_s26 }
  0x2a   : > { %4819 = dma.hbm_to_vmem [thread:$0]  (!%p5442_p12), %s513_s1, 24576, %s515_s26, [#allocation3], %s5263_s24, %s5263_s24, %s5264_s19  }
  0x2b   : > { %s554_s29 = sshll.u32 %s5265_s3, 4  ;;  %s569_s25 = sshll.u32 %s6159_s12, 4  ;;  %s555_s29 = int_to_ptr.vmem [resolvable:$true] %s554_s29  ;;  %s570_s25 = int_to_ptr.hbm [resolvable:$true] %s569_s25 }
  0x2c   : > { %s5266_s27 = smov 256   ;;  %s5267_s6 = smov 16  }
  0x2d   : > { %4825 = dma.hbm_to_vmem [thread:$0]  (!%p5442_p12), %s553_s23, 16384, %s555_s29, [#allocation6], %s5266_s27, %s5266_s27, %s5267_s6  }
  0x2e   : > { %s5268_s18 = smov [#allocation8]   ;;  %615 = sbr.rel (%p5431_p10) target bundleno = 8713 (0x2209), region = 100 }
  0x2f   : > { %s571_s16 = sshll.u32 %s5268_s18, 4  ;;  %s572_s16 = int_to_ptr.vmem [resolvable:$true] %s571_s16 }
  0x30   : > { %4828 = dma.hbm_to_vmem [thread:$0]  (!%p5442_p12), %s570_s25, 16384, %s572_s16, [#allocation9], %s5260_s0, %s5260_s0, %s5261_s21  }
  0x33   : > { %5228 = dma.done.wait (%p4833_p9), [#allocation3], 24576  }
  0x34   : > { %5230 = vsyncadd (%p4833_p9), [#allocation3], 4294942720 }
  0x35   : > { %5232 = dma.done.wait (%p4833_p9), [#allocation6], 24576  }
  0x36   : > { %5234 = vsyncadd (%p4833_p9), [#allocation6], 4294942720 }
  0x37   : > { %5236 = dma.done.wait (%p4833_p9), [#allocation9], 16384  }
  0x38   : > { %5238 = vsyncadd (%p4833_p9), [#allocation9], 4294950912  ;;  %p687_p13 = scmp.lt.s32.totalorder %s5403_s2, 1  ;;  %s6206_s20 = sld [smem:[#allocation23_spill]]  ;;  %vm698_vm0 = vcmask 130048   ;;  %v769_v3 = vld [vmem:[#allocation2 + $0x168] sm:$0xff] }
  0x39   : > { %s6207_s28 = sld [smem:[#allocation24_spill]]  ;;  %v770_v4 = vld [vmem:[#allocation2 + $0x170] sm:$0xff]  ;;  %v771_v5 = vld [vmem:[#allocation2 + $0x178] sm:$0xff]  ;;  %780 = vmatpush.msra.mxu1 %v769_v3  ;;  %v768_v8 = vld [vmem:[#allocation2 + $0x160] sm:$0xff]  ;;  %s5269_s6 = smov 80   ;;  %vm866_vm1 = vcmask 64512  }
  0x3a   : > { %s688_s16 = scalar_select %p687_p13, %s5403_s2, 1  ;;  %800 = vmatpush.msra.mxu2 %v770_v4  ;;  %v766_v6 = vld [vmem:[#allocation2 + $0x150] sm:$0xff]  ;;  %v767_v7 = vld [vmem:[#allocation2 + $0x158] sm:$0xff]  ;;  %820 = vmatpush.msra.mxu3 %v771_v5  ;;  %v764_v10 = vld [vmem:[#allocation2 + $0x140] sm:$0xff]  ;;  %vm1386_vm2 = vcmask 261120   ;;  %vm1388_vm3 = vcmask 392192  }
  0x3b   : > { %v763_v9 = vld [vmem:[#allocation2 + $0x138] sm:$0xff]  ;;  %781 = vmatpush.msra.mxu1 %v766_v6  ;;  %v765_v11 = vld [vmem:[#allocation2 + $0x148] sm:$0xff]  ;;  %v760_v12 = vld [vmem:[#allocation2 + $0x120] sm:$0xff]  ;;  %s6208_s26 = sld [smem:[#allocation25_spill]]  ;;  %s5272_s18 = smov 48   ;;  %vm1390_vm4 = vcmask 523264  }
  0x3c   : > { %s4673_s17 = sshll.u32 %s688_s16, 3  ;;  %801 = vmatpush.msra.mxu2 %v767_v7  ;;  %821 = vmatpush.msra.mxu3 %v768_v8  ;;  %v761_v13 = vld [vmem:[#allocation2 + $0x128] sm:$0xff]  ;;  %v762_v14 = vld [vmem:[#allocation2 + $0x130] sm:$0xff]  ;;  %v759_v17 = vld [vmem:[#allocation2 + $0x118] sm:$0xff]  ;;  %s6209_s29 = sld [smem:[#allocation26_spill]]  ;;  %vm1392_vm5 = vcmask 654336  }
  0x3d   : > { %782 = vmatpush.msra.mxu1 %v763_v9  ;;  %v757_v15 = vld [vmem:[#allocation2 + $0x108] sm:$0xff]  ;;  %v758_v16 = vld [vmem:[#allocation2 + $0x110] sm:$0xff]  ;;  %v755_v19 = vld [vmem:[#allocation2 + $0xf8] sm:$0xff]  ;;  %s5270_s16 = smov 112   ;;  %s5273_s19 = smov 32   ;;  %vm1394_vm6 = vcmask 785408  }
  0x3e   : > { %s690_s1 = scalar_lea.vmem %s6206_s20, %s4673_s17  ;;  %802 = vmatpush.msra.mxu2 %v764_v10  ;;  %822 = vmatpush.msra.mxu3 %v765_v11  ;;  %v754_v18 = vld [vmem:[#allocation2 + $0xf0] sm:$0xff]  ;;  %v756_v20 = vld [vmem:[#allocation2 + $0x100] sm:$0xff]  ;;  %v751_v21 = vld [vmem:[#allocation2 + $0xd8] sm:$0xff]  ;;  %s5271_s17 = smov 96   ;;  %vm1396_vm7 = vcmask 916480  }
  0x3f   : > { %v693_v0 = vld [vmem:[%s6207_s28 + $0x8] sm:$0xff]  ;;  %v692_v1 = vld [vmem:[%s6207_s28] sm:$0xff]  ;;  %783 = vmatpush.msra.mxu1 %v760_v12  ;;  %v750_v26 = vld [vmem:[#allocation2 + $0xd0] sm:$0xff]  ;;  %s5274_s20 = smov 16   ;;  %s6210_s21 = sld [smem:[#allocation29_spill]] }
  0x40   : > { %v691_v2 = vld [vmem:[%s690_s1] sm:$0xff]  ;;  %716 = vmatpush.msra.mxu0 %v693_v0  ;;  %803 = vmatpush.msra.mxu2 %v761_v13  ;;  %v753_v23 = vld [vmem:[#allocation2 + $0xe8] sm:$0xff]  ;;  %v746_v28 = vld [vmem:[#allocation2 + $0xb0] sm:$0xff]  ;;  %s5275_s1 = smov 64   ;;  %s6211_s24 = sld [smem:[#allocation31_spill]] }
  0x41   : > { %823 = vmatpush.msra.mxu3 %v762_v14  ;;  %784 = vmatpush.msra.mxu1 %v757_v15  ;;  %v752_v22 = vld [vmem:[#allocation2 + $0xe0] sm:$0xff]  ;;  %v749_v25 = vld [vmem:[#allocation2 + $0xc8] sm:$0xff]  ;;  %v747_v29 = vld [vmem:[#allocation2 + $0xb8] sm:$0xff]  ;;  %s6214_s3 = sld [smem:[#allocation30_spill]] }
  0x42   : > { %717 = vmatpush.msra.mxu0 %v692_v1  ;;  %804 = vmatpush.msra.mxu2 %v758_v16  ;;  %v748_v24 = vld [vmem:[#allocation2 + $0xc0] sm:$0xff]  ;;  %v745_v27 = vld [vmem:[#allocation2 + $0xa8] sm:$0xff]  ;;  %v742_v30 = vld [vmem:[#allocation2 + $0x90] sm:$0xff] }
  0x43   : > { %4674 = vmatmul.msk.f32.vlgmr.msra.gmra.mxu0 %vm698_vm0, %v691_v2  ;;  %824 = vmatpush.msra.mxu3 %v759_v17  ;;  %v743_v31 = vld [vmem:[#allocation2 + $0x98] sm:$0xff]  ;;  %v744_v32 = vld [vmem:[#allocation2 + $0xa0] sm:$0xff]  ;;  %v741_v35 = vld [vmem:[#allocation2 + $0x88] sm:$0xff] }
  0x44   : > { %785 = vmatpush.msra.mxu1 %v754_v18  ;;  %805 = vmatpush.msra.mxu2 %v755_v19  ;;  %v739_v33 = vld [vmem:[#allocation2 + $0x78] sm:$0xff]  ;;  %v740_v34 = vld [vmem:[#allocation2 + $0x80] sm:$0xff]  ;;  %v737_v37 = vld [vmem:[#allocation2 + $0x68] sm:$0xff] }
  0x45   : > { %825 = vmatpush.msra.mxu3 %v756_v20  ;;  %v736_v36 = vld [vmem:[#allocation2 + $0x60] sm:$0xff]  ;;  %v738_v38 = vld [vmem:[#allocation2 + $0x70] sm:$0xff]  ;;  %v733_v39 = vld [vmem:[#allocation2 + $0x48] sm:$0xff] }
  0x46   : > { %786 = vmatpush.msra.mxu1 %v751_v21  ;;  %806 = vmatpush.msra.mxu2 %v752_v22  ;;  %v734_v40 = vld [vmem:[#allocation2 + $0x50] sm:$0xff]  ;;  %v735_v41 = vld [vmem:[#allocation2 + $0x58] sm:$0xff]  ;;  %v732_v44 = vld [vmem:[#allocation2 + $0x40] sm:$0xff]  ;;  %s6212_s4 = smov %s6211_s24 }
  0x47   : > { %826 = vmatpush.msra.mxu3 %v753_v23  ;;  %v730_v42 = vld [vmem:[#allocation2 + $0x30] sm:$0xff]  ;;  %v731_v43 = vld [vmem:[#allocation2 + $0x38] sm:$0xff]  ;;  %v728_v46 = vld [vmem:[#allocation2 + $0x20] sm:$0xff] }
  0x48   : > { %787 = vmatpush.msra.mxu1 %v748_v24  ;;  %807 = vmatpush.msra.mxu2 %v749_v25  ;;  %v727_v45 = vld [vmem:[#allocation2 + $0x18] sm:$0xff]  ;;  %v729_v47 = vld [vmem:[#allocation2 + $0x28] sm:$0xff]  ;;  %v724_v48 = vld [vmem:[#allocation2] sm:$0xff] }
  0x49   : > { %827 = vmatpush.msra.mxu3 %v750_v26  ;;  %v725_v49 = vld [vmem:[#allocation2 + $0x8] sm:$0xff]  ;;  %v726_v50 = vld [vmem:[#allocation2 + $0x10] sm:$0xff]  ;;  %v4892_v51 = vld [vmem:[%s6208_s26] ss:$0 sm:$0xff] }
  0x4a   : > { %788 = vmatpush.msra.mxu1 %v745_v27  ;;  %808 = vmatpush.msra.mxu2 %v746_v28  ;;  %v722_v53 = vld [vmem:[%s6209_s29] sm:$0xff] }
  0x4b   : > { %828 = vmatpush.msra.mxu3 %v747_v29  ;;  %v772_v56 = vld [vmem:[%s6152_s5] sm:$0x7] }
  0x4c   : > { %789 = vmatpush.msra.mxu1 %v742_v30  ;;  %809 = vmatpush.msra.mxu2 %v743_v31  ;;  %v775_v57 = vperm.slane %v772_v56, 1  ;;  %v776_v58 = vperm.slane %v772_v56, 2  ;;  %v774_v60 = vperm.slane %v772_v56, 0 }
  0x4d   : > { %829 = vmatpush.msra.mxu3 %v744_v32 }
  0x4e   : > { %790 = vmatpush.msra.mxu1 %v739_v33  ;;  %810 = vmatpush.msra.mxu2 %v740_v34 }
  0x4f   : > { %830 = vmatpush.msra.mxu3 %v741_v35 }
  0x50   : > { %791 = vmatpush.msra.mxu1 %v736_v36  ;;  %811 = vmatpush.msra.mxu2 %v737_v37 }
  0x51   : > { %831 = vmatpush.msra.mxu3 %v738_v38 }
  0x52   : > { %792 = vmatpush.msra.mxu1 %v733_v39  ;;  %812 = vmatpush.msra.mxu2 %v734_v40 }
  0x53   : > { %832 = vmatpush.msra.mxu3 %v735_v41 }
  0x54   : > { %793 = vmatpush.msra.mxu1 %v730_v42  ;;  %813 = vmatpush.msra.mxu2 %v731_v43 }
  0x55   : > { %833 = vmatpush.msra.mxu3 %v732_v44 }
  0x56   : > { %794 = vmatpush.msra.mxu1 %v727_v45  ;;  %814 = vmatpush.msra.mxu2 %v728_v46 }
  0x57   : > { %834 = vmatpush.msra.mxu3 %v729_v47 }
  0x58   : > { %795 = vmatpush.msra.mxu1 %v724_v48  ;;  %815 = vmatpush.msra.mxu2 %v725_v49 }
  0x59   : > { %835 = vmatpush.msra.mxu3 %v726_v50 }
  0xc0   : > { %v719_v52 = vpop.f32.mrf.mxu0 }
  0xc1   : > { %v720_v54 = vadd.f32 %v4892_v51, %v719_v52 }
  0xc3   : > { %v5495_v55 = vadd.f32 %v722_v53, %v720_v54 }
  0xc5   : > { %796 = vmatmul.f32.vlgmr.msra.gmra.mxu1 %v5495_v55  ;;  %816 = vmatmul.f32.vlgmr.msra.gmra.mxu2 %v5495_v55 }
  0xc6   : > { %836 = vmatmul.f32.vlgmr.msra.gmra.mxu3 %v5495_v55 }
 0x142   : > { %v797_v63 = vpop.f32.mrf.mxu1 }
 0x143   : > { %v798_v1 = vadd.f32 %v797_v63, %v774_v60 }
 0x148   : > { %v817_v59 = vpop.f32.mrf.mxu2 }
 0x149   : > { %v5503_v61 = vadd.f32 %v817_v59, %v775_v57  ;;  %v837_v62 = vpop.f32.mrf.mxu3 }
 0x14a   : > { %v5505_v0 = vadd.f32 %v837_v62, %v776_v58 }
 0x14b   : > { %1034 = vrot.lane.b32.xlu2 %v5503_v61, %s5269_s6  ;;  %903 = vrot.lane.b32.xlu1 %v5503_v61, %s5270_s16 }
 0x14c   : > { %4675 = vmatpush.xpose.msk.msrb.mxu0 %vm698_vm0, %v5503_v61 }
 0x14f   : > { %4676 = vmatmul.msk.f32.vlgmr.msrb.gmra.mxu0 %vm698_vm0, %v798_v1 }
 0x150   : > { %896 = vmatpush.msra.mxu0 %v5505_v0 }
 0x153   : > { %901 = vrot.lane.b32.xlu1 %v798_v1, %s5270_s16 }
 0x15b   : > { %969 = vrot.lane.b32.xlu1 %v5503_v61, %s5271_s17 }
 0x163   : > { %967 = vrot.lane.b32.xlu1 %v798_v1, %s5271_s17 }
 0x16b   : > { %1032 = vrot.lane.b32.xlu1 %v798_v1, %s5269_s6 }
 0x173   : > { %1164 = vrot.lane.b32.xlu1 %v5503_v61, %s5272_s18 }
 0x17b   : > { %1229 = vrot.lane.b32.xlu1 %v5503_v61, %s5273_s19 }
 0x183   : > { %1292 = vrot.lane.b32.xlu1 %v798_v1, %s5274_s20 }
 0x1a5   : > { %v1035_v2 = vpop.permute.xlu2 %1034 }
 0x1a6   : > { %4684 = vmatpush.xpose.msk.msrb.mxu3 %vm698_vm0, %v1035_v2 }
 0x1bd   : > { %v904_v3 = vpop.permute.xlu1 %903 }
 0x1be   : > { %4678 = vmatpush.xpose.msk.msrb.mxu0 %vm698_vm0, %v904_v3 }
 0x1c5   : > { %v902_v4 = vpop.permute.xlu1 %901 }
 0x1cc   : > { %v863_v5 = vpop.f32.mrf.mxu0 }
 0x1cd   : > { %v970_v6 = vpop.permute.xlu1 %969  ;;  %v867_v7 = vsel %vm866_vm1, %v863_v5, -inf }
 0x1ce   : > { %868 = vmax.xlane.f32.xlu0 %v867_v7 }
 0x1d5   : > { %v5528_v8 = vpop.permute.xlu1 %967 }
 0x1dd   : > { %v1033_v9 = vpop.permute.xlu1 %1032 }
 0x1de   : > { %4685 = vmatmul.msk.f32.vlgmr.msrb.gmra.mxu3 %vm698_vm0, %v1033_v9 }
 0x1e5   : > { %v1165_v10 = vpop.permute.xlu1 %1164 }
 0x1e6   : > { %4690 = vmatpush.xpose.msk.msra.mxu3 %vm698_vm0, %v1165_v10 }
 0x1ed   : > { %v1230_v23 = vpop.permute.xlu1 %1229 }
 0x1f5   : > { %v1293_v44 = vpop.permute.xlu1 %1292 }
 0x241   : > { %v869_v11 = vpop.xlane.xlu0 %868 }
 0x242   : > { %v870_v12 = vsub.f32 %v863_v5, %v869_v11 }
 0x244   : > { %v871_v13 = vmul.f32 1.442695, %v870_v12 }
 0x246   : > { %4917 = vpow2.f32 %v871_v13 }
 0x24c   : > { %v4918_v14 = vpop.eup %4917 }
 0x24d   : > { %v873_v15 = vsel %vm866_vm1, %v4918_v14, 0.0 }
 0x24e   : > { %874 = vadd.xlane.f32.xlu0 %v873_v15 }
 0x261   : > { %v1057_v16 = vpop.f32.mrf.mxu3 }
 0x262   : > { %941 = vrot.lane.b32.xlu0 %v5505_v0, %s5270_s16  ;;  %v1060_v17 = vsel %vm866_vm1, %v1057_v16, -inf }
 0x26a   : > { %1099 = vrot.lane.b32.xlu0 %v5503_v61, %s5275_s1 }
 0x272   : > { %1162 = vrot.lane.b32.xlu0 %v798_v1, %s5272_s18 }
 0x27a   : > { %1227 = vrot.lane.b32.xlu0 %v798_v1, %s5273_s19 }
 0x2a4   : > { %1061 = vmax.xlane.f32.xlu0 %v1060_v17 }
 0x2c1   : > { %v875_v18 = vpop.xlane.xlu0 %874 }
 0x2c2   : > { %4919 = vrcp.f32 %v875_v18 }
 0x2c8   : > { %v4920_v19 = vpop.eup %4919 }
 0x2c9   : > { %v877_v20 = vmul.f32 %v4920_v19, %v4918_v14 }
 0x2cb   : > { %4677 = vmatmul.msk.f32.vlgmr.msra.gmra.mxu0 %vm866_vm1, %v877_v20 }
 0x2d3   : > { %4679 = vmatmul.msk.f32.vlgmr.msrb.gmra.mxu0 %vm698_vm0, %v902_v4 }
 0x2d4   : > { %v942_v21 = vpop.permute.xlu0 %941 }
 0x2d5   : > { %962 = vmatpush.msra.mxu0 %v942_v21 }
 0x2d7   : > { %4681 = vmatpush.xpose.msk.msrb.mxu0 %vm698_vm0, %v970_v6 }
 0x2dc   : > { %v1100_v22 = vpop.permute.xlu0 %1099 }
 0x2dd   : > { %4687 = vmatpush.xpose.msk.msrb.mxu1 %vm698_vm0, %v1100_v22 }
 0x2e1   : > { %4693 = vmatpush.xpose.msk.msra.mxu1 %vm698_vm0, %v1230_v23 }
 0x2e4   : > { %v1163_v24 = vpop.permute.xlu0 %1162 }
 0x2e5   : > { %4691 = vmatmul.msk.f32.vlgmr.msra.gmra.mxu3 %vm698_vm0, %v1163_v24 }
 0x2ec   : > { %v1228_v34 = vpop.permute.xlu0 %1227 }
 0x317   : > { %v1062_v36 = vpop.xlane.xlu0 %1061 }
 0x318   : > { %v1063_v37 = vsub.f32 %v1057_v16, %v1062_v36 }
 0x31a   : > { %v1064_v43 = vmul.f32 1.442695, %v1063_v37 }
 0x348   : > { %v5546_v25 = vpop.f32.mrf.mxu0 }
 0x350   : > { %v926_v26 = vpop.f32.mrf.mxu0 }
 0x351   : > { %v929_v27 = vsel %vm866_vm1, %v926_v26, -inf }
 0x352   : > { %930 = vmax.xlane.f32.xlu2 %v929_v27 }
 0x368   : > { %v1187_v58 = vpop.f32.mrf.mxu3 }
 0x369   : > { %v1190_v59 = vsel %vm866_vm1, %v1187_v58, -inf }
 0x36a   : > { %1097 = vrot.lane.b32.xlu2 %v798_v1, %s5275_s1 }
 0x3c5   : > { %v931_v28 = vpop.xlane.xlu2 %930 }
 0x3c6   : > { %v932_v29 = vsub.f32 %v926_v26, %v931_v28 }
 0x3c8   : > { %v933_v30 = vmul.f32 1.442695, %v932_v29 }
 0x3ca   : > { %4921 = vpow2.f32 %v933_v30 }
 0x3cd   : > { %v1098_v31 = vpop.permute.xlu2 %1097 }
 0x3ce   : > { %4688 = vmatmul.msk.f32.vlgmr.msrb.gmra.mxu1 %vm698_vm0, %v1098_v31 }
 0x3d0   : > { %v4922_v32 = vpop.eup %4921 }
 0x3d1   : > { %v935_v33 = vsel %vm866_vm1, %v4922_v32, 0.0 }
 0x3d2   : > { %936 = vadd.xlane.f32.xlu2 %v935_v33 }
 0x3d6   : > { %4694 = vmatmul.msk.f32.vlgmr.msra.gmra.mxu1 %vm698_vm0, %v1228_v34 }
 0x3ea   : > { %1294 = vrot.lane.b32.xlu2 %v5503_v61, %s5274_s20 }
 0x445   : > { %v937_v35 = vpop.xlane.xlu2 %936 }
 0x446   : > { %4923 = vrcp.f32 %v937_v35 }
 0x447   : > { %4925 = vpow2.f32 %v1064_v43 }
 0x44b   : > { %v1122_v38 = vpop.f32.mrf.mxu1 }
 0x44c   : > { %v4924_v39 = vpop.eup %4923  ;;  %v1125_v40 = vsel %vm866_vm1, %v1122_v38, -inf }
 0x44d   : > { %v939_v41 = vmul.f32 %v4924_v39, %v4922_v32  ;;  %v1295_v42 = vpop.permute.xlu2 %1294  ;;  %1126 = vmax.xlane.f32.xlu1 %v1125_v40  ;;  %v5562_v47 = vpop.eup %4925 }
 0x44e   : > { %4696 = vmatpush.xpose.msk.msrb.mxu3 %vm698_vm0, %v1295_v42  ;;  %v1066_v48 = vsel %vm866_vm1, %v5562_v47, 0.0 }
 0x44f   : > { %4680 = vmatmul.msk.f32.vlgmr.msra.gmra.mxu0 %vm866_vm1, %v939_v41 }
 0x451   : > { %4697 = vmatmul.msk.f32.vlgmr.msrb.gmra.mxu3 %vm698_vm0, %v1293_v44 }
 0x453   : > { %v1252_v45 = vpop.f32.mrf.mxu1 }
 0x454   : > { %v1255_v46 = vsel %vm866_vm1, %v1252_v45, -inf }
 0x455   : > { %1256 = vmax.xlane.f32.xlu0 %v1255_v46 }
 0x457   : > { %4682 = vmatmul.msk.f32.vlgmr.msrb.gmra.mxu0 %vm698_vm0, %v5528_v8 }
 0x45d   : > { %1067 = vadd.xlane.f32.xlu0 %v1066_v48 }
 0x4c0   : > { %v1127_v49 = vpop.xlane.xlu1 %1126 }
 0x4c1   : > { %v1128_v50 = vsub.f32 %v1122_v38, %v1127_v49  ;;  %v1413_v49 = vld [vmem:[#allocation5 + $0x78] sm:$0xff] }
 0x4c2   : > { %1418 = vmatpush.msrb.mxu1 %v1413_v49  ;;  %v1489_v49 = vld [vmem:[#allocation7 + $0x68] sm:$0xff] }
 0x4c3   : > { %v1129_v51 = vmul.f32 1.442695, %v1128_v50  ;;  %v1412_v50 = vld [vmem:[#allocation5 + $0x70] sm:$0xff] }
 0x4c4   : > { %1419 = vmatpush.msrb.mxu1 %v1412_v50  ;;  %v1486_v50 = vld [vmem:[#allocation7 + $0x50] sm:$0xff] }
 0x4c5   : > { %4927 = vpow2.f32 %v1129_v51  ;;  %v1411_v51 = vld [vmem:[#allocation5 + $0x68] sm:$0xff] }
 0x4c6   : > { %1420 = vmatpush.msrb.mxu1 %v1411_v51  ;;  %v1487_v51 = vld [vmem:[#allocation7 + $0x58] sm:$0xff] }
 0x4c8   : > { %v1257_v2 = vpop.xlane.xlu0 %1256 }
 0x4c9   : > { %v1258_v6 = vsub.f32 %v1252_v45, %v1257_v2  ;;  %v1398_v2 = vld [vmem:[#allocation5] sm:$0xff] }
 0x4cb   : > { %v5566_v52 = vpop.eup %4927  ;;  %v1259_v9 = vmul.f32 1.442695, %v1258_v6 }
 0x4cc   : > { %v964_v53 = vpop.f32.mrf.mxu0  ;;  %v1131_v54 = vsel %vm866_vm1, %v5566_v52, 0.0 }
 0x4cd   : > { %1132 = vadd.xlane.f32.xlu1 %v1131_v54  ;;  %v1408_v54 = vld [vmem:[#allocation5 + $0x50] sm:$0xff] }
 0x4d0   : > { %v1068_v24 = vpop.xlane.xlu0 %1067 }
 0x4d4   : > { %v992_v56 = vpop.f32.mrf.mxu0  ;;  %v1317_v60 = vpop.f32.mrf.mxu3 }
 0x4d5   : > { %v995_v57 = vsel %vm866_vm1, %v992_v56, -inf  ;;  %v1320_v61 = vsel %vm866_vm1, %v1317_v60, -inf }
 0x4d6   : > { %996 = vmax.xlane.f32.xlu2 %v995_v57  ;;  %v1406_v57 = vld [vmem:[#allocation5 + $0x40] sm:$0xff] }
 0x4de   : > { %1191 = vmax.xlane.f32.xlu2 %v1190_v59  ;;  %v1404_v59 = vld [vmem:[#allocation5 + $0x30] sm:$0xff] }
 0x4e6   : > { %1071 = vrot.lane.b32.xlu1 %v5505_v0, %s5269_s6  ;;  %1321 = vmax.xlane.f32.xlu2 %v1320_v61  ;;  %v1402_v61 = vld [vmem:[#allocation5 + $0x20] sm:$0xff] }
 0x4ee   : > { %1201 = vrot.lane.b32.xlu1 %v5505_v0, %s5272_s18 }
 0x4fe   : > { %1006 = vrot.lane.b32.xlu2 %v5505_v0, %s5271_s17 }
 0x540   : > { %v1133_v11 = vpop.xlane.xlu1 %1132 }
 0x549   : > { %v997_v62 = vpop.xlane.xlu2 %996 }
 0x54a   : > { %v998_v63 = vsub.f32 %v992_v56, %v997_v62  ;;  %v1407_v56 = vld [vmem:[#allocation5 + $0x48] sm:$0xff]  ;;  %v1401_v62 = vld [vmem:[#allocation5 + $0x18] sm:$0xff] }
 0x54c   : > { %v999_v1 = vmul.f32 1.442695, %v998_v63  ;;  %v1400_v63 = vld [vmem:[#allocation5 + $0x10] sm:$0xff] }
 0x54e   : > { %4929 = vpow2.f32 %v999_v1  ;;  %v1399_v1 = vld [vmem:[#allocation5 + $0x8] sm:$0xff] }
 0x551   : > { %v1192_v3 = vpop.xlane.xlu2 %1191 }
 0x552   : > { %v1193_v4 = vsub.f32 %v1187_v58, %v1192_v3  ;;  %v1405_v58 = vld [vmem:[#allocation5 + $0x38] sm:$0xff] }
 0x554   : > { %v4930_v5 = vpop.eup %4929  ;;  %v1194_v7 = vmul.f32 1.442695, %v1193_v4 }
 0x555   : > { %v1001_v8 = vsel %vm866_vm1, %v4930_v5, 0.0 }
 0x556   : > { %4931 = vpow2.f32 %v1194_v7  ;;  %1002 = vadd.xlane.f32.xlu1 %v1001_v8 }
 0x557   : > { %4933 = vpow2.f32 %v1259_v9 }
 0x558   : > { %v1072_v18 = vpop.permute.xlu1 %1071 }
 0x559   : > { %v1322_v10 = vpop.xlane.xlu2 %1321 }
 0x55a   : > { %v1323_v12 = vsub.f32 %v1317_v60, %v1322_v10  ;;  %v1403_v60 = vld [vmem:[#allocation5 + $0x28] sm:$0xff] }
 0x55c   : > { %v4932_v13 = vpop.eup %4931  ;;  %v1324_v14 = vmul.f32 1.442695, %v1323_v12 }
 0x55d   : > { %v1196_v15 = vsel %vm866_vm1, %v4932_v13, 0.0  ;;  %v4934_v17 = vpop.eup %4933 }
 0x55e   : > { %4935 = vpow2.f32 %v1324_v14  ;;  %1197 = vadd.xlane.f32.xlu0 %v1196_v15  ;;  %v1261_v21 = vsel %vm866_vm1, %v4934_v17, 0.0 }
 0x560   : > { %v1202_v22 = vpop.permute.xlu1 %1201 }
 0x561   : > { %v1007_v16 = vpop.permute.xlu2 %1006 }
 0x562   : > { %1027 = vmatpush.msra.mxu0 %v1007_v16  ;;  %v4893_v16 = vld [vmem:[%s6154_s7] ss:$0 sm:$0xff] }
 0x564   : > { %1092 = vmatpush.msrb.mxu0 %v1072_v18  ;;  %v4936_v19 = vpop.eup %4935 }
 0x565   : > { %v1326_v20 = vsel %vm866_vm1, %v4936_v19, 0.0 }
 0x566   : > { %1327 = vadd.xlane.f32.xlu2 %v1326_v20  ;;  %1262 = vadd.xlane.f32.xlu0 %v1261_v21  ;;  %v5276_v20 = vmov 128.0   ;;  %v1506_v21 = vld [vmem:[#allocation7 + $0xf0] sm:$0xff] }
 0x56f   : > { %1331 = vrot.lane.b32.xlu1 %v5505_v0, %s5274_s20 }
 0x57a   : > { %1136 = vrot.lane.b32.xlu0 %v5505_v0, %s5275_s1 }
 0x582   : > { %1266 = vrot.lane.b32.xlu0 %v5505_v0, %s5273_s19 }
 0x58a   : > { %1358 = vrot.lane.b32.xlu0 %v964_v53, %s5274_s20  ;;  %v1409_v53 = vld [vmem:[#allocation5 + $0x58] sm:$0xff] }
 0x5c9   : > { %v1003_v23 = vpop.xlane.xlu1 %1002 }
 0x5ca   : > { %4937 = vrcp.f32 %v1003_v23  ;;  %v1504_v23 = vld [vmem:[#allocation7 + $0xe0] sm:$0xff] }
 0x5cb   : > { %4939 = vrcp.f32 %v1068_v24  ;;  %v1505_v24 = vld [vmem:[#allocation7 + $0xe8] sm:$0xff] }
 0x5d0   : > { %v4938_v26 = vpop.eup %4937 }
 0x5d1   : > { %v1005_v27 = vmul.f32 %v4938_v26, %v4930_v5  ;;  %v1198_v28 = vpop.xlane.xlu0 %1197  ;;  %v4940_v29 = vpop.eup %4939 }
 0x5d2   : > { %4941 = vrcp.f32 %v1198_v28  ;;  %v1070_v30 = vmul.f32 %v4940_v29, %v5562_v47 }
 0x5d3   : > { %4683 = vmatmul.msk.f32.vlgmr.msra.gmra.mxu0 %vm866_vm1, %v1005_v27 }
 0x5d4   : > { %1222 = vmatpush.msra.mxu0 %v1202_v22  ;;  %v1507_v22 = vld [vmem:[#allocation7 + $0xf8] sm:$0xff] }
 0x5d5   : > { %1534 = vmatpush.msra.mxu3 %v1507_v22  ;;  %v1562_v22 = vld [vmem:[#allocation8 + $0x30] sm:$0xff] }
 0x5d7   : > { %1535 = vmatpush.msra.mxu3 %v1505_v24 }
 0x5d8   : > { %v4942_v31 = vpop.eup %4941 }
 0x5d9   : > { %v1328_v0 = vpop.xlane.xlu2 %1327  ;;  %v1200_v32 = vmul.f32 %v4942_v31, %v4932_v13  ;;  %v1263_v34 = vpop.xlane.xlu0 %1262 }
 0x5da   : > { %4943 = vrcp.f32 %v1328_v0 }
 0x5db   : > { %4686 = vmatmul.msk.f32.vlgmr.msrb.gmra.mxu0 %vm866_vm1, %v1070_v30  ;;  %4945 = vrcp.f32 %v1133_v11 }
 0x5dc   : > { %4947 = vrcp.f32 %v1263_v34  ;;  %v1502_v34 = vld [vmem:[#allocation7 + $0xd0] sm:$0xff] }
 0x5dd   : > { %4949 = vrcp.f32 %v5276_v20  ;;  %v1579_v20 = vld [vmem:[#allocation8 + $0xb8] sm:$0xff] }
 0x5e0   : > { %v4944_v35 = vpop.eup %4943 }
 0x5e1   : > { %v1332_v33 = vpop.permute.xlu1 %1331  ;;  %v4946_v36 = vpop.eup %4945  ;;  %v1330_v37 = vmul.f32 %v4944_v35, %v4936_v19  ;;  %v1503_v35 = vld [vmem:[#allocation7 + $0xd8] sm:$0xff] }
 0x5e2   : > { %1352 = vmatpush.msrb.mxu0 %v1332_v33  ;;  %v1135_v39 = vmul.f32 %v4946_v36, %v5566_v52  ;;  %v4948_v40 = vpop.eup %4947  ;;  %v1410_v52 = vld [vmem:[#allocation5 + $0x60] sm:$0xff]  ;;  %1536 = vmatpush.msra.mxu3 %v1503_v35 }
 0x5e3   : > { %4692 = vmatmul.msk.f32.vlgmr.msra.gmra.mxu0 %vm866_vm1, %v1200_v32  ;;  %v1265_v41 = vmul.f32 %v4948_v40, %v4934_v17  ;;  %1421 = vmatpush.msrb.mxu1 %v1410_v52  ;;  %v4950_v26 = vpop.eup %4949  ;;  %v1500_v36 = vld [vmem:[#allocation7 + $0xc0] sm:$0xff] }
 0x5e4   : > { %v1444_v27 = vmul.f32 128.0, %v4950_v26  ;;  %vm1448_vm8 = vweird.f32 %v4950_v26  ;;  %v1496_v40 = vld [vmem:[#allocation7 + $0xa0] sm:$0xff] }
 0x5e5   : > { %1422 = vmatpush.msrb.mxu1 %v1409_v53  ;;  %v1484_v52 = vld [vmem:[#allocation7 + $0x40] sm:$0xff]  ;;  %v1485_v53 = vld [vmem:[#allocation7 + $0x48] sm:$0xff] }
 0x5e6   : > { %v1445_v28 = vsub.f32 1.0, %v1444_v27  ;;  %v1577_v27 = vld [vmem:[#allocation8 + $0xa8] sm:$0xff]  ;;  %v4894_v35 = vld [vmem:[%s6155_s8] ss:$0 sm:$0xff] }
 0x5e7   : > { %1423 = vmatpush.msrb.mxu1 %v1408_v54  ;;  %v1482_v54 = vld [vmem:[#allocation7 + $0x30] sm:$0xff] }
 0x5e8   : > { %v1446_v29 = vmul.f32 %v4950_v26, %v1445_v28 }
 0x5e9   : > { %1424 = vmatpush.msrb.mxu1 %v1407_v56  ;;  %v1483_v56 = vld [vmem:[#allocation7 + $0x38] sm:$0xff] }
 0x5ea   : > { %v1447_v30 = vadd.f32 %v4950_v26, %v1446_v29  ;;  %v1560_v29 = vld [vmem:[#allocation8 + $0x20] sm:$0xff] }
 0x5eb   : > { %4698 = vmatmul.msk.f32.vlgmr.msrb.gmra.mxu0 %vm866_vm1, %v1330_v37  ;;  %1425 = vmatpush.msrb.mxu1 %v1406_v57  ;;  %v1501_v37 = vld [vmem:[#allocation7 + $0xc8] sm:$0xff]  ;;  %v1480_v57 = vld [vmem:[#allocation7 + $0x20] sm:$0xff] }
 0x5ec   : > { %v1137_v38 = vpop.permute.xlu0 %1136  ;;  %v5616_v0 = vsel %vm1448_vm8, %v4950_v26, %v1447_v30  ;;  %1537 = vmatpush.msra.mxu3 %v1501_v37  ;;  %v1561_v26 = vld [vmem:[#allocation8 + $0x28] sm:$0xff]  ;;  %v1576_v30 = vld [vmem:[#allocation8 + $0xa0] sm:$0xff] }
 0x5ed   : > { %1157 = vmatpush.msrb.mxu2 %v1137_v38  ;;  %1426 = vmatpush.msrb.mxu1 %v1405_v58  ;;  %v1498_v38 = vld [vmem:[#allocation7 + $0xb0] sm:$0xff]  ;;  %v1481_v58 = vld [vmem:[#allocation7 + $0x28] sm:$0xff] }
 0x5ee   : > { %4689 = vmatmul.msk.f32.vlgmr.msrb.gmra.mxu2 %vm866_vm1, %v1135_v39  ;;  %v1499_v39 = vld [vmem:[#allocation7 + $0xb8] sm:$0xff] }
 0x5ef   : > { %1427 = vmatpush.msrb.mxu1 %v1404_v59  ;;  %1538 = vmatpush.msra.mxu3 %v1499_v39  ;;  %v1478_v59 = vld [vmem:[#allocation7 + $0x10] sm:$0xff] }
 0x5f1   : > { %1428 = vmatpush.msrb.mxu1 %v1403_v60  ;;  %v1479_v60 = vld [vmem:[#allocation7 + $0x18] sm:$0xff] }
 0x5f3   : > { %1429 = vmatpush.msrb.mxu1 %v1402_v61  ;;  %v1476_v61 = vld [vmem:[#allocation7] sm:$0xff] }
 0x5f4   : > { %v1267_v42 = vpop.permute.xlu0 %1266 }
 0x5f5   : > { %1287 = vmatpush.msra.mxu2 %v1267_v42  ;;  %1430 = vmatpush.msrb.mxu1 %v1401_v62  ;;  %v1494_v42 = vld [vmem:[#allocation7 + $0x90] sm:$0xff]  ;;  %v1477_v62 = vld [vmem:[#allocation7 + $0x8] sm:$0xff] }
 0x5f6   : > { %4695 = vmatmul.msk.f32.vlgmr.msra.gmra.mxu2 %vm866_vm1, %v1265_v41  ;;  %v1497_v41 = vld [vmem:[#allocation7 + $0xa8] sm:$0xff] }
 0x5f7   : > { %1431 = vmatpush.msrb.mxu1 %v1400_v63  ;;  %1514 = vmatpush.msrb.mxu2 %v1506_v21  ;;  %v1571_v63 = vld [vmem:[#allocation8 + $0x78] sm:$0xff] }
 0x5f8   : > { %1539 = vmatpush.msra.mxu3 %v1497_v41  ;;  %1592 = vmatpush.msra.mxu0 %v1571_v63  ;;  %v1558_v41 = vld [vmem:[#allocation8 + $0x10] sm:$0xff] }
 0x5f9   : > { %1432 = vmatpush.msrb.mxu1 %v1399_v1  ;;  %1515 = vmatpush.msrb.mxu2 %v1504_v23  ;;  %v1587_v1 = vld [vmem:[#allocation8 + $0xf8] sm:$0xff]  ;;  %v1578_v23 = vld [vmem:[#allocation8 + $0xb0] sm:$0xff] }
 0x5fa   : > { %v1710_v63 = vld [vmem:[#allocation2 + $0x2f0] sm:$0xff] }
 0x5fb   : > { %1433 = vmatpush.msrb.mxu1 %v1398_v2  ;;  %1516 = vmatpush.msrb.mxu2 %v1502_v34  ;;  %v1570_v2 = vld [vmem:[#allocation8 + $0x70] sm:$0xff] }
 0x5fc   : > { %v1359_v3 = vpop.permute.xlu0 %1358  ;;  %1593 = vmatpush.msra.mxu0 %v1570_v2  ;;  %v1706_v2 = vld [vmem:[#allocation2 + $0x2d0] sm:$0xff] }
 0x5fd   : > { %v1385_v6 = vsel %vm698_vm0, %v5546_v25, %v1359_v3  ;;  %1517 = vmatpush.msrb.mxu2 %v1500_v36  ;;  %1612 = vmatpush.msra.mxu1 %v1587_v1  ;;  %v1586_v3 = vld [vmem:[#allocation8 + $0xf0] sm:$0xff]  ;;  %v1711_v1 = vld [vmem:[#allocation2 + $0x2f8] sm:$0xff] }
 0x5ff   : > { %1518 = vmatpush.msrb.mxu2 %v1498_v38  ;;  %1613 = vmatpush.msra.mxu1 %v1586_v3  ;;  %v4895_v38 = vld [vmem:[%s6156_s9] ss:$0 sm:$0xff]  ;;  %v1707_v3 = vld [vmem:[#allocation2 + $0x2d8] sm:$0xff] }
 0x601   : > { %1519 = vmatpush.msrb.mxu2 %v1496_v40 }
 0x603   : > { %1520 = vmatpush.msrb.mxu2 %v1494_v42  ;;  %v1574_v42 = vld [vmem:[#allocation8 + $0x90] sm:$0xff] }
 0x650   : > { %v1029_v43 = vpop.f32.mrf.mxu0 }
 0x658   : > { %v1094_v44 = vpop.f32.mrf.mxu0 }
 0x659   : > { %1366 = vrot.lane.b32.xlu0 %v1094_v44, %s5272_s18  ;;  %v1492_v44 = vld [vmem:[#allocation7 + $0x80] sm:$0xff] }
 0x65a   : > { %1521 = vmatpush.msrb.mxu2 %v1492_v44  ;;  %v1573_v44 = vld [vmem:[#allocation8 + $0x88] sm:$0xff] }
 0x660   : > { %v1224_v45 = vpop.f32.mrf.mxu0 }
 0x661   : > { %1374 = vrot.lane.b32.xlu0 %v1224_v45, %s5269_s6  ;;  %v1493_v45 = vld [vmem:[#allocation7 + $0x88] sm:$0xff] }
 0x668   : > { %v1354_v48 = vpop.f32.mrf.mxu0 }
 0x671   : > { %v1159_v46 = vpop.f32.mrf.mxu2 }
 0x672   : > { %1370 = vrot.lane.b32.xlu1 %v1159_v46, %s5275_s1  ;;  %v1490_v46 = vld [vmem:[#allocation7 + $0x70] sm:$0xff] }
 0x673   : > { %1522 = vmatpush.msrb.mxu2 %v1490_v46  ;;  %v1572_v46 = vld [vmem:[#allocation8 + $0x80] sm:$0xff] }
 0x679   : > { %v1289_v47 = vpop.f32.mrf.mxu2 }
 0x67a   : > { %1362 = vrot.lane.b32.xlu1 %v1029_v43, %s5273_s19  ;;  %1378 = vrot.lane.b32.xlu2 %v1289_v47, %s5271_s17  ;;  %v1495_v43 = vld [vmem:[#allocation7 + $0x98] sm:$0xff] }
 0x67b   : > { %1540 = vmatpush.msra.mxu3 %v1495_v43  ;;  %v1491_v47 = vld [vmem:[#allocation7 + $0x78] sm:$0xff]  ;;  %v1557_v43 = vld [vmem:[#allocation8 + $0x8] sm:$0xff] }
 0x67d   : > { %1541 = vmatpush.msra.mxu3 %v1493_v45  ;;  %v1556_v45 = vld [vmem:[#allocation8] sm:$0xff] }
 0x67f   : > { %1542 = vmatpush.msra.mxu3 %v1491_v47 }
 0x681   : > { %1543 = vmatpush.msra.mxu3 %v1489_v49 }
 0x682   : > { %1382 = vrot.lane.b32.xlu1 %v1354_v48, %s5270_s16  ;;  %v1488_v48 = vld [vmem:[#allocation7 + $0x60] sm:$0xff] }
 0x683   : > { %1523 = vmatpush.msrb.mxu2 %v1488_v48  ;;  %1544 = vmatpush.msra.mxu3 %v1487_v51 }
 0x685   : > { %1524 = vmatpush.msrb.mxu2 %v1486_v50  ;;  %1545 = vmatpush.msra.mxu3 %v1485_v53 }
 0x687   : > { %1525 = vmatpush.msrb.mxu2 %v1484_v52  ;;  %1546 = vmatpush.msra.mxu3 %v1483_v56  ;;  %v4896_v56 = vld [vmem:[%s6160_s13] ss:$0 sm:$0xff] }
 0x689   : > { %1526 = vmatpush.msrb.mxu2 %v1482_v54  ;;  %1547 = vmatpush.msra.mxu3 %v1481_v58 }
 0x68b   : > { %1527 = vmatpush.msrb.mxu2 %v1480_v57  ;;  %1548 = vmatpush.msra.mxu3 %v1479_v60 }
 0x68d   : > { %1528 = vmatpush.msrb.mxu2 %v1478_v59  ;;  %1549 = vmatpush.msra.mxu3 %v1477_v62  ;;  %v1709_v62 = vld [vmem:[#allocation2 + $0x2e8] sm:$0xff] }
 0x68f   : > { %1529 = vmatpush.msrb.mxu2 %v1476_v61  ;;  %1741 = vmatpush.msrb.mxu3 %v1710_v63  ;;  %v4898_v63 = vld [vmem:[%s6162_s15] ss:$0 sm:$0xff] }
 0x691   : > { %1721 = vmatpush.msra.mxu2 %v1709_v62  ;;  %1742 = vmatpush.msrb.mxu3 %v1707_v3  ;;  %v4699_v3 = vld [vmem:[%s6152_s5 + $0x3] sm:$0x7] }
 0x693   : > { %1722 = vmatpush.msra.mxu2 %v1706_v2 }
 0x6cb   : > { %v1367_v5 = vpop.permute.xlu0 %1366 }
 0x6d3   : > { %v1375_v11 = vpop.permute.xlu0 %1374 }
 0x6d4   : > { %v1379_v13 = vpop.permute.xlu2 %1378 }
 0x6e4   : > { %v1371_v4 = vpop.permute.xlu1 %1370 }
 0x6ec   : > { %v1363_v7 = vpop.permute.xlu1 %1362 }
 0x6ed   : > { %v1387_v8 = vsel %vm1386_vm2, %v1385_v6, %v1363_v7 }
 0x6ee   : > { %v1389_v9 = vsel %vm1388_vm3, %v1387_v8, %v1367_v5  ;;  %v1585_v5 = vld [vmem:[#allocation8 + $0xe8] sm:$0xff]  ;;  %v1568_v8 = vld [vmem:[#allocation8 + $0x60] sm:$0xff] }
 0x6ef   : > { %v1391_v10 = vsel %vm1390_vm4, %v1389_v9, %v1371_v4  ;;  %v1569_v4 = vld [vmem:[#allocation8 + $0x68] sm:$0xff]  ;;  %v1584_v9 = vld [vmem:[#allocation8 + $0xe0] sm:$0xff]  ;;  %1614 = vmatpush.msra.mxu1 %v1585_v5 }
 0x6f0   : > { %v1393_v12 = vsel %vm1392_vm5, %v1391_v10, %v1375_v11  ;;  %1594 = vmatpush.msra.mxu0 %v1569_v4  ;;  %v1567_v11 = vld [vmem:[#allocation8 + $0x58] sm:$0xff]  ;;  %v1708_v4 = vld [vmem:[#allocation2 + $0x2e0] sm:$0xff] }
 0x6f1   : > { %v1395_v15 = vsel %vm1394_vm6, %v1393_v12, %v1379_v13  ;;  %v1583_v12 = vld [vmem:[#allocation8 + $0xd8] sm:$0xff]  ;;  %1615 = vmatpush.msra.mxu1 %v1584_v9  ;;  %v1566_v13 = vld [vmem:[#allocation8 + $0x50] sm:$0xff] }
 0x6f2   : > { %1595 = vmatpush.msra.mxu0 %v1568_v8  ;;  %v1703_v9 = vld [vmem:[#allocation2 + $0x2b8] sm:$0xff] }
 0x6f3   : > { %1616 = vmatpush.msra.mxu1 %v1583_v12  ;;  %1723 = vmatpush.msra.mxu2 %v1703_v9  ;;  %v1700_v12 = vld [vmem:[#allocation2 + $0x2a0] sm:$0xff] }
 0x6f4   : > { %v1383_v14 = vpop.permute.xlu1 %1382  ;;  %1596 = vmatpush.msra.mxu0 %v1567_v11  ;;  %v1705_v11 = vld [vmem:[#allocation2 + $0x2c8] sm:$0xff] }
 0x6f5   : > { %v1397_v25 = vsel %vm1396_vm7, %v1395_v15, %v1383_v14  ;;  %v1582_v14 = vld [vmem:[#allocation8 + $0xd0] sm:$0xff]  ;;  %v1565_v15 = vld [vmem:[#allocation8 + $0x48] sm:$0xff]  ;;  %1724 = vmatpush.msra.mxu2 %v1700_v12 }
 0x6f6   : > { %1434 = vmatmul.f32.vlgmr.msrb.gmra.mxu1 %v1397_v25  ;;  %v1581_v25 = vld [vmem:[#allocation8 + $0xc8] sm:$0xff]  ;;  %1597 = vmatpush.msra.mxu0 %v1566_v13 }
 0x6f7   : > { %1617 = vmatpush.msra.mxu1 %v1582_v14  ;;  %v1701_v13 = vld [vmem:[#allocation2 + $0x2a8] sm:$0xff]  ;;  %v1702_v14 = vld [vmem:[#allocation2 + $0x2b0] sm:$0xff] }
 0x6f8   : > { %1598 = vmatpush.msra.mxu0 %v1565_v15  ;;  %v1697_v15 = vld [vmem:[#allocation2 + $0x288] sm:$0xff] }
 0x6f9   : > { %1618 = vmatpush.msra.mxu1 %v1581_v25  ;;  %v1698_v25 = vld [vmem:[#allocation2 + $0x290] sm:$0xff]  ;;  %1725 = vmatpush.msra.mxu2 %v1697_v15 }
 0x773   : > { %v1435_v17 = vpop.f32.mrf.mxu1 }
 0x774   : > { %v1436_v18 = vadd.f32 %v4893_v16, %v1435_v17  ;;  %v1564_v16 = vld [vmem:[#allocation8 + $0x40] sm:$0xff] }
 0x775   : > { %v1580_v17 = vld [vmem:[#allocation8 + $0xc0] sm:$0xff]  ;;  %1599 = vmatpush.msra.mxu0 %v1564_v16  ;;  %v1699_v16 = vld [vmem:[#allocation2 + $0x298] sm:$0xff] }
 0x776   : > { %v1438_v19 = vadd.f32 %v1436_v18, %v5495_v55  ;;  %1619 = vmatpush.msra.mxu1 %v1580_v17  ;;  %v1694_v17 = vld [vmem:[#allocation2 + $0x270] sm:$0xff] }
 0x777   : > { %1726 = vmatpush.msra.mxu2 %v1694_v17 }
 0x778   : > { %1441 = vadd.xlane.f32.xlu0 %v1438_v19  ;;  %1620 = vmatpush.msra.mxu1 %v1579_v20  ;;  %v1691_v20 = vld [vmem:[#allocation2 + $0x258] sm:$0xff] }
 0x779   : > { %1727 = vmatpush.msra.mxu2 %v1691_v20 }
 0x77a   : > { %1621 = vmatpush.msra.mxu1 %v1578_v23  ;;  %v1688_v23 = vld [vmem:[#allocation2 + $0x240] sm:$0xff] }
 0x77b   : > { %1728 = vmatpush.msra.mxu2 %v1688_v23 }
 0x77c   : > { %1622 = vmatpush.msra.mxu1 %v1577_v27  ;;  %v1685_v27 = vld [vmem:[#allocation2 + $0x228] sm:$0xff] }
 0x77d   : > { %1729 = vmatpush.msra.mxu2 %v1685_v27 }
 0x77e   : > { %1623 = vmatpush.msra.mxu1 %v1576_v30  ;;  %v1682_v30 = vld [vmem:[#allocation2 + $0x210] sm:$0xff] }
 0x77f   : > { %1730 = vmatpush.msra.mxu2 %v1682_v30 }
 0x7eb   : > { %v1442_v55 = vpop.xlane.xlu0 %1441 }
 0x7ec   : > { %v1450_v31 = vmul.f32 %v5616_v0, %v1442_v55 }
 0x7ee   : > { %v5619_v32 = vsub.f32 %v1438_v19, %v1450_v31  ;;  %v1563_v19 = vld [vmem:[#allocation8 + $0x38] sm:$0xff] }
 0x7ef   : > { %1600 = vmatpush.msra.mxu0 %v1563_v19  ;;  %v1559_v31 = vld [vmem:[#allocation8 + $0x18] sm:$0xff]  ;;  %v1696_v19 = vld [vmem:[#allocation2 + $0x280] sm:$0xff] }
 0x7f0   : > { %v1452_v33 = vmul.f32 %v5619_v32, %v5619_v32 }
 0x7f1   : > { %1601 = vmatpush.msra.mxu0 %v1562_v22  ;;  %v1693_v22 = vld [vmem:[#allocation2 + $0x268] sm:$0xff] }
 0x7f2   : > { %1453 = vadd.xlane.f32.xlu1 %v1452_v33  ;;  %v1575_v33 = vld [vmem:[#allocation8 + $0x98] sm:$0xff] }
 0x7f3   : > { %1602 = vmatpush.msra.mxu0 %v1561_v26  ;;  %1624 = vmatpush.msra.mxu1 %v1575_v33  ;;  %v1690_v26 = vld [vmem:[#allocation2 + $0x250] sm:$0xff]  ;;  %v1679_v33 = vld [vmem:[#allocation2 + $0x1f8] sm:$0xff] }
 0x7f4   : > { %1731 = vmatpush.msra.mxu2 %v1679_v33 }
 0x7f5   : > { %1603 = vmatpush.msra.mxu0 %v1560_v29  ;;  %1625 = vmatpush.msra.mxu1 %v1574_v42  ;;  %v1687_v29 = vld [vmem:[#allocation2 + $0x238] sm:$0xff]  ;;  %v1670_v42 = vld [vmem:[#allocation2 + $0x1b0] sm:$0xff] }
 0x7f7   : > { %1604 = vmatpush.msra.mxu0 %v1559_v31  ;;  %1626 = vmatpush.msra.mxu1 %v1573_v44  ;;  %v1684_v31 = vld [vmem:[#allocation2 + $0x220] sm:$0xff] }
 0x7f8   : > { %v1672_v44 = vld [vmem:[#allocation2 + $0x1c0] sm:$0xff] }
 0x7f9   : > { %1605 = vmatpush.msra.mxu0 %v1558_v41  ;;  %1627 = vmatpush.msra.mxu1 %v1572_v46  ;;  %v1675_v41 = vld [vmem:[#allocation2 + $0x1d8] sm:$0xff]  ;;  %v1668_v46 = vld [vmem:[#allocation2 + $0x1a0] sm:$0xff] }
 0x7fb   : > { %1606 = vmatpush.msra.mxu0 %v1557_v43  ;;  %v1671_v43 = vld [vmem:[#allocation2 + $0x1b8] sm:$0xff] }
 0x7fd   : > { %1607 = vmatpush.msra.mxu0 %v1556_v45  ;;  %v1667_v45 = vld [vmem:[#allocation2 + $0x198] sm:$0xff] }
 0x7ff   : > { %1761 = vmatpush.msrb.mxu0 %v1711_v1 }
 0x801   : > { %1762 = vmatpush.msrb.mxu0 %v1708_v4  ;;  %v1717_v4 = vperm.slane %v4699_v3, 2 }
 0x803   : > { %1763 = vmatpush.msrb.mxu0 %v1705_v11 }
 0x805   : > { %1764 = vmatpush.msrb.mxu0 %v1702_v14 }
 0x807   : > { %1765 = vmatpush.msrb.mxu0 %v1699_v16 }
 0x809   : > { %1766 = vmatpush.msrb.mxu0 %v1696_v19 }
 0x80b   : > { %1767 = vmatpush.msrb.mxu0 %v1693_v22 }
 0x80d   : > { %1768 = vmatpush.msrb.mxu0 %v1690_v26 }
 0x80f   : > { %1769 = vmatpush.msrb.mxu0 %v1687_v29 }
 0x811   : > { %1770 = vmatpush.msrb.mxu0 %v1684_v31 }
 0x865   : > { %v1454_v6 = vpop.xlane.xlu1 %1453 }
 0x866   : > { %v1455_v7 = vmul.f32 %v1454_v6, %v5616_v0 }
 0x868   : > { %v1456_v10 = vadd.f32 1e-05, %v1455_v7 }
 0x86a   : > { %4951 = vrsqrt.f32 %v1456_v10  ;;  %vm1463_vm10 = vweird.f32 %v1456_v10 }
 0x870   : > { %v4952_v18 = vpop.eup %4951 }
 0x871   : > { %v1458_v21 = vmul.f32 %v4952_v18, %v1456_v10  ;;  %vm1464_vm9 = vweird.f32 %v4952_v18  ;;  %v1704_v10 = vld [vmem:[#allocation2 + $0x2c0] sm:$0xff] }
 0x872   : > { %vm1465_vm11 = vmor %vm1463_vm10, %vm1464_vm9  ;;  %1743 = vmatpush.msrb.mxu3 %v1704_v10 }
 0x873   : > { %v1459_v24 = vmul.f32 %v4952_v18, %v1458_v21  ;;  %v1692_v21 = vld [vmem:[#allocation2 + $0x260] sm:$0xff] }
 0x874   : > { %1744 = vmatpush.msrb.mxu3 %v1701_v13 }
 0x875   : > { %v1460_v28 = vmul.f32 0.5, %v1459_v24  ;;  %v1689_v24 = vld [vmem:[#allocation2 + $0x248] sm:$0xff] }
 0x876   : > { %1745 = vmatpush.msrb.mxu3 %v1698_v25 }
 0x877   : > { %v1461_v55 = vsub.f32 1.5, %v1460_v28  ;;  %v1686_v28 = vld [vmem:[#allocation2 + $0x230] sm:$0xff] }
 0x879   : > { %v1462_v34 = vmul.f32 %v4952_v18, %v1461_v55  ;;  %v1683_v55 = vld [vmem:[#allocation2 + $0x218] sm:$0xff] }
 0x87b   : > { %v1466_v36 = vsel %vm1465_vm11, %v4952_v18, %v1462_v34  ;;  %v1695_v18 = vld [vmem:[#allocation2 + $0x278] sm:$0xff]  ;;  %v1680_v34 = vld [vmem:[#allocation2 + $0x200] sm:$0xff] }
 0x87c   : > { %v1467_v37 = vmul.f32 %v1466_v36, %v5619_v32  ;;  %v1508_v32 = vld [vmem:[%s6158_s11] sm:$0x3]  ;;  %1746 = vmatpush.msrb.mxu3 %v1695_v18 }
 0x87d   : > { %v1510_v47 = vperm.slane %v1508_v32, 0  ;;  %v1511_v48 = vperm.slane %v1508_v32, 1  ;;  %v1676_v36 = vld [vmem:[#allocation2 + $0x1e0] sm:$0xff]  ;;  %v1669_v32 = vld [vmem:[#allocation2 + $0x1a8] sm:$0xff] }
 0x87e   : > { %v1471_v39 = vmul.f32 %v4894_v35, %v1467_v37  ;;  %1747 = vmatpush.msrb.mxu3 %v1692_v21  ;;  %v1681_v35 = vld [vmem:[#allocation2 + $0x208] sm:$0xff]  ;;  %1732 = vmatpush.msra.mxu2 %v1676_v36 }
 0x87f   : > { %1771 = vmatpush.msrb.mxu0 %v1681_v35  ;;  %v1677_v37 = vld [vmem:[#allocation2 + $0x1e8] sm:$0xff] }
 0x880   : > { %v1475_v40 = vadd.f32 %v4895_v38, %v1471_v39  ;;  %1748 = vmatpush.msrb.mxu3 %v1689_v24  ;;  %v1678_v38 = vld [vmem:[#allocation2 + $0x1f0] sm:$0xff]  ;;  %v1673_v39 = vld [vmem:[#allocation2 + $0x1c8] sm:$0xff] }
 0x881   : > { %1772 = vmatpush.msrb.mxu0 %v1678_v38  ;;  %1733 = vmatpush.msra.mxu2 %v1673_v39 }
 0x882   : > { %1530 = vmatmul.f32.vlgmr.msrb.gmra.mxu2 %v1475_v40  ;;  %1550 = vmatmul.f32.vlgmr.msra.gmra.mxu3 %v1475_v40 }
 0x883   : > { %1749 = vmatpush.msrb.mxu3 %v1686_v28  ;;  %1773 = vmatpush.msrb.mxu0 %v1675_v41 }
 0x884   : > { %1734 = vmatpush.msra.mxu2 %v1670_v42 }
 0x885   : > { %1750 = vmatpush.msrb.mxu3 %v1683_v55  ;;  %1774 = vmatpush.msrb.mxu0 %v1672_v44 }
 0x886   : > { %1735 = vmatpush.msra.mxu2 %v1667_v45 }
 0x887   : > { %1751 = vmatpush.msrb.mxu3 %v1680_v34  ;;  %1775 = vmatpush.msrb.mxu0 %v1669_v32 }
 0x889   : > { %1752 = vmatpush.msrb.mxu3 %v1677_v37 }
 0x905   : > { %v1531_v49 = vpop.f32.mrf.mxu2  ;;  %v1551_v50 = vpop.f32.mrf.mxu3 }
 0x906   : > { %v1532_v51 = vadd.f32 %v1531_v49, %v1510_v47  ;;  %v1552_v52 = vadd.f32 %v1551_v50, %v1511_v48  ;;  %v1664_v47 = vld [vmem:[#allocation2 + $0x180] sm:$0xff]  ;;  %v1665_v48 = vld [vmem:[#allocation2 + $0x188] sm:$0xff]  ;;  %v1666_v49 = vld [vmem:[#allocation2 + $0x190] sm:$0xff] }
 0x907   : > { %1736 = vmatpush.msra.mxu2 %v1664_v47  ;;  %1776 = vmatpush.msrb.mxu0 %v1666_v49 }
 0x908   : > { %v1554_v53 = vmax.f32 %v1532_v51, 0.0  ;;  %v1555_v54 = vmax.f32 %v1552_v52, 0.0 }
 0x90a   : > { %1608 = vmatmul.f32.vlgmr.msra.gmra.mxu0 %v1554_v53  ;;  %1628 = vmatmul.f32.vlgmr.msra.gmra.mxu1 %v1555_v54 }
 0x987   : > { %v1609_v57 = vpop.f32.mrf.mxu0  ;;  %v1629_v59 = vpop.f32.mrf.mxu1 }
 0x988   : > { %v1610_v58 = vadd.f32 %v4896_v56, %v1609_v57 }
 0x98a   : > { %v1630_v60 = vadd.f32 %v1629_v59, %v1610_v58 }
 0x98c   : > { %v1632_v61 = vadd.f32 %v1630_v60, %v1475_v40  ;;  %v1674_v40 = vld [vmem:[#allocation2 + $0x1d0] sm:$0xff]  ;;  %v4897_v60 = vld [vmem:[%s6161_s14] ss:$0 sm:$0xff] }
 0x98d   : > { %1753 = vmatpush.msrb.mxu3 %v1674_v40 }
 0x98e   : > { %1635 = vadd.xlane.f32.xlu2 %v1632_v61 }
 0x98f   : > { %1754 = vmatpush.msrb.mxu3 %v1671_v43 }
 0x991   : > { %1755 = vmatpush.msrb.mxu3 %v1668_v46 }
 0x993   : > { %1756 = vmatpush.msrb.mxu3 %v1665_v48 }
 0xa01   : > { %v1636_v5 = vpop.xlane.xlu2 %1635 }
 0xa02   : > { %v1637_v6 = vmul.f32 %v1636_v5, %v5616_v0 }
 0xa04   : > { %v5638_v7 = vsub.f32 %v1632_v61, %v1637_v6 }
 0xa06   : > { %v1639_v8 = vmul.f32 %v5638_v7, %v5638_v7 }
 0xa08   : > { %1640 = vadd.xlane.f32.xlu0 %v1639_v8  ;;  %v1716_v8 = vperm.slane %v4699_v3, 1 }
 0xa7b   : > { %v1641_v50 = vpop.xlane.xlu0 %1640 }
 0xa7c   : > { %v1642_v51 = vmul.f32 %v1641_v50, %v5616_v0 }
 0xa7e   : > { %v1643_v52 = vadd.f32 1e-05, %v1642_v51 }
 0xa80   : > { %4953 = vrsqrt.f32 %v1643_v52  ;;  %vm1650_vm13 = vweird.f32 %v1643_v52 }
 0xa86   : > { %v4954_v53 = vpop.eup %4953 }
 0xa87   : > { %v1645_v54 = vmul.f32 %v4954_v53, %v1643_v52  ;;  %vm1651_vm12 = vweird.f32 %v4954_v53 }
 0xa88   : > { %vm1652_vm14 = vmor %vm1650_vm13, %vm1651_vm12 }
 0xa89   : > { %v1646_v56 = vmul.f32 %v4954_v53, %v1645_v54 }
 0xa8b   : > { %v1647_v57 = vmul.f32 0.5, %v1646_v56 }
 0xa8d   : > { %v1648_v58 = vsub.f32 1.5, %v1647_v57 }
 0xa8f   : > { %v1649_v59 = vmul.f32 %v4954_v53, %v1648_v58 }
 0xa91   : > { %v1653_v61 = vsel %vm1652_vm14, %v4954_v53, %v1649_v59 }
 0xa92   : > { %v1654_v62 = vmul.f32 %v1653_v61, %v5638_v7  ;;  %v1715_v7 = vperm.slane %v4699_v3, 0 }
 0xa94   : > { %v1658_v1 = vmul.f32 %v4897_v60, %v1654_v62 }
 0xa96   : > { %v5650_v2 = vadd.f32 %v4898_v63, %v1658_v1 }
 0xa98   : > { %1737 = vmatmul.f32.vlgmr.msra.gmra.mxu2 %v5650_v2  ;;  %1757 = vmatmul.f32.vlgmr.msrb.gmra.mxu3 %v5650_v2 }
 0xa99   : > { %1777 = vmatmul.f32.vlgmr.msrb.gmra.mxu0 %v5650_v2 }
 0xb16   : > { %v1778_v5 = vpop.f32.mrf.mxu0 }
 0xb17   : > { %v5658_v6 = vadd.f32 %v1778_v5, %v1717_v4 }
 0xb19   : > { %1836 = vmatpush.msrb.mxu2 %v5658_v6 }
 0xb1b   : > { %v1738_v9 = vpop.f32.mrf.mxu2  ;;  %v1758_v10 = vpop.f32.mrf.mxu3 }
 0xb1c   : > { %v1739_v11 = vadd.f32 %v1738_v9, %v1715_v7  ;;  %v1759_v12 = vadd.f32 %v1758_v10, %v1716_v8 }
 0xb1e   : > { %1909 = vrot.lane.b32.xlu2 %v1759_v12, %s5271_s17  ;;  %1843 = vrot.lane.b32.xlu1 %v1759_v12, %s5270_s16 }
 0xb1f   : > { %4700 = vmatpush.xpose.msk.msrb.mxu1 %vm698_vm0, %v1759_v12  ;;  %1841 = vrot.lane.b32.xlu0 %v1739_v11, %s5270_s16 }
 0xb22   : > { %4701 = vmatmul.msk.f32.vlgmr.msrb.gmra.mxu1 %vm698_vm0, %v1739_v11 }
 0xb26   : > { %2104 = vrot.lane.b32.xlu2 %v1759_v12, %s5272_s18  ;;  %1974 = vrot.lane.b32.xlu1 %v1759_v12, %s5269_s6 }
 0xb27   : > { %1907 = vrot.lane.b32.xlu0 %v1739_v11, %s5271_s17 }
 0xb2e   : > { %2169 = vrot.lane.b32.xlu2 %v1759_v12, %s5273_s19  ;;  %1972 = vrot.lane.b32.xlu1 %v1739_v11, %s5269_s6 }
 0xb2f   : > { %2039 = vrot.lane.b32.xlu0 %v1759_v12, %s5275_s1 }
 0xb36   : > { %2232 = vrot.lane.b32.xlu2 %v1739_v11, %s5274_s20  ;;  %2037 = vrot.lane.b32.xlu1 %v1739_v11, %s5275_s1 }
 0xb37   : > { %2102 = vrot.lane.b32.xlu0 %v1739_v11, %s5272_s18 }
 0xb3e   : > { %2234 = vrot.lane.b32.xlu1 %v1759_v12, %s5274_s20 }
 0xb3f   : > { %2167 = vrot.lane.b32.xlu0 %v1739_v11, %s5273_s19 }
 0xb78   : > { %v1910_v13 = vpop.permute.xlu2 %1909 }
 0xb79   : > { %4706 = vmatpush.xpose.msk.msra.mxu1 %vm698_vm0, %v1910_v13 }
 0xb80   : > { %v2105_v25 = vpop.permute.xlu2 %2104 }
 0xb88   : > { %v2170_v22 = vpop.permute.xlu2 %2169 }
 0xb90   : > { %v1844_v14 = vpop.permute.xlu1 %1843  ;;  %v2233_v28 = vpop.permute.xlu2 %2232 }
 0xb91   : > { %v1842_v15 = vpop.permute.xlu0 %1841  ;;  %4703 = vmatpush.xpose.msk.msra.mxu3 %vm698_vm0, %v1844_v14 }
 0xb94   : > { %4704 = vmatmul.msk.f32.vlgmr.msra.gmra.mxu3 %vm698_vm0, %v1842_v15 }
 0xb98   : > { %v1975_v16 = vpop.permute.xlu1 %1974 }
 0xb99   : > { %v1908_v17 = vpop.permute.xlu0 %1907  ;;  %4709 = vmatpush.xpose.msk.msrb.mxu3 %vm698_vm0, %v1975_v16 }
 0xb9a   : > { %4707 = vmatmul.msk.f32.vlgmr.msra.gmra.mxu1 %vm698_vm0, %v1908_v17 }
 0xb9d   : > { %4715 = vmatpush.xpose.msk.msra.mxu3 %vm698_vm0, %v2105_v25 }
 0xb9f   : > { %v1804_v18 = vpop.f32.mrf.mxu1 }
 0xba0   : > { %v1973_v19 = vpop.permute.xlu1 %1972  ;;  %v1807_v20 = vsel %vm866_vm1, %v1804_v18, -inf }
 0xba1   : > { %v2040_v21 = vpop.permute.xlu0 %2039  ;;  %1808 = vmax.xlane.f32.xlu1 %v1807_v20  ;;  %4710 = vmatmul.msk.f32.vlgmr.msrb.gmra.mxu3 %vm698_vm0, %v1973_v19 }
 0xba2   : > { %4712 = vmatpush.xpose.msk.msrb.mxu1 %vm698_vm0, %v2040_v21 }
 0xba6   : > { %4718 = vmatpush.xpose.msk.msra.mxu1 %vm698_vm0, %v2170_v22 }
 0xba8   : > { %v2038_v23 = vpop.permute.xlu1 %2037 }
 0xba9   : > { %v2103_v24 = vpop.permute.xlu0 %2102  ;;  %4713 = vmatmul.msk.f32.vlgmr.msrb.gmra.mxu1 %vm698_vm0, %v2038_v23 }
 0xbaa   : > { %4716 = vmatmul.msk.f32.vlgmr.msra.gmra.mxu3 %vm698_vm0, %v2103_v24 }
 0xbb0   : > { %v2235_v26 = vpop.permute.xlu1 %2234 }
 0xbb1   : > { %v2168_v27 = vpop.permute.xlu0 %2167  ;;  %4721 = vmatpush.xpose.msk.msrb.mxu3 %vm698_vm0, %v2235_v26 }
 0xbb2   : > { %4719 = vmatmul.msk.f32.vlgmr.msra.gmra.mxu1 %vm698_vm0, %v2168_v27 }
 0xbb4   : > { %4722 = vmatmul.msk.f32.vlgmr.msrb.gmra.mxu3 %vm698_vm0, %v2233_v28 }
 0xc14   : > { %v1809_v29 = vpop.xlane.xlu1 %1808 }
 0xc15   : > { %v1810_v30 = vsub.f32 %v1804_v18, %v1809_v29 }
 0xc17   : > { %v1811_v55 = vmul.f32 1.442695, %v1810_v30  ;;  %v1932_v31 = vpop.f32.mrf.mxu1  ;;  %v1866_v33 = vpop.f32.mrf.mxu3 }
 0xc18   : > { %v1935_v34 = vsel %vm866_vm1, %v1932_v31, -inf  ;;  %v1869_v35 = vsel %vm866_vm1, %v1866_v33, -inf }
 0xc19   : > { %4955 = vpow2.f32 %v1811_v55  ;;  %1936 = vmax.xlane.f32.xlu2 %v1935_v34  ;;  %1870 = vmax.xlane.f32.xlu0 %v1869_v35 }
 0xc1f   : > { %v4956_v36 = vpop.eup %4955 }
 0xc20   : > { %v1813_v37 = vsel %vm866_vm1, %v4956_v36, 0.0 }
 0xc21   : > { %1814 = vadd.xlane.f32.xlu2 %v1813_v37 }
 0xc24   : > { %v1997_v38 = vpop.f32.mrf.mxu3 }
 0xc25   : > { %v2000_v39 = vsel %vm866_vm1, %v1997_v38, -inf }
 0xc26   : > { %v2062_v40 = vpop.f32.mrf.mxu1  ;;  %2001 = vmax.xlane.f32.xlu1 %v2000_v39 }
 0xc27   : > { %v2065_v41 = vsel %vm866_vm1, %v2062_v40, -inf }
 0xc28   : > { %2066 = vmax.xlane.f32.xlu0 %v2065_v41 }
 0xc2d   : > { %v2127_v42 = vpop.f32.mrf.mxu3 }
 0xc2e   : > { %v2130_v43 = vsel %vm866_vm1, %v2127_v42, -inf }
 0xc2f   : > { %v2192_v44 = vpop.f32.mrf.mxu1  ;;  %2131 = vmax.xlane.f32.xlu2 %v2130_v43 }
 0xc30   : > { %v2195_v45 = vsel %vm866_vm1, %v2192_v44, -inf }
 0xc31   : > { %2196 = vmax.xlane.f32.xlu1 %v2195_v45 }
 0xc37   : > { %v2257_v46 = vpop.f32.mrf.mxu3 }
 0xc38   : > { %v2260_v32 = vsel %vm866_vm1, %v2257_v46, -inf }
 0xc39   : > { %2261 = vmax.xlane.f32.xlu0 %v2260_v32 }
 0xc47   : > { %1946 = vrot.lane.b32.xlu2 %v5658_v6, %s5271_s17 }
 0xc8c   : > { %v1937_v47 = vpop.xlane.xlu2 %1936  ;;  %v1871_v48 = vpop.xlane.xlu0 %1870 }
 0xc8d   : > { %v1938_v49 = vsub.f32 %v1932_v31, %v1937_v47  ;;  %v1872_v50 = vsub.f32 %v1866_v33, %v1871_v48 }
 0xc8f   : > { %v1939_v51 = vmul.f32 1.442695, %v1938_v49  ;;  %v1873_v52 = vmul.f32 1.442695, %v1872_v50 }
 0xc91   : > { %4957 = vpow2.f32 %v1939_v51 }
 0xc92   : > { %4959 = vpow2.f32 %v1873_v52 }
 0xc94   : > { %v1815_v53 = vpop.xlane.xlu2 %1814 }
 0xc95   : > { %4961 = vrcp.f32 %v1815_v53 }
 0xc97   : > { %v4958_v54 = vpop.eup %4957 }
 0xc98   : > { %v5702_v56 = vpop.eup %4959  ;;  %v1941_v57 = vsel %vm866_vm1, %v4958_v54, 0.0 }
 0xc99   : > { %1942 = vadd.xlane.f32.xlu0 %v1941_v57  ;;  %v1875_v58 = vsel %vm866_vm1, %v5702_v56, 0.0  ;;  %v2002_v59 = vpop.xlane.xlu1 %2001 }
 0xc9a   : > { %1876 = vadd.xlane.f32.xlu1 %v1875_v58  ;;  %v2003_v60 = vsub.f32 %v1997_v38, %v2002_v59 }
 0xc9b   : > { %v4962_v61 = vpop.eup %4961  ;;  %v2067_v7 = vpop.xlane.xlu0 %2066 }
 0xc9c   : > { %v1817_v62 = vmul.f32 %v4962_v61, %v4956_v36  ;;  %v2004_v63 = vmul.f32 1.442695, %v2003_v60  ;;  %v2068_v8 = vsub.f32 %v2062_v40, %v2067_v7  ;;  %v2348_v60 = vld [vmem:[#allocation5 + $0xf8] sm:$0xff]  ;;  %v2347_v61 = vld [vmem:[#allocation5 + $0xf0] sm:$0xff] }
 0xc9d   : > { %2354 = vmatpush.msrb.mxu1 %v2348_v60  ;;  %v2340_v7 = vld [vmem:[#allocation5 + $0xb8] sm:$0xff] }
 0xc9e   : > { %4963 = vpow2.f32 %v2004_v63  ;;  %4702 = vmatmul.msk.f32.vlgmr.msrb.gmra.mxu2 %vm866_vm1, %v1817_v62  ;;  %v2069_v10 = vmul.f32 1.442695, %v2068_v8  ;;  %v2346_v62 = vld [vmem:[#allocation5 + $0xe8] sm:$0xff]  ;;  %v2345_v63 = vld [vmem:[#allocation5 + $0xe0] sm:$0xff]  ;;  %v2339_v8 = vld [vmem:[#allocation5 + $0xb0] sm:$0xff] }
 0xc9f   : > { %2355 = vmatpush.msrb.mxu1 %v2347_v61  ;;  %v2415_v60 = vld [vmem:[#allocation7 + $0x138] sm:$0xff]  ;;  %v2412_v61 = vld [vmem:[#allocation7 + $0x120] sm:$0xff] }
 0xca0   : > { %4965 = vpow2.f32 %v2069_v10  ;;  %v2337_v10 = vld [vmem:[#allocation5 + $0xa0] sm:$0xff] }
 0xca1   : > { %2356 = vmatpush.msrb.mxu1 %v2346_v62  ;;  %v2413_v62 = vld [vmem:[#allocation7 + $0x128] sm:$0xff] }
 0xca2   : > { %v2132_v1 = vpop.xlane.xlu2 %2131 }
 0xca3   : > { %v2133_v12 = vsub.f32 %v2127_v42, %v2132_v1  ;;  %v2344_v1 = vld [vmem:[#allocation5 + $0xd8] sm:$0xff]  ;;  %2357 = vmatpush.msrb.mxu1 %v2345_v63  ;;  %v2410_v63 = vld [vmem:[#allocation7 + $0x110] sm:$0xff] }
 0xca4   : > { %v4964_v3 = vpop.eup %4963  ;;  %v2197_v9 = vpop.xlane.xlu1 %2196 }
 0xca5   : > { %v2006_v4 = vsel %vm866_vm1, %v4964_v3, 0.0  ;;  %v2198_v11 = vsub.f32 %v2192_v44, %v2197_v9  ;;  %v2134_v14 = vmul.f32 1.442695, %v2133_v12  ;;  %2358 = vmatpush.msrb.mxu1 %v2344_v1  ;;  %v2338_v9 = vld [vmem:[#allocation5 + $0xa8] sm:$0xff]  ;;  %v2335_v12 = vld [vmem:[#allocation5 + $0x90] sm:$0xff]  ;;  %v2411_v1 = vld [vmem:[#allocation7 + $0x118] sm:$0xff] }
 0xca6   : > { %2007 = vadd.xlane.f32.xlu2 %v2006_v4  ;;  %v4966_v25 = vpop.eup %4965  ;;  %v2342_v4 = vld [vmem:[#allocation5 + $0xc8] sm:$0xff] }
 0xca7   : > { %v2199_v13 = vmul.f32 1.442695, %v2198_v11  ;;  %v2071_v17 = vsel %vm866_vm1, %v4966_v25, 0.0  ;;  %v2336_v11 = vld [vmem:[#allocation5 + $0x98] sm:$0xff] }
 0xca9   : > { %4967 = vpow2.f32 %v2199_v13  ;;  %v2334_v13 = vld [vmem:[#allocation5 + $0x88] sm:$0xff] }
 0xcaa   : > { %v1947_v5 = vpop.permute.xlu2 %1946  ;;  %4969 = vpow2.f32 %v2134_v14  ;;  %v2333_v14 = vld [vmem:[#allocation5 + $0x80] sm:$0xff] }
 0xcab   : > { %1967 = vmatpush.msra.mxu2 %v1947_v5  ;;  %v2341_v5 = vld [vmem:[#allocation5 + $0xc0] sm:$0xff] }
 0xcac   : > { %v2262_v15 = vpop.xlane.xlu0 %2261 }
 0xcad   : > { %2011 = vrot.lane.b32.xlu0 %v5658_v6, %s5269_s6  ;;  %v2263_v16 = vsub.f32 %v2257_v46, %v2262_v15 }
 0xcaf   : > { %v4968_v18 = vpop.eup %4967  ;;  %v2264_v19 = vmul.f32 1.442695, %v2263_v16 }
 0xcb0   : > { %v4970_v20 = vpop.eup %4969  ;;  %v2201_v21 = vsel %vm866_vm1, %v4968_v18, 0.0 }
 0xcb1   : > { %4971 = vpow2.f32 %v2264_v19  ;;  %v2136_v22 = vsel %vm866_vm1, %v4970_v20, 0.0 }
 0xcb3   : > { %1881 = vrot.lane.b32.xlu1 %v5658_v6, %s5270_s16 }
 0xcb7   : > { %v4972_v23 = vpop.eup %4971 }
 0xcb8   : > { %v2266_v24 = vsel %vm866_vm1, %v4972_v23, 0.0 }
 0xcbe   : > { %2076 = vrot.lane.b32.xlu2 %v5658_v6, %s5275_s1 }
 0xcd7   : > { %2072 = vadd.xlane.f32.xlu0 %v2071_v17 }
 0xcdd   : > { %2202 = vadd.xlane.f32.xlu1 %v2201_v21 }
 0xcdf   : > { %2137 = vadd.xlane.f32.xlu0 %v2136_v22 }
 0xce7   : > { %2267 = vadd.xlane.f32.xlu2 %v2266_v24 }
 0xcf3   : > { %2141 = vrot.lane.b32.xlu0 %v5658_v6, %s5272_s18 }
 0xcfb   : > { %2206 = vrot.lane.b32.xlu0 %v5658_v6, %s5273_s19 }
 0xd03   : > { %2271 = vrot.lane.b32.xlu0 %v5658_v6, %s5274_s20 }
 0xd0c   : > { %v1943_v26 = vpop.xlane.xlu0 %1942 }
 0xd0d   : > { %4973 = vrcp.f32 %v1943_v26  ;;  %v1877_v29 = vpop.xlane.xlu1 %1876 }
 0xd0e   : > { %4975 = vrcp.f32 %v1877_v29  ;;  %v4899_v29 = vld [vmem:[%s6154_s7 + $0x1] ss:$0 sm:$0xff] }
 0xd13   : > { %v4974_v27 = vpop.eup %4973 }
 0xd14   : > { %v1945_v28 = vmul.f32 %v4974_v27, %v4958_v54  ;;  %v4976_v31 = vpop.eup %4975 }
 0xd15   : > { %v1879_v33 = vmul.f32 %v4976_v31, %v5702_v56 }
 0xd16   : > { %4708 = vmatmul.msk.f32.vlgmr.msra.gmra.mxu2 %vm866_vm1, %v1945_v28 }
 0xd19   : > { %v2008_v30 = vpop.xlane.xlu2 %2007 }
 0xd1a   : > { %4977 = vrcp.f32 %v2008_v30 }
 0xd1f   : > { %v2012_v35 = vpop.permute.xlu0 %2011 }
 0xd20   : > { %v4978_v6 = vpop.eup %4977 }
 0xd21   : > { %v2077_v55 = vpop.permute.xlu2 %2076  ;;  %v2010_v36 = vmul.f32 %v4978_v6, %v4964_v3  ;;  %v1838_v51 = vpop.f32.mrf.mxu2  ;;  %v2343_v3 = vld [vmem:[#allocation5 + $0xd0] sm:$0xff]  ;;  %v2437_v6 = vld [vmem:[#allocation7 + $0x1e8] sm:$0xff] }
 0xd22   : > { %2097 = vmatpush.msrb.mxu2 %v2077_v55  ;;  %2359 = vmatpush.msrb.mxu1 %v2343_v3  ;;  %v2408_v3 = vld [vmem:[#allocation7 + $0x100] sm:$0xff] }
 0xd24   : > { %2360 = vmatpush.msrb.mxu1 %v2342_v4  ;;  %v2409_v4 = vld [vmem:[#allocation7 + $0x108] sm:$0xff] }
 0xd25   : > { %v1882_v34 = vpop.permute.xlu1 %1881 }
 0xd26   : > { %1902 = vmatpush.msra.mxu0 %v1882_v34  ;;  %2361 = vmatpush.msrb.mxu1 %v2341_v5  ;;  %v2439_v34 = vld [vmem:[#allocation7 + $0x1f8] sm:$0xff] }
 0xd27   : > { %4705 = vmatmul.msk.f32.vlgmr.msra.gmra.mxu0 %vm866_vm1, %v1879_v33  ;;  %v2438_v33 = vld [vmem:[#allocation7 + $0x1f0] sm:$0xff]  ;;  %2467 = vmatpush.msra.mxu3 %v2439_v34  ;;  %v2505_v5 = vld [vmem:[#allocation8 + $0x178] sm:$0xff] }
 0xd28   : > { %2032 = vmatpush.msrb.mxu0 %v2012_v35  ;;  %2362 = vmatpush.msrb.mxu1 %v2340_v7  ;;  %v2436_v35 = vld [vmem:[#allocation7 + $0x1e0] sm:$0xff]  ;;  %v2521_v7 = vld [vmem:[#allocation8 + $0x1f8] sm:$0xff] }
 0xd29   : > { %2468 = vmatpush.msra.mxu3 %v2437_v6  ;;  %v2510_v6 = vld [vmem:[#allocation8 + $0x1a0] sm:$0xff] }
 0xd2a   : > { %2363 = vmatpush.msrb.mxu1 %v2339_v8  ;;  %v2504_v8 = vld [vmem:[#allocation8 + $0x170] sm:$0xff] }
 0xd2c   : > { %2364 = vmatpush.msrb.mxu1 %v2338_v9  ;;  %v2520_v9 = vld [vmem:[#allocation8 + $0x1f0] sm:$0xff] }
 0xd2e   : > { %2365 = vmatpush.msrb.mxu1 %v2337_v10  ;;  %v2503_v10 = vld [vmem:[#allocation8 + $0x168] sm:$0xff] }
 0xd2f   : > { %4711 = vmatmul.msk.f32.vlgmr.msrb.gmra.mxu0 %vm866_vm1, %v2010_v36 }
 0xd30   : > { %2366 = vmatpush.msrb.mxu1 %v2336_v11  ;;  %v2519_v11 = vld [vmem:[#allocation8 + $0x1e8] sm:$0xff] }
 0xd32   : > { %2367 = vmatpush.msrb.mxu1 %v2335_v12 }
 0xd34   : > { %2368 = vmatpush.msrb.mxu1 %v2334_v13 }
 0xd36   : > { %2369 = vmatpush.msrb.mxu1 %v2333_v14  ;;  %v2502_v14 = vld [vmem:[#allocation8 + $0x160] sm:$0xff] }
 0xd38   : > { %2547 = vmatpush.msra.mxu1 %v2521_v7  ;;  %v2648_v7 = vld [vmem:[#allocation2 + $0x478] sm:$0xff] }
 0xd3a   : > { %2548 = vmatpush.msra.mxu1 %v2520_v9  ;;  %v2644_v9 = vld [vmem:[#allocation2 + $0x458] sm:$0xff] }
 0xd3c   : > { %2549 = vmatpush.msra.mxu1 %v2519_v11 }
 0xd4a   : > { %v2073_v37 = vpop.xlane.xlu0 %2072 }
 0xd4b   : > { %4979 = vrcp.f32 %v2073_v37 }
 0xd50   : > { %v2203_v41 = vpop.xlane.xlu1 %2202 }
 0xd51   : > { %v4980_v38 = vpop.eup %4979 }
 0xd52   : > { %v2075_v39 = vmul.f32 %v4980_v38, %v4966_v25  ;;  %v2138_v40 = vpop.xlane.xlu0 %2137 }
 0xd53   : > { %4981 = vrcp.f32 %v2138_v40  ;;  %v2434_v40 = vld [vmem:[#allocation7 + $0x1d0] sm:$0xff] }
 0xd54   : > { %4714 = vmatmul.msk.f32.vlgmr.msrb.gmra.mxu2 %vm866_vm1, %v2075_v39  ;;  %4983 = vrcp.f32 %v2203_v41  ;;  %v2432_v41 = vld [vmem:[#allocation7 + $0x1c0] sm:$0xff] }
 0xd59   : > { %v4982_v42 = vpop.eup %4981 }
 0xd5a   : > { %v2140_v43 = vmul.f32 %v4982_v42, %v4970_v20  ;;  %v2268_v45 = vpop.xlane.xlu2 %2267  ;;  %v4984_v46 = vpop.eup %4983  ;;  %v2433_v42 = vld [vmem:[#allocation7 + $0x1c8] sm:$0xff] }
 0xd5b   : > { %4985 = vrcp.f32 %v2268_v45  ;;  %v2205_v32 = vmul.f32 %v4984_v46, %v4968_v18  ;;  %v2428_v45 = vld [vmem:[#allocation7 + $0x1a0] sm:$0xff]  ;;  %v2429_v46 = vld [vmem:[#allocation7 + $0x1a8] sm:$0xff] }
 0xd61   : > { %v4986_v48 = vpop.eup %4985 }
 0xd62   : > { %v2270_v49 = vmul.f32 %v4986_v48, %v4972_v23  ;;  %v2424_v48 = vld [vmem:[#allocation7 + $0x180] sm:$0xff] }
 0xd65   : > { %v2142_v44 = vpop.permute.xlu0 %2141 }
 0xd66   : > { %2162 = vmatpush.msra.mxu0 %v2142_v44  ;;  %v2431_v44 = vld [vmem:[#allocation7 + $0x1b8] sm:$0xff] }
 0xd67   : > { %4717 = vmatmul.msk.f32.vlgmr.msra.gmra.mxu0 %vm866_vm1, %v2140_v43  ;;  %v2430_v43 = vld [vmem:[#allocation7 + $0x1b0] sm:$0xff] }
 0xd6d   : > { %v2207_v47 = vpop.permute.xlu0 %2206 }
 0xd6e   : > { %2227 = vmatpush.msra.mxu2 %v2207_v47  ;;  %v2427_v47 = vld [vmem:[#allocation7 + $0x198] sm:$0xff] }
 0xd6f   : > { %4720 = vmatmul.msk.f32.vlgmr.msra.gmra.mxu2 %vm866_vm1, %v2205_v32  ;;  %v2426_v32 = vld [vmem:[#allocation7 + $0x190] sm:$0xff] }
 0xd70   : > { %2447 = vmatpush.msrb.mxu2 %v2438_v33  ;;  %v2511_v33 = vld [vmem:[#allocation8 + $0x1a8] sm:$0xff] }
 0xd72   : > { %2448 = vmatpush.msrb.mxu2 %v2436_v35  ;;  %v2494_v35 = vld [vmem:[#allocation8 + $0x120] sm:$0xff] }
 0xd74   : > { %2449 = vmatpush.msrb.mxu2 %v2434_v40 }
 0xd75   : > { %v2272_v50 = vpop.permute.xlu0 %2271 }
 0xd76   : > { %2292 = vmatpush.msrb.mxu0 %v2272_v50  ;;  %2450 = vmatpush.msrb.mxu2 %v2432_v41  ;;  %v2422_v50 = vld [vmem:[#allocation7 + $0x170] sm:$0xff] }
 0xd77   : > { %4723 = vmatmul.msk.f32.vlgmr.msrb.gmra.mxu0 %vm866_vm1, %v2270_v49  ;;  %v2425_v49 = vld [vmem:[#allocation7 + $0x188] sm:$0xff] }
 0xd78   : > { %2451 = vmatpush.msrb.mxu2 %v2430_v43  ;;  %2527 = vmatpush.msra.mxu0 %v2505_v5  ;;  %v4901_v43 = vld [vmem:[%s6156_s9 + $0x1] ss:$0 sm:$0xff]  ;;  %v2647_v5 = vld [vmem:[#allocation2 + $0x470] sm:$0xff] }
 0xd7a   : > { %2452 = vmatpush.msrb.mxu2 %v2428_v45  ;;  %2528 = vmatpush.msra.mxu0 %v2504_v8  ;;  %v2643_v8 = vld [vmem:[#allocation2 + $0x450] sm:$0xff] }
 0xd7c   : > { %2453 = vmatpush.msrb.mxu2 %v2426_v32  ;;  %2529 = vmatpush.msra.mxu0 %v2503_v10  ;;  %v2508_v32 = vld [vmem:[#allocation8 + $0x190] sm:$0xff]  ;;  %v2645_v10 = vld [vmem:[#allocation2 + $0x460] sm:$0xff] }
 0xd7e   : > { %2454 = vmatpush.msrb.mxu2 %v2424_v48  ;;  %2530 = vmatpush.msra.mxu0 %v2502_v14  ;;  %v2507_v48 = vld [vmem:[#allocation8 + $0x188] sm:$0xff] }
 0xd80   : > { %2455 = vmatpush.msrb.mxu2 %v2422_v50  ;;  %v2506_v50 = vld [vmem:[#allocation8 + $0x180] sm:$0xff] }
 0xd99   : > { %v1969_v52 = vpop.f32.mrf.mxu2 }
 0xd9a   : > { %2302 = vrot.lane.b32.xlu1 %v1969_v52, %s5273_s19  ;;  %v2420_v52 = vld [vmem:[#allocation7 + $0x160] sm:$0xff] }
 0xd9b   : > { %2456 = vmatpush.msrb.mxu2 %v2420_v52 }
 0xda4   : > { %v1904_v53 = vpop.f32.mrf.mxu0 }
 0xda5   : > { %2298 = vrot.lane.b32.xlu0 %v1904_v53, %s5274_s20  ;;  %v2421_v53 = vld [vmem:[#allocation7 + $0x168] sm:$0xff] }
 0xdac   : > { %v2034_v54 = vpop.f32.mrf.mxu0 }
 0xdad   : > { %2306 = vrot.lane.b32.xlu0 %v2034_v54, %s5272_s18  ;;  %v2418_v54 = vld [vmem:[#allocation7 + $0x150] sm:$0xff] }
 0xdae   : > { %2457 = vmatpush.msrb.mxu2 %v2418_v54 }
 0xdd7   : > { %v2099_v56 = vpop.f32.mrf.mxu2 }
 0xdd8   : > { %2310 = vrot.lane.b32.xlu2 %v2099_v56, %s5275_s1  ;;  %v2419_v56 = vld [vmem:[#allocation7 + $0x158] sm:$0xff] }
 0xde4   : > { %v2164_v57 = vpop.f32.mrf.mxu0 }
 0xde5   : > { %2314 = vrot.lane.b32.xlu0 %v2164_v57, %s5269_s6  ;;  %v2416_v57 = vld [vmem:[#allocation7 + $0x140] sm:$0xff] }
 0xde6   : > { %2458 = vmatpush.msrb.mxu2 %v2416_v57 }
 0xdf2   : > { %v2229_v58 = vpop.f32.mrf.mxu2 }
 0xdf3   : > { %2318 = vrot.lane.b32.xlu0 %v2229_v58, %s5271_s17  ;;  %v2417_v58 = vld [vmem:[#allocation7 + $0x148] sm:$0xff] }
 0xdf4   : > { %v2294_v59 = vpop.f32.mrf.mxu0 }
 0xdf5   : > { %2322 = vrot.lane.b32.xlu1 %v2294_v59, %s5270_s16  ;;  %v2414_v59 = vld [vmem:[#allocation7 + $0x130] sm:$0xff] }
 0xdf6   : > { %2459 = vmatpush.msrb.mxu2 %v2414_v59 }
 0xdf8   : > { %2460 = vmatpush.msrb.mxu2 %v2412_v61 }
 0xdfa   : > { %2461 = vmatpush.msrb.mxu2 %v2410_v63 }
 0xdfc   : > { %2462 = vmatpush.msrb.mxu2 %v2408_v3 }
 0xe0c   : > { %v2303_v17 = vpop.permute.xlu1 %2302 }
 0xe17   : > { %v2299_v15 = vpop.permute.xlu0 %2298 }
 0xe18   : > { %v2325_v18 = vsel %vm698_vm0, %v1838_v51, %v2299_v15  ;;  %v2423_v51 = vld [vmem:[#allocation7 + $0x178] sm:$0xff]  ;;  %v2518_v15 = vld [vmem:[#allocation8 + $0x1e0] sm:$0xff] }
 0xe19   : > { %v2326_v20 = vsel %vm1386_vm2, %v2325_v18, %v2303_v17  ;;  %v2517_v17 = vld [vmem:[#allocation8 + $0x1d8] sm:$0xff]  ;;  %2550 = vmatpush.msra.mxu1 %v2518_v15  ;;  %v2500_v18 = vld [vmem:[#allocation8 + $0x150] sm:$0xff] }
 0xe1a   : > { %v2640_v15 = vld [vmem:[#allocation2 + $0x438] sm:$0xff] }
 0xe1b   : > { %2551 = vmatpush.msra.mxu1 %v2517_v17  ;;  %v2637_v17 = vld [vmem:[#allocation2 + $0x420] sm:$0xff] }
 0xe1f   : > { %v2307_v25 = vpop.permute.xlu0 %2306 }
 0xe20   : > { %v2327_v21 = vsel %vm1388_vm3, %v2326_v20, %v2307_v25  ;;  %v2499_v20 = vld [vmem:[#allocation8 + $0x148] sm:$0xff] }
 0xe32   : > { %v2311_v19 = vpop.permute.xlu2 %2310 }
 0xe33   : > { %v2328_v22 = vsel %vm1390_vm4, %v2327_v21, %v2311_v19  ;;  %v2516_v19 = vld [vmem:[#allocation8 + $0x1d0] sm:$0xff]  ;;  %v2515_v21 = vld [vmem:[#allocation8 + $0x1c8] sm:$0xff] }
 0xe34   : > { %2552 = vmatpush.msra.mxu1 %v2516_v19  ;;  %v2639_v19 = vld [vmem:[#allocation2 + $0x430] sm:$0xff] }
 0xe36   : > { %2553 = vmatpush.msra.mxu1 %v2515_v21  ;;  %v2635_v21 = vld [vmem:[#allocation2 + $0x410] sm:$0xff] }
 0xe57   : > { %v2315_v16 = vpop.permute.xlu0 %2314 }
 0xe58   : > { %v2329_v23 = vsel %vm1392_vm5, %v2328_v22, %v2315_v16  ;;  %v2501_v16 = vld [vmem:[#allocation8 + $0x158] sm:$0xff]  ;;  %v2498_v22 = vld [vmem:[#allocation8 + $0x140] sm:$0xff] }
 0xe59   : > { %2531 = vmatpush.msra.mxu0 %v2501_v16  ;;  %v2642_v16 = vld [vmem:[#allocation2 + $0x448] sm:$0xff] }
 0xe5b   : > { %2532 = vmatpush.msra.mxu0 %v2500_v18  ;;  %v2638_v18 = vld [vmem:[#allocation2 + $0x428] sm:$0xff] }
 0xe5d   : > { %2533 = vmatpush.msra.mxu0 %v2499_v20  ;;  %v2634_v20 = vld [vmem:[#allocation2 + $0x408] sm:$0xff] }
 0xe5f   : > { %2534 = vmatpush.msra.mxu0 %v2498_v22  ;;  %v2636_v22 = vld [vmem:[#allocation2 + $0x418] sm:$0xff] }
 0xe65   : > { %v2319_v24 = vpop.permute.xlu0 %2318 }
 0xe66   : > { %v2330_v26 = vsel %vm1394_vm6, %v2329_v23, %v2319_v24  ;;  %v2514_v23 = vld [vmem:[#allocation8 + $0x1c0] sm:$0xff] }
 0xe67   : > { %v2323_v27 = vpop.permute.xlu1 %2322  ;;  %2554 = vmatpush.msra.mxu1 %v2514_v23  ;;  %v2631_v23 = vld [vmem:[#allocation2 + $0x3f0] sm:$0xff] }
 0xe68   : > { %v2331_v28 = vsel %vm1396_vm7, %v2330_v26, %v2323_v27  ;;  %v2497_v26 = vld [vmem:[#allocation8 + $0x138] sm:$0xff] }
 0xe69   : > { %2370 = vmatmul.f32.vlgmr.msrb.gmra.mxu1 %v2331_v28  ;;  %v2513_v27 = vld [vmem:[#allocation8 + $0x1b8] sm:$0xff]  ;;  %2535 = vmatpush.msra.mxu0 %v2497_v26  ;;  %v2633_v26 = vld [vmem:[#allocation2 + $0x400] sm:$0xff] }
 0xe6a   : > { %2555 = vmatpush.msra.mxu1 %v2513_v27  ;;  %v2628_v27 = vld [vmem:[#allocation2 + $0x3d8] sm:$0xff] }
 0xee6   : > { %v2371_v30 = vpop.f32.mrf.mxu1 }
 0xee7   : > { %v2372_v55 = vadd.f32 %v4899_v29, %v2371_v30  ;;  %v2496_v29 = vld [vmem:[#allocation8 + $0x130] sm:$0xff] }
 0xee8   : > { %v2512_v30 = vld [vmem:[#allocation8 + $0x1b0] sm:$0xff]  ;;  %2536 = vmatpush.msra.mxu0 %v2496_v29  ;;  %v2630_v29 = vld [vmem:[#allocation2 + $0x3e8] sm:$0xff] }
 0xee9   : > { %v2374_v31 = vadd.f32 %v2372_v55, %v5650_v2  ;;  %v2435_v2 = vld [vmem:[#allocation7 + $0x1d8] sm:$0xff]  ;;  %2556 = vmatpush.msra.mxu1 %v2512_v30  ;;  %v2625_v30 = vld [vmem:[#allocation2 + $0x3c0] sm:$0xff] }
 0xeea   : > { %2469 = vmatpush.msra.mxu3 %v2435_v2  ;;  %v4900_v2 = vld [vmem:[%s6155_s8 + $0x1] ss:$0 sm:$0xff] }
 0xeeb   : > { %2379 = vadd.xlane.f32.xlu0 %v2374_v31  ;;  %2557 = vmatpush.msra.mxu1 %v2511_v33  ;;  %v2622_v33 = vld [vmem:[#allocation2 + $0x3a8] sm:$0xff] }
 0xeec   : > { %2470 = vmatpush.msra.mxu3 %v2433_v42 }
 0xeed   : > { %2558 = vmatpush.msra.mxu1 %v2510_v6  ;;  %v2619_v6 = vld [vmem:[#allocation2 + $0x390] sm:$0xff] }
 0xeee   : > { %2471 = vmatpush.msra.mxu3 %v2431_v44 }
 0xef0   : > { %2472 = vmatpush.msra.mxu3 %v2429_v46  ;;  %v2492_v46 = vld [vmem:[#allocation8 + $0x110] sm:$0xff] }
 0xef2   : > { %2473 = vmatpush.msra.mxu3 %v2427_v47  ;;  %v2491_v47 = vld [vmem:[#allocation8 + $0x108] sm:$0xff] }
 0xef4   : > { %2474 = vmatpush.msra.mxu3 %v2425_v49  ;;  %v2490_v49 = vld [vmem:[#allocation8 + $0x100] sm:$0xff] }
 0xef6   : > { %2475 = vmatpush.msra.mxu3 %v2423_v51 }
 0xef8   : > { %2476 = vmatpush.msra.mxu3 %v2421_v53 }
 0xefa   : > { %2477 = vmatpush.msra.mxu3 %v2419_v56 }
 0xefc   : > { %2478 = vmatpush.msra.mxu3 %v2417_v58 }
 0xefe   : > { %2479 = vmatpush.msra.mxu3 %v2415_v60  ;;  %v4902_v60 = vld [vmem:[%s6160_s13 + $0x1] ss:$0 sm:$0xff] }
 0xf00   : > { %2480 = vmatpush.msra.mxu3 %v2413_v62 }
 0xf02   : > { %2481 = vmatpush.msra.mxu3 %v2411_v1 }
 0xf04   : > { %2482 = vmatpush.msra.mxu3 %v2409_v4  ;;  %v2646_v4 = vld [vmem:[#allocation2 + $0x468] sm:$0xff] }
 0xf05   : > { %2658 = vmatpush.msra.mxu2 %v2646_v4 }
 0xf06   : > { %2678 = vmatpush.msrb.mxu3 %v2647_v5  ;;  %v4904_v5 = vld [vmem:[%s6162_s15 + $0x1] ss:$0 sm:$0xff] }
 0xf07   : > { %2659 = vmatpush.msra.mxu2 %v2643_v8 }
 0xf08   : > { %2679 = vmatpush.msrb.mxu3 %v2644_v9  ;;  %v4731_v9 = vld [vmem:[%s6152_s5 + $0x6] sm:$0x7] }
 0xf09   : > { %2660 = vmatpush.msra.mxu2 %v2640_v15 }
 0xf0b   : > { %2661 = vmatpush.msra.mxu2 %v2637_v17 }
 0xf0d   : > { %2662 = vmatpush.msra.mxu2 %v2634_v20 }
 0xf0f   : > { %2663 = vmatpush.msra.mxu2 %v2631_v23 }
 0xf11   : > { %2664 = vmatpush.msra.mxu2 %v2628_v27 }
 0xf13   : > { %2665 = vmatpush.msra.mxu2 %v2625_v30 }
 0xf15   : > { %2666 = vmatpush.msra.mxu2 %v2622_v33 }
 0xf17   : > { %2667 = vmatpush.msra.mxu2 %v2619_v6 }
 0xf5e   : > { %v2380_v36 = vpop.xlane.xlu0 %2379 }
 0xf5f   : > { %v2381_v37 = vmul.f32 %v2380_v36, %v5616_v0 }
 0xf61   : > { %v5752_v38 = vsub.f32 %v2374_v31, %v2381_v37  ;;  %v2495_v31 = vld [vmem:[#allocation8 + $0x128] sm:$0xff]  ;;  %v2493_v37 = vld [vmem:[#allocation8 + $0x118] sm:$0xff] }
 0xf62   : > { %2537 = vmatpush.msra.mxu0 %v2495_v31  ;;  %v2627_v31 = vld [vmem:[#allocation2 + $0x3d0] sm:$0xff] }
 0xf63   : > { %v2383_v39 = vmul.f32 %v5752_v38, %v5752_v38 }
 0xf64   : > { %2538 = vmatpush.msra.mxu0 %v2494_v35  ;;  %v2624_v35 = vld [vmem:[#allocation2 + $0x3b8] sm:$0xff] }
 0xf65   : > { %2384 = vadd.xlane.f32.xlu1 %v2383_v39  ;;  %v2509_v39 = vld [vmem:[#allocation8 + $0x198] sm:$0xff] }
 0xf66   : > { %2539 = vmatpush.msra.mxu0 %v2493_v37  ;;  %2559 = vmatpush.msra.mxu1 %v2509_v39  ;;  %v2621_v37 = vld [vmem:[#allocation2 + $0x3a0] sm:$0xff]  ;;  %v2616_v39 = vld [vmem:[#allocation2 + $0x378] sm:$0xff] }
 0xf67   : > { %2668 = vmatpush.msra.mxu2 %v2616_v39 }
 0xf68   : > { %2540 = vmatpush.msra.mxu0 %v2492_v46  ;;  %2560 = vmatpush.msra.mxu1 %v2508_v32  ;;  %v2612_v46 = vld [vmem:[#allocation2 + $0x358] sm:$0xff]  ;;  %v2607_v32 = vld [vmem:[#allocation2 + $0x330] sm:$0xff] }
 0xf6a   : > { %2541 = vmatpush.msra.mxu0 %v2491_v47  ;;  %2561 = vmatpush.msra.mxu1 %v2507_v48  ;;  %v2608_v47 = vld [vmem:[#allocation2 + $0x338] sm:$0xff]  ;;  %v2609_v48 = vld [vmem:[#allocation2 + $0x340] sm:$0xff] }
 0xf6c   : > { %2542 = vmatpush.msra.mxu0 %v2490_v49  ;;  %2562 = vmatpush.msra.mxu1 %v2506_v50  ;;  %v2604_v49 = vld [vmem:[#allocation2 + $0x318] sm:$0xff]  ;;  %v2605_v50 = vld [vmem:[#allocation2 + $0x320] sm:$0xff] }
 0xf6e   : > { %2698 = vmatpush.msrb.mxu0 %v2648_v7 }
 0xf70   : > { %2699 = vmatpush.msrb.mxu0 %v2645_v10  ;;  %v2654_v10 = vperm.slane %v4731_v9, 2 }
 0xf72   : > { %2700 = vmatpush.msrb.mxu0 %v2642_v16 }
 0xf74   : > { %2701 = vmatpush.msrb.mxu0 %v2639_v19 }
 0xf76   : > { %2702 = vmatpush.msrb.mxu0 %v2636_v22 }
 0xf78   : > { %2703 = vmatpush.msrb.mxu0 %v2633_v26 }
 0xf7a   : > { %2704 = vmatpush.msrb.mxu0 %v2630_v29 }
 0xf7c   : > { %2705 = vmatpush.msrb.mxu0 %v2627_v31 }
 0xf7e   : > { %2706 = vmatpush.msrb.mxu0 %v2624_v35 }
 0xf80   : > { %2707 = vmatpush.msrb.mxu0 %v2621_v37 }
 0xfd8   : > { %v2385_v12 = vpop.xlane.xlu1 %2384 }
 0xfd9   : > { %v2386_v13 = vmul.f32 %v2385_v12, %v5616_v0 }
 0xfdb   : > { %v2387_v25 = vadd.f32 1e-05, %v2386_v13 }
 0xfdd   : > { %4987 = vrsqrt.f32 %v2387_v25  ;;  %vm2394_vm8 = vweird.f32 %v2387_v25 }
 0xfe3   : > { %v4988_v24 = vpop.eup %4987 }
 0xfe4   : > { %v2389_v28 = vmul.f32 %v4988_v24, %v2387_v25  ;;  %vm2395_vm15 = vweird.f32 %v4988_v24  ;;  %v2641_v25 = vld [vmem:[#allocation2 + $0x440] sm:$0xff] }
 0xfe5   : > { %vm2396_vm9 = vmor %vm2394_vm8, %vm2395_vm15  ;;  %2680 = vmatpush.msrb.mxu3 %v2641_v25 }
 0xfe6   : > { %v2390_v55 = vmul.f32 %v4988_v24, %v2389_v28  ;;  %v2629_v28 = vld [vmem:[#allocation2 + $0x3e0] sm:$0xff] }
 0xfe7   : > { %2681 = vmatpush.msrb.mxu3 %v2638_v18 }
 0xfe8   : > { %v2391_v34 = vmul.f32 0.5, %v2390_v55  ;;  %v2626_v55 = vld [vmem:[#allocation2 + $0x3c8] sm:$0xff] }
 0xfe9   : > { %2682 = vmatpush.msrb.mxu3 %v2635_v21 }
 0xfea   : > { %v2392_v36 = vsub.f32 1.5, %v2391_v34  ;;  %v2623_v34 = vld [vmem:[#allocation2 + $0x3b0] sm:$0xff] }
 0xfec   : > { %v2393_v40 = vmul.f32 %v4988_v24, %v2392_v36  ;;  %v2620_v36 = vld [vmem:[#allocation2 + $0x398] sm:$0xff] }
 0xfee   : > { %v2397_v41 = vsel %vm2396_vm9, %v4988_v24, %v2393_v40  ;;  %v2632_v24 = vld [vmem:[#allocation2 + $0x3f8] sm:$0xff]  ;;  %v2617_v40 = vld [vmem:[#allocation2 + $0x380] sm:$0xff] }
 0xfef   : > { %v2398_v42 = vmul.f32 %v2397_v41, %v5752_v38  ;;  %v4727_v38 = vld [vmem:[%s6158_s11 + $0x2] sm:$0x3]  ;;  %2683 = vmatpush.msrb.mxu3 %v2632_v24 }
 0xff0   : > { %v2443_v51 = vperm.slane %v4727_v38, 0  ;;  %v2444_v52 = vperm.slane %v4727_v38, 1  ;;  %v2613_v41 = vld [vmem:[#allocation2 + $0x360] sm:$0xff]  ;;  %v2606_v38 = vld [vmem:[#allocation2 + $0x328] sm:$0xff] }
 0xff1   : > { %v2402_v44 = vmul.f32 %v4900_v2, %v2398_v42  ;;  %2684 = vmatpush.msrb.mxu3 %v2629_v28  ;;  %v2618_v2 = vld [vmem:[#allocation2 + $0x388] sm:$0xff]  ;;  %2669 = vmatpush.msra.mxu2 %v2613_v41 }
 0xff2   : > { %2708 = vmatpush.msrb.mxu0 %v2618_v2  ;;  %v2614_v42 = vld [vmem:[#allocation2 + $0x368] sm:$0xff] }
 0xff3   : > { %v2406_v45 = vadd.f32 %v4901_v43, %v2402_v44  ;;  %2685 = vmatpush.msrb.mxu3 %v2626_v55  ;;  %v2615_v43 = vld [vmem:[#allocation2 + $0x370] sm:$0xff]  ;;  %v2610_v44 = vld [vmem:[#allocation2 + $0x348] sm:$0xff] }
 0xff4   : > { %2709 = vmatpush.msrb.mxu0 %v2615_v43  ;;  %2670 = vmatpush.msra.mxu2 %v2610_v44 }
 0xff5   : > { %2463 = vmatmul.f32.vlgmr.msrb.gmra.mxu2 %v2406_v45  ;;  %2483 = vmatmul.f32.vlgmr.msra.gmra.mxu3 %v2406_v45 }
 0xff6   : > { %2686 = vmatpush.msrb.mxu3 %v2623_v34  ;;  %2710 = vmatpush.msrb.mxu0 %v2612_v46 }
 0xff7   : > { %2671 = vmatpush.msra.mxu2 %v2607_v32 }
 0xff8   : > { %2687 = vmatpush.msrb.mxu3 %v2620_v36  ;;  %2711 = vmatpush.msrb.mxu0 %v2609_v48 }
 0xff9   : > { %2672 = vmatpush.msra.mxu2 %v2604_v49 }
 0xffa   : > { %2688 = vmatpush.msrb.mxu3 %v2617_v40  ;;  %2712 = vmatpush.msrb.mxu0 %v2606_v38 }
 0xffc   : > { %2689 = vmatpush.msrb.mxu3 %v2614_v42 }
0x1078   : > { %v2464_v53 = vpop.f32.mrf.mxu2  ;;  %v2484_v54 = vpop.f32.mrf.mxu3 }
0x1079   : > { %v2465_v56 = vadd.f32 %v2464_v53, %v2443_v51  ;;  %v2485_v57 = vadd.f32 %v2484_v54, %v2444_v52  ;;  %v2601_v51 = vld [vmem:[#allocation2 + $0x300] sm:$0xff]  ;;  %v2602_v52 = vld [vmem:[#allocation2 + $0x308] sm:$0xff]  ;;  %v2603_v53 = vld [vmem:[#allocation2 + $0x310] sm:$0xff] }
0x107a   : > { %2673 = vmatpush.msra.mxu2 %v2601_v51  ;;  %2713 = vmatpush.msrb.mxu0 %v2603_v53 }
0x107b   : > { %v2487_v58 = vmax.f32 %v2465_v56, 0.0  ;;  %v2488_v59 = vmax.f32 %v2485_v57, 0.0 }
0x107d   : > { %2543 = vmatmul.f32.vlgmr.msra.gmra.mxu0 %v2487_v58  ;;  %2563 = vmatmul.f32.vlgmr.msra.gmra.mxu1 %v2488_v59 }
0x10fa   : > { %v2544_v61 = vpop.f32.mrf.mxu0  ;;  %v2564_v63 = vpop.f32.mrf.mxu1 }
0x10fb   : > { %v2545_v62 = vadd.f32 %v4902_v60, %v2544_v61 }
0x10fd   : > { %v2565_v1 = vadd.f32 %v2564_v63, %v2545_v62 }
0x10ff   : > { %v2567_v3 = vadd.f32 %v2565_v1, %v2406_v45  ;;  %v2611_v45 = vld [vmem:[#allocation2 + $0x350] sm:$0xff]  ;;  %v4903_v1 = vld [vmem:[%s6161_s14 + $0x1] ss:$0 sm:$0xff] }
0x1100   : > { %2690 = vmatpush.msrb.mxu3 %v2611_v45 }
0x1101   : > { %2572 = vadd.xlane.f32.xlu2 %v2567_v3 }
0x1102   : > { %2691 = vmatpush.msrb.mxu3 %v2608_v47 }
0x1104   : > { %2692 = vmatpush.msrb.mxu3 %v2605_v50 }
0x1106   : > { %2693 = vmatpush.msrb.mxu3 %v2602_v52 }
0x1174   : > { %v2573_v11 = vpop.xlane.xlu2 %2572 }
0x1175   : > { %v2574_v12 = vmul.f32 %v2573_v11, %v5616_v0 }
0x1177   : > { %v5771_v13 = vsub.f32 %v2567_v3, %v2574_v12 }
0x1179   : > { %v2576_v14 = vmul.f32 %v5771_v13, %v5771_v13 }
0x117b   : > { %2577 = vadd.xlane.f32.xlu0 %v2576_v14  ;;  %v2653_v14 = vperm.slane %v4731_v9, 1 }
0x11ee   : > { %v2578_v54 = vpop.xlane.xlu0 %2577 }
0x11ef   : > { %v2579_v56 = vmul.f32 %v2578_v54, %v5616_v0 }
0x11f1   : > { %v2580_v57 = vadd.f32 1e-05, %v2579_v56 }
0x11f3   : > { %4989 = vrsqrt.f32 %v2580_v57  ;;  %vm2587_vm11 = vweird.f32 %v2580_v57 }
0x11f9   : > { %v4990_v58 = vpop.eup %4989 }
0x11fa   : > { %v2582_v59 = vmul.f32 %v4990_v58, %v2580_v57  ;;  %vm2588_vm10 = vweird.f32 %v4990_v58 }
0x11fb   : > { %vm2589_vm12 = vmor %vm2587_vm11, %vm2588_vm10 }
0x11fc   : > { %v2583_v60 = vmul.f32 %v4990_v58, %v2582_v59 }
0x11fe   : > { %v2584_v61 = vmul.f32 0.5, %v2583_v60 }
0x1200   : > { %v2585_v62 = vsub.f32 1.5, %v2584_v61 }
0x1202   : > { %v2586_v63 = vmul.f32 %v4990_v58, %v2585_v62 }
0x1204   : > { %v2590_v3 = vsel %vm2589_vm12, %v4990_v58, %v2586_v63 }
0x1205   : > { %v2591_v4 = vmul.f32 %v2590_v3, %v5771_v13  ;;  %v2652_v13 = vperm.slane %v4731_v9, 0 }
0x1207   : > { %v2595_v7 = vmul.f32 %v4903_v1, %v2591_v4 }
0x1209   : > { %v5783_v8 = vadd.f32 %v4904_v5, %v2595_v7 }
0x120b   : > { %2674 = vmatmul.f32.vlgmr.msra.gmra.mxu2 %v5783_v8  ;;  %2694 = vmatmul.f32.vlgmr.msrb.gmra.mxu3 %v5783_v8 }
0x120c   : > { %2714 = vmatmul.f32.vlgmr.msrb.gmra.mxu0 %v5783_v8 }
0x1289   : > { %v2715_v11 = vpop.f32.mrf.mxu0 }
0x128a   : > { %v5791_v12 = vadd.f32 %v2715_v11, %v2654_v10 }
0x128c   : > { %2773 = vmatpush.msrb.mxu2 %v5791_v12 }
0x128e   : > { %v2675_v15 = vpop.f32.mrf.mxu2  ;;  %v2695_v25 = vpop.f32.mrf.mxu3 }
0x128f   : > { %v2676_v16 = vadd.f32 %v2675_v15, %v2652_v13  ;;  %v2696_v17 = vadd.f32 %v2695_v25, %v2653_v14 }
0x1291   : > { %2846 = vrot.lane.b32.xlu0 %v2696_v17, %s5271_s17  ;;  %2780 = vrot.lane.b32.xlu1 %v2696_v17, %s5270_s16 }
0x1292   : > { %4732 = vmatpush.xpose.msk.msrb.mxu1 %vm698_vm0, %v2696_v17  ;;  %2778 = vrot.lane.b32.xlu2 %v2676_v16, %s5270_s16 }
0x1295   : > { %4733 = vmatmul.msk.f32.vlgmr.msrb.gmra.mxu1 %vm698_vm0, %v2676_v16 }
0x1299   : > { %2911 = vrot.lane.b32.xlu0 %v2696_v17, %s5269_s6  ;;  %2909 = vrot.lane.b32.xlu1 %v2676_v16, %s5269_s6 }
0x129a   : > { %2844 = vrot.lane.b32.xlu2 %v2676_v16, %s5271_s17 }
0x12a1   : > { %2976 = vrot.lane.b32.xlu0 %v2696_v17, %s5275_s1  ;;  %2974 = vrot.lane.b32.xlu1 %v2676_v16, %s5275_s1 }
0x12a2   : > { %3041 = vrot.lane.b32.xlu2 %v2696_v17, %s5272_s18 }
0x12a9   : > { %3039 = vrot.lane.b32.xlu0 %v2676_v16, %s5272_s18  ;;  %3171 = vrot.lane.b32.xlu1 %v2696_v17, %s5274_s20 }
0x12aa   : > { %3106 = vrot.lane.b32.xlu2 %v2696_v17, %s5273_s19 }
0x12b1   : > { %3104 = vrot.lane.b32.xlu0 %v2676_v16, %s5273_s19 }
0x12b2   : > { %3169 = vrot.lane.b32.xlu2 %v2676_v16, %s5274_s20 }
0x12ec   : > { %v2779_v18 = vpop.permute.xlu2 %2778 }
0x12f4   : > { %v2845_v19 = vpop.permute.xlu2 %2844 }
0x12fc   : > { %v3042_v22 = vpop.permute.xlu2 %3041 }
0x1303   : > { %v2847_v20 = vpop.permute.xlu0 %2846  ;;  %v2781_v21 = vpop.permute.xlu1 %2780 }
0x1304   : > { %4735 = vmatpush.xpose.msk.msra.mxu3 %vm698_vm0, %v2781_v21  ;;  %4738 = vmatpush.xpose.msk.msra.mxu1 %vm698_vm0, %v2847_v20  ;;  %v3107_v30 = vpop.permute.xlu2 %3106 }
0x1307   : > { %4736 = vmatmul.msk.f32.vlgmr.msra.gmra.mxu3 %vm698_vm0, %v2779_v18  ;;  %4739 = vmatmul.msk.f32.vlgmr.msra.gmra.mxu1 %vm698_vm0, %v2845_v19 }
0x130b   : > { %v2912_v23 = vpop.permute.xlu0 %2911  ;;  %v2910_v24 = vpop.permute.xlu1 %2909 }
0x130c   : > { %4741 = vmatpush.xpose.msk.msrb.mxu3 %vm698_vm0, %v2912_v23  ;;  %v3170_v33 = vpop.permute.xlu2 %3169 }
0x130f   : > { %4742 = vmatmul.msk.f32.vlgmr.msrb.gmra.mxu3 %vm698_vm0, %v2910_v24 }
0x1310   : > { %4747 = vmatpush.xpose.msk.msra.mxu3 %vm698_vm0, %v3042_v22 }
0x1312   : > { %v2741_v26 = vpop.f32.mrf.mxu1 }
0x1313   : > { %v2977_v27 = vpop.permute.xlu0 %2976  ;;  %v2975_v28 = vpop.permute.xlu1 %2974  ;;  %v2744_v29 = vsel %vm866_vm1, %v2741_v26, -inf }
0x1314   : > { %2745 = vmax.xlane.f32.xlu1 %v2744_v29  ;;  %4744 = vmatpush.xpose.msk.msrb.mxu1 %vm698_vm0, %v2977_v27 }
0x1317   : > { %4745 = vmatmul.msk.f32.vlgmr.msrb.gmra.mxu1 %vm698_vm0, %v2975_v28 }
0x1318   : > { %4750 = vmatpush.xpose.msk.msra.mxu1 %vm698_vm0, %v3107_v30 }
0x131b   : > { %v3040_v55 = vpop.permute.xlu0 %3039  ;;  %v3172_v31 = vpop.permute.xlu1 %3171 }
0x131c   : > { %4748 = vmatmul.msk.f32.vlgmr.msra.gmra.mxu3 %vm698_vm0, %v3040_v55 }
0x131d   : > { %4753 = vmatpush.xpose.msk.msrb.mxu3 %vm698_vm0, %v3172_v31 }
0x1323   : > { %v3105_v34 = vpop.permute.xlu0 %3104 }
0x1324   : > { %4751 = vmatmul.msk.f32.vlgmr.msra.gmra.mxu1 %vm698_vm0, %v3105_v34  ;;  %4754 = vmatmul.msk.f32.vlgmr.msrb.gmra.mxu3 %vm698_vm0, %v3170_v33 }
0x1384   : > { %v2869_v35 = vpop.f32.mrf.mxu1 }
0x1385   : > { %v2872_v6 = vsel %vm866_vm1, %v2869_v35, -inf }
0x1386   : > { %2873 = vmax.xlane.f32.xlu2 %v2872_v6 }
0x1387   : > { %v2746_v36 = vpop.xlane.xlu1 %2745 }
0x1388   : > { %v2747_v37 = vsub.f32 %v2741_v26, %v2746_v36 }
0x138a   : > { %v2748_v39 = vmul.f32 1.442695, %v2747_v37  ;;  %v2803_v40 = vpop.f32.mrf.mxu3 }
0x138b   : > { %v2806_v2 = vsel %vm866_vm1, %v2803_v40, -inf }
0x138c   : > { %4991 = vpow2.f32 %v2748_v39  ;;  %2807 = vmax.xlane.f32.xlu0 %v2806_v2 }
0x1392   : > { %v4992_v41 = vpop.eup %4991  ;;  %v2934_v42 = vpop.f32.mrf.mxu3 }
0x1393   : > { %v2750_v43 = vsel %vm866_vm1, %v4992_v41, 0.0  ;;  %v2937_v44 = vsel %vm866_vm1, %v2934_v42, -inf }
0x1394   : > { %2751 = vadd.xlane.f32.xlu2 %v2750_v43  ;;  %v2999_v45 = vpop.f32.mrf.mxu1  ;;  %2938 = vmax.xlane.f32.xlu1 %v2937_v44 }
0x1395   : > { %v3002_v46 = vsel %vm866_vm1, %v2999_v45, -inf }
0x1396   : > { %3003 = vmax.xlane.f32.xlu0 %v3002_v46 }
0x139f   : > { %v3064_v32 = vpop.f32.mrf.mxu3 }
0x13a0   : > { %v3067_v47 = vsel %vm866_vm1, %v3064_v32, -inf }
0x13a1   : > { %v3129_v48 = vpop.f32.mrf.mxu1  ;;  %3068 = vmax.xlane.f32.xlu2 %v3067_v47 }
0x13a2   : > { %v3132_v49 = vsel %vm866_vm1, %v3129_v48, -inf }
0x13a3   : > { %3133 = vmax.xlane.f32.xlu1 %v3132_v49 }
0x13a7   : > { %v3194_v50 = vpop.f32.mrf.mxu3 }
0x13a8   : > { %v3197_v38 = vsel %vm866_vm1, %v3194_v50, -inf }
0x13a9   : > { %3198 = vmax.xlane.f32.xlu0 %v3197_v38 }
0x13b9   : > { %2883 = vrot.lane.b32.xlu2 %v5791_v12, %s5271_s17 }
0x13f9   : > { %v2874_v51 = vpop.xlane.xlu2 %2873 }
0x13fa   : > { %v2875_v52 = vsub.f32 %v2869_v35, %v2874_v51 }
0x13fc   : > { %v2876_v53 = vmul.f32 1.442695, %v2875_v52 }
0x13fe   : > { %4993 = vpow2.f32 %v2876_v53 }
0x13ff   : > { %v2808_v54 = vpop.xlane.xlu0 %2807 }
0x1400   : > { %v2809_v56 = vsub.f32 %v2803_v40, %v2808_v54 }
0x1402   : > { %v2810_v57 = vmul.f32 1.442695, %v2809_v56 }
0x1404   : > { %v4994_v58 = vpop.eup %4993  ;;  %4995 = vpow2.f32 %v2810_v57 }
0x1405   : > { %v2878_v59 = vsel %vm866_vm1, %v4994_v58, 0.0 }
0x1406   : > { %2879 = vadd.xlane.f32.xlu0 %v2878_v59 }
0x1407   : > { %v2752_v60 = vpop.xlane.xlu2 %2751  ;;  %v2939_v61 = vpop.xlane.xlu1 %2938 }
0x1408   : > { %4997 = vrcp.f32 %v2752_v60  ;;  %v2940_v62 = vsub.f32 %v2934_v42, %v2939_v61 }
0x1409   : > { %v3004_v13 = vpop.xlane.xlu0 %3003 }
0x140a   : > { %v4996_v63 = vpop.eup %4995  ;;  %v2941_v1 = vmul.f32 1.442695, %v2940_v62  ;;  %v3005_v14 = vsub.f32 %v2999_v45, %v3004_v13  ;;  %v3277_v13 = vld [vmem:[#allocation5 + $0x138] sm:$0xff] }
0x140b   : > { %v2812_v3 = vsel %vm866_vm1, %v4996_v63, 0.0 }
0x140c   : > { %4999 = vpow2.f32 %v2941_v1  ;;  %2813 = vadd.xlane.f32.xlu1 %v2812_v3  ;;  %v3006_v15 = vmul.f32 1.442695, %v3005_v14  ;;  %v3285_v1 = vld [vmem:[#allocation5 + $0x178] sm:$0xff]  ;;  %v3284_v3 = vld [vmem:[#allocation5 + $0x170] sm:$0xff] }
0x140d   : > { %3291 = vmatpush.msrb.mxu1 %v3285_v1  ;;  %v3276_v14 = vld [vmem:[#allocation5 + $0x130] sm:$0xff]  ;;  %v3352_v1 = vld [vmem:[#allocation7 + $0x238] sm:$0xff] }
0x140e   : > { %v4998_v4 = vpop.eup %4997  ;;  %5001 = vpow2.f32 %v3006_v15  ;;  %v3275_v15 = vld [vmem:[#allocation5 + $0x128] sm:$0xff] }
0x140f   : > { %v2754_v5 = vmul.f32 %v4998_v4, %v4992_v41  ;;  %v3283_v4 = vld [vmem:[#allocation5 + $0x168] sm:$0xff]  ;;  %3292 = vmatpush.msrb.mxu1 %v3284_v3  ;;  %v3349_v3 = vld [vmem:[#allocation7 + $0x220] sm:$0xff] }
0x1411   : > { %4734 = vmatmul.msk.f32.vlgmr.msrb.gmra.mxu2 %vm866_vm1, %v2754_v5  ;;  %v3282_v5 = vld [vmem:[#allocation5 + $0x160] sm:$0xff]  ;;  %3293 = vmatpush.msrb.mxu1 %v3283_v4  ;;  %v3350_v4 = vld [vmem:[#allocation7 + $0x228] sm:$0xff] }
0x1412   : > { %v5000_v7 = vpop.eup %4999 }
0x1413   : > { %v2943_v9 = vsel %vm866_vm1, %v5000_v7, 0.0  ;;  %3294 = vmatpush.msrb.mxu1 %v3282_v5  ;;  %v3347_v5 = vld [vmem:[#allocation7 + $0x210] sm:$0xff] }
0x1414   : > { %v3069_v10 = vpop.xlane.xlu2 %3068  ;;  %2944 = vadd.xlane.f32.xlu2 %v2943_v9  ;;  %v5002_v19 = vpop.eup %5001  ;;  %v3280_v9 = vld [vmem:[#allocation5 + $0x150] sm:$0xff] }
0x1415   : > { %v3070_v25 = vsub.f32 %v3064_v32, %v3069_v10  ;;  %v3008_v23 = vsel %vm866_vm1, %v5002_v19, 0.0  ;;  %v3279_v10 = vld [vmem:[#allocation5 + $0x148] sm:$0xff] }
0x1416   : > { %v3134_v16 = vpop.xlane.xlu1 %3133 }
0x1417   : > { %v3135_v17 = vsub.f32 %v3129_v48, %v3134_v16  ;;  %v3071_v18 = vmul.f32 1.442695, %v3070_v25  ;;  %v3274_v25 = vld [vmem:[#allocation5 + $0x120] sm:$0xff]  ;;  %v3273_v16 = vld [vmem:[#allocation5 + $0x118] sm:$0xff] }
0x1419   : > { %v3136_v21 = vmul.f32 1.442695, %v3135_v17  ;;  %5003 = vpow2.f32 %v3071_v18  ;;  %v3272_v17 = vld [vmem:[#allocation5 + $0x110] sm:$0xff]  ;;  %v3271_v18 = vld [vmem:[#allocation5 + $0x108] sm:$0xff] }
0x141a   : > { %2948 = vrot.lane.b32.xlu0 %v5791_v12, %s5269_s6 }
0x141b   : > { %5005 = vpow2.f32 %v3136_v21 }
0x141c   : > { %v2884_v11 = vpop.permute.xlu2 %2883  ;;  %v3199_v20 = vpop.xlane.xlu0 %3198 }
0x141d   : > { %2904 = vmatpush.msra.mxu2 %v2884_v11  ;;  %v3200_v22 = vsub.f32 %v3194_v50, %v3199_v20  ;;  %v3278_v11 = vld [vmem:[#allocation5 + $0x140] sm:$0xff] }
0x141f   : > { %v3201_v24 = vmul.f32 1.442695, %v3200_v22  ;;  %v5004_v26 = vpop.eup %5003 }
0x1420   : > { %v3073_v28 = vsel %vm866_vm1, %v5004_v26, 0.0 }
0x1421   : > { %v5006_v27 = vpop.eup %5005  ;;  %5007 = vpow2.f32 %v3201_v24 }
0x1422   : > { %v3138_v29 = vsel %vm866_vm1, %v5006_v27, 0.0 }
0x1425   : > { %2818 = vrot.lane.b32.xlu1 %v5791_v12, %s5270_s16 }
0x1427   : > { %v5008_v30 = vpop.eup %5007 }
0x1428   : > { %v3203_v55 = vsel %vm866_vm1, %v5008_v30, 0.0 }
0x142c   : > { %3013 = vrot.lane.b32.xlu2 %v5791_v12, %s5275_s1 }
0x1444   : > { %3009 = vadd.xlane.f32.xlu0 %v3008_v23 }
0x144c   : > { %3074 = vadd.xlane.f32.xlu0 %v3073_v28 }
0x144f   : > { %3139 = vadd.xlane.f32.xlu1 %v3138_v29 }
0x1455   : > { %3204 = vadd.xlane.f32.xlu2 %v3203_v55 }
0x1460   : > { %3078 = vrot.lane.b32.xlu0 %v5791_v12, %s5272_s18 }
0x1468   : > { %3143 = vrot.lane.b32.xlu0 %v5791_v12, %s5273_s19 }
0x1470   : > { %3208 = vrot.lane.b32.xlu0 %v5791_v12, %s5274_s20 }
0x1479   : > { %v2880_v31 = vpop.xlane.xlu0 %2879 }
0x147a   : > { %5009 = vrcp.f32 %v2880_v31 }
0x147f   : > { %v2814_v6 = vpop.xlane.xlu1 %2813 }
0x1480   : > { %v5010_v33 = vpop.eup %5009  ;;  %5011 = vrcp.f32 %v2814_v6 }
0x1481   : > { %v2882_v34 = vmul.f32 %v5010_v33, %v4994_v58 }
0x1483   : > { %4740 = vmatmul.msk.f32.vlgmr.msra.gmra.mxu2 %vm866_vm1, %v2882_v34 }
0x1486   : > { %v5012_v37 = vpop.eup %5011 }
0x1487   : > { %v2945_v35 = vpop.xlane.xlu2 %2944  ;;  %v2816_v39 = vmul.f32 %v5012_v37, %v4996_v63 }
0x1488   : > { %5013 = vrcp.f32 %v2945_v35  ;;  %v4905_v35 = vld [vmem:[%s6154_s7 + $0x2] ss:$0 sm:$0xff] }
0x148c   : > { %v2949_v2 = vpop.permute.xlu0 %2948 }
0x148e   : > { %v5014_v12 = vpop.eup %5013 }
0x148f   : > { %v3014_v36 = vpop.permute.xlu2 %3013  ;;  %v2947_v41 = vmul.f32 %v5014_v12, %v5000_v7  ;;  %v3281_v7 = vld [vmem:[#allocation5 + $0x158] sm:$0xff]  ;;  %v3374_v12 = vld [vmem:[#allocation7 + $0x2e8] sm:$0xff] }
0x1490   : > { %3034 = vmatpush.msrb.mxu2 %v3014_v36  ;;  %3295 = vmatpush.msrb.mxu1 %v3281_v7  ;;  %v3348_v7 = vld [vmem:[#allocation7 + $0x218] sm:$0xff] }
0x1492   : > { %3296 = vmatpush.msrb.mxu1 %v3280_v9  ;;  %v3345_v9 = vld [vmem:[#allocation7 + $0x200] sm:$0xff] }
0x1494   : > { %v2775_v56 = vpop.f32.mrf.mxu2  ;;  %3297 = vmatpush.msrb.mxu1 %v3279_v10  ;;  %v3346_v10 = vld [vmem:[#allocation7 + $0x208] sm:$0xff] }
0x1496   : > { %3298 = vmatpush.msrb.mxu1 %v3278_v11  ;;  %v3442_v11 = vld [vmem:[#allocation8 + $0x278] sm:$0xff] }
0x1497   : > { %v2819_v40 = vpop.permute.xlu1 %2818 }
0x1498   : > { %2839 = vmatpush.msra.mxu0 %v2819_v40  ;;  %3299 = vmatpush.msrb.mxu1 %v3277_v13  ;;  %v3376_v40 = vld [vmem:[#allocation7 + $0x2f8] sm:$0xff] }
0x1499   : > { %4737 = vmatmul.msk.f32.vlgmr.msra.gmra.mxu0 %vm866_vm1, %v2816_v39  ;;  %v3375_v39 = vld [vmem:[#allocation7 + $0x2f0] sm:$0xff]  ;;  %3404 = vmatpush.msra.mxu3 %v3376_v40  ;;  %v3458_v13 = vld [vmem:[#allocation8 + $0x2f8] sm:$0xff] }
0x149a   : > { %2969 = vmatpush.msrb.mxu0 %v2949_v2  ;;  %3300 = vmatpush.msrb.mxu1 %v3276_v14  ;;  %v3373_v2 = vld [vmem:[#allocation7 + $0x2e0] sm:$0xff]  ;;  %v3441_v14 = vld [vmem:[#allocation8 + $0x270] sm:$0xff] }
0x149b   : > { %3405 = vmatpush.msra.mxu3 %v3374_v12  ;;  %v3447_v12 = vld [vmem:[#allocation8 + $0x2a0] sm:$0xff] }
0x149c   : > { %3301 = vmatpush.msrb.mxu1 %v3275_v15  ;;  %v3457_v15 = vld [vmem:[#allocation8 + $0x2f0] sm:$0xff] }
0x149e   : > { %3302 = vmatpush.msrb.mxu1 %v3274_v25  ;;  %v3440_v25 = vld [vmem:[#allocation8 + $0x268] sm:$0xff] }
0x14a0   : > { %3303 = vmatpush.msrb.mxu1 %v3273_v16  ;;  %v3456_v16 = vld [vmem:[#allocation8 + $0x2e8] sm:$0xff] }
0x14a1   : > { %4743 = vmatmul.msk.f32.vlgmr.msrb.gmra.mxu0 %vm866_vm1, %v2947_v41 }
0x14a2   : > { %3304 = vmatpush.msrb.mxu1 %v3272_v17 }
0x14a4   : > { %3305 = vmatpush.msrb.mxu1 %v3271_v18 }
0x14b7   : > { %v3010_v42 = vpop.xlane.xlu0 %3009 }
0x14b8   : > { %5015 = vrcp.f32 %v3010_v42 }
0x14be   : > { %v5016_v43 = vpop.eup %5015 }
0x14bf   : > { %v3012_v44 = vmul.f32 %v5016_v43, %v5002_v19  ;;  %v3075_v45 = vpop.xlane.xlu0 %3074  ;;  %v3270_v19 = vld [vmem:[#allocation5 + $0x100] sm:$0xff] }
0x14c0   : > { %5017 = vrcp.f32 %v3075_v45  ;;  %3306 = vmatpush.msrb.mxu1 %v3270_v19  ;;  %v3371_v45 = vld [vmem:[#allocation7 + $0x2d0] sm:$0xff]  ;;  %v3439_v19 = vld [vmem:[#allocation8 + $0x260] sm:$0xff] }
0x14c1   : > { %4746 = vmatmul.msk.f32.vlgmr.msrb.gmra.mxu2 %vm866_vm1, %v3012_v44 }
0x14c2   : > { %v3140_v46 = vpop.xlane.xlu1 %3139  ;;  %3484 = vmatpush.msra.mxu1 %v3458_v13  ;;  %v3585_v13 = vld [vmem:[#allocation2 + $0x5f8] sm:$0xff] }
0x14c3   : > { %5019 = vrcp.f32 %v3140_v46  ;;  %v3369_v46 = vld [vmem:[#allocation7 + $0x2c0] sm:$0xff] }
0x14c4   : > { %3485 = vmatpush.msra.mxu1 %v3457_v15  ;;  %v3581_v15 = vld [vmem:[#allocation2 + $0x5d8] sm:$0xff] }
0x14c6   : > { %v5018_v32 = vpop.eup %5017  ;;  %3486 = vmatpush.msra.mxu1 %v3456_v16 }
0x14c7   : > { %v3077_v47 = vmul.f32 %v5018_v32, %v5004_v26  ;;  %v3370_v32 = vld [vmem:[#allocation7 + $0x2c8] sm:$0xff] }
0x14c8   : > { %v3205_v49 = vpop.xlane.xlu2 %3204 }
0x14c9   : > { %v5020_v50 = vpop.eup %5019  ;;  %5021 = vrcp.f32 %v3205_v49  ;;  %v3365_v49 = vld [vmem:[#allocation7 + $0x2a0] sm:$0xff] }
0x14ca   : > { %v3142_v38 = vmul.f32 %v5020_v50, %v5006_v27  ;;  %v3366_v50 = vld [vmem:[#allocation7 + $0x2a8] sm:$0xff] }
0x14cf   : > { %v5022_v52 = vpop.eup %5021 }
0x14d0   : > { %v3207_v53 = vmul.f32 %v5022_v52, %v5008_v30  ;;  %v3361_v52 = vld [vmem:[#allocation7 + $0x280] sm:$0xff] }
0x14d2   : > { %v3079_v48 = vpop.permute.xlu0 %3078 }
0x14d3   : > { %3099 = vmatpush.msra.mxu0 %v3079_v48  ;;  %v3368_v48 = vld [vmem:[#allocation7 + $0x2b8] sm:$0xff] }
0x14d4   : > { %4749 = vmatmul.msk.f32.vlgmr.msra.gmra.mxu0 %vm866_vm1, %v3077_v47  ;;  %v3367_v47 = vld [vmem:[#allocation7 + $0x2b0] sm:$0xff] }
0x14da   : > { %v3144_v51 = vpop.permute.xlu0 %3143 }
0x14db   : > { %3164 = vmatpush.msra.mxu2 %v3144_v51  ;;  %v3364_v51 = vld [vmem:[#allocation7 + $0x298] sm:$0xff] }
0x14dc   : > { %4752 = vmatmul.msk.f32.vlgmr.msra.gmra.mxu2 %vm866_vm1, %v3142_v38  ;;  %v3363_v38 = vld [vmem:[#allocation7 + $0x290] sm:$0xff] }
0x14dd   : > { %3384 = vmatpush.msrb.mxu2 %v3375_v39  ;;  %v3448_v39 = vld [vmem:[#allocation8 + $0x2a8] sm:$0xff] }
0x14df   : > { %3385 = vmatpush.msrb.mxu2 %v3373_v2  ;;  %v3431_v2 = vld [vmem:[#allocation8 + $0x220] sm:$0xff] }
0x14e1   : > { %3386 = vmatpush.msrb.mxu2 %v3371_v45 }
0x14e2   : > { %v3209_v54 = vpop.permute.xlu0 %3208 }
0x14e3   : > { %3229 = vmatpush.msrb.mxu0 %v3209_v54  ;;  %3387 = vmatpush.msrb.mxu2 %v3369_v46  ;;  %v3359_v54 = vld [vmem:[#allocation7 + $0x270] sm:$0xff] }
0x14e4   : > { %4755 = vmatmul.msk.f32.vlgmr.msrb.gmra.mxu0 %vm866_vm1, %v3207_v53  ;;  %v3362_v53 = vld [vmem:[#allocation7 + $0x288] sm:$0xff] }
0x14e5   : > { %3388 = vmatpush.msrb.mxu2 %v3367_v47  ;;  %3464 = vmatpush.msra.mxu0 %v3442_v11  ;;  %v4907_v47 = vld [vmem:[%s6156_s9 + $0x2] ss:$0 sm:$0xff]  ;;  %v3584_v11 = vld [vmem:[#allocation2 + $0x5f0] sm:$0xff] }
0x14e7   : > { %3389 = vmatpush.msrb.mxu2 %v3365_v49  ;;  %3465 = vmatpush.msra.mxu0 %v3441_v14  ;;  %v3580_v14 = vld [vmem:[#allocation2 + $0x5d0] sm:$0xff] }
0x14e9   : > { %3390 = vmatpush.msrb.mxu2 %v3363_v38  ;;  %3466 = vmatpush.msra.mxu0 %v3440_v25  ;;  %v3445_v38 = vld [vmem:[#allocation8 + $0x290] sm:$0xff]  ;;  %v3582_v25 = vld [vmem:[#allocation2 + $0x5e0] sm:$0xff] }
0x14eb   : > { %3391 = vmatpush.msrb.mxu2 %v3361_v52  ;;  %3467 = vmatpush.msra.mxu0 %v3439_v19  ;;  %v3444_v52 = vld [vmem:[#allocation8 + $0x288] sm:$0xff] }
0x14ed   : > { %3392 = vmatpush.msrb.mxu2 %v3359_v54  ;;  %v3443_v54 = vld [vmem:[#allocation8 + $0x280] sm:$0xff] }
0x1506   : > { %v2906_v57 = vpop.f32.mrf.mxu2 }
0x1507   : > { %3239 = vrot.lane.b32.xlu1 %v2906_v57, %s5273_s19  ;;  %v3357_v57 = vld [vmem:[#allocation7 + $0x260] sm:$0xff] }
0x1508   : > { %3393 = vmatpush.msrb.mxu2 %v3357_v57 }
0x1516   : > { %v2841_v58 = vpop.f32.mrf.mxu0 }
0x1517   : > { %3235 = vrot.lane.b32.xlu0 %v2841_v58, %s5274_s20  ;;  %v3358_v58 = vld [vmem:[#allocation7 + $0x268] sm:$0xff] }
0x151e   : > { %v2971_v59 = vpop.f32.mrf.mxu0 }
0x151f   : > { %3243 = vrot.lane.b32.xlu0 %v2971_v59, %s5272_s18  ;;  %v3355_v59 = vld [vmem:[#allocation7 + $0x250] sm:$0xff] }
0x1520   : > { %3394 = vmatpush.msrb.mxu2 %v3355_v59 }
0x1544   : > { %v3036_v60 = vpop.f32.mrf.mxu2 }
0x1545   : > { %3247 = vrot.lane.b32.xlu2 %v3036_v60, %s5275_s1  ;;  %v3356_v60 = vld [vmem:[#allocation7 + $0x258] sm:$0xff] }
0x1551   : > { %v3101_v61 = vpop.f32.mrf.mxu0 }
0x1552   : > { %3251 = vrot.lane.b32.xlu0 %v3101_v61, %s5269_s6  ;;  %v3353_v61 = vld [vmem:[#allocation7 + $0x240] sm:$0xff] }
0x1553   : > { %3395 = vmatpush.msrb.mxu2 %v3353_v61 }
0x155f   : > { %v3166_v62 = vpop.f32.mrf.mxu2 }
0x1560   : > { %3255 = vrot.lane.b32.xlu0 %v3166_v62, %s5271_s17  ;;  %v3354_v62 = vld [vmem:[#allocation7 + $0x248] sm:$0xff] }
0x1561   : > { %v3231_v63 = vpop.f32.mrf.mxu0 }
0x1562   : > { %3259 = vrot.lane.b32.xlu1 %v3231_v63, %s5270_s16  ;;  %v3351_v63 = vld [vmem:[#allocation7 + $0x230] sm:$0xff] }
0x1563   : > { %3396 = vmatpush.msrb.mxu2 %v3351_v63 }
0x1565   : > { %3397 = vmatpush.msrb.mxu2 %v3349_v3 }
0x1567   : > { %3398 = vmatpush.msrb.mxu2 %v3347_v5 }
0x1569   : > { %3399 = vmatpush.msrb.mxu2 %v3345_v9 }
0x1579   : > { %v3240_v23 = vpop.permute.xlu1 %3239 }
0x1589   : > { %v3236_v20 = vpop.permute.xlu0 %3235 }
0x158a   : > { %v3262_v24 = vsel %vm698_vm0, %v2775_v56, %v3236_v20  ;;  %v3360_v56 = vld [vmem:[#allocation7 + $0x278] sm:$0xff]  ;;  %v3455_v20 = vld [vmem:[#allocation8 + $0x2e0] sm:$0xff] }
0x158b   : > { %v3263_v27 = vsel %vm1386_vm2, %v3262_v24, %v3240_v23  ;;  %v3454_v23 = vld [vmem:[#allocation8 + $0x2d8] sm:$0xff]  ;;  %3487 = vmatpush.msra.mxu1 %v3455_v20  ;;  %v3437_v24 = vld [vmem:[#allocation8 + $0x250] sm:$0xff] }
0x158c   : > { %v3577_v20 = vld [vmem:[#allocation2 + $0x5b8] sm:$0xff] }
0x158d   : > { %3488 = vmatpush.msra.mxu1 %v3454_v23  ;;  %v3574_v23 = vld [vmem:[#allocation2 + $0x5a0] sm:$0xff] }
0x1591   : > { %v3244_v21 = vpop.permute.xlu0 %3243 }
0x1592   : > { %v3264_v28 = vsel %vm1388_vm3, %v3263_v27, %v3244_v21  ;;  %v3436_v27 = vld [vmem:[#allocation8 + $0x248] sm:$0xff] }
0x159f   : > { %v3248_v26 = vpop.permute.xlu2 %3247 }
0x15a0   : > { %v3265_v29 = vsel %vm1390_vm4, %v3264_v28, %v3248_v26  ;;  %v3453_v26 = vld [vmem:[#allocation8 + $0x2d0] sm:$0xff]  ;;  %v3452_v28 = vld [vmem:[#allocation8 + $0x2c8] sm:$0xff] }
0x15a1   : > { %3489 = vmatpush.msra.mxu1 %v3453_v26  ;;  %v3576_v26 = vld [vmem:[#allocation2 + $0x5b0] sm:$0xff] }
0x15a3   : > { %3490 = vmatpush.msra.mxu1 %v3452_v28  ;;  %v3572_v28 = vld [vmem:[#allocation2 + $0x590] sm:$0xff] }
0x15c4   : > { %v3252_v22 = vpop.permute.xlu0 %3251 }
0x15c5   : > { %v3266_v30 = vsel %vm1392_vm5, %v3265_v29, %v3252_v22  ;;  %v3438_v22 = vld [vmem:[#allocation8 + $0x258] sm:$0xff]  ;;  %v3435_v29 = vld [vmem:[#allocation8 + $0x240] sm:$0xff] }
0x15c6   : > { %3468 = vmatpush.msra.mxu0 %v3438_v22  ;;  %v3579_v22 = vld [vmem:[#allocation2 + $0x5c8] sm:$0xff] }
0x15c8   : > { %3469 = vmatpush.msra.mxu0 %v3437_v24  ;;  %v3575_v24 = vld [vmem:[#allocation2 + $0x5a8] sm:$0xff] }
0x15ca   : > { %3470 = vmatpush.msra.mxu0 %v3436_v27  ;;  %v3571_v27 = vld [vmem:[#allocation2 + $0x588] sm:$0xff] }
0x15cc   : > { %3471 = vmatpush.msra.mxu0 %v3435_v29  ;;  %v3573_v29 = vld [vmem:[#allocation2 + $0x598] sm:$0xff] }
0x15d2   : > { %v3256_v55 = vpop.permute.xlu0 %3255 }
0x15d3   : > { %v3267_v31 = vsel %vm1394_vm6, %v3266_v30, %v3256_v55  ;;  %v3451_v30 = vld [vmem:[#allocation8 + $0x2c0] sm:$0xff] }
0x15d4   : > { %v3260_v33 = vpop.permute.xlu1 %3259  ;;  %3491 = vmatpush.msra.mxu1 %v3451_v30  ;;  %v3568_v30 = vld [vmem:[#allocation2 + $0x570] sm:$0xff] }
0x15d5   : > { %v3268_v34 = vsel %vm1396_vm7, %v3267_v31, %v3260_v33  ;;  %v3434_v31 = vld [vmem:[#allocation8 + $0x238] sm:$0xff] }
0x15d6   : > { %3307 = vmatmul.f32.vlgmr.msrb.gmra.mxu1 %v3268_v34  ;;  %v3450_v33 = vld [vmem:[#allocation8 + $0x2b8] sm:$0xff]  ;;  %3472 = vmatpush.msra.mxu0 %v3434_v31  ;;  %v3570_v31 = vld [vmem:[#allocation2 + $0x580] sm:$0xff] }
0x15d7   : > { %3492 = vmatpush.msra.mxu1 %v3450_v33  ;;  %v3565_v33 = vld [vmem:[#allocation2 + $0x558] sm:$0xff] }
0x1653   : > { %v3308_v6 = vpop.f32.mrf.mxu1 }
0x1654   : > { %v3309_v36 = vadd.f32 %v4905_v35, %v3308_v6  ;;  %v3433_v35 = vld [vmem:[#allocation8 + $0x230] sm:$0xff] }
0x1655   : > { %v3449_v6 = vld [vmem:[#allocation8 + $0x2b0] sm:$0xff]  ;;  %3473 = vmatpush.msra.mxu0 %v3433_v35  ;;  %v3567_v35 = vld [vmem:[#allocation2 + $0x568] sm:$0xff] }
0x1656   : > { %v3311_v37 = vadd.f32 %v3309_v36, %v5783_v8  ;;  %v3372_v8 = vld [vmem:[#allocation7 + $0x2d8] sm:$0xff]  ;;  %3493 = vmatpush.msra.mxu1 %v3449_v6  ;;  %v3562_v6 = vld [vmem:[#allocation2 + $0x540] sm:$0xff] }
0x1657   : > { %3406 = vmatpush.msra.mxu3 %v3372_v8  ;;  %v4906_v8 = vld [vmem:[%s6155_s8 + $0x2] ss:$0 sm:$0xff] }
0x1658   : > { %3316 = vadd.xlane.f32.xlu0 %v3311_v37  ;;  %3494 = vmatpush.msra.mxu1 %v3448_v39  ;;  %v3559_v39 = vld [vmem:[#allocation2 + $0x528] sm:$0xff] }
0x1659   : > { %3407 = vmatpush.msra.mxu3 %v3370_v32 }
0x165a   : > { %3495 = vmatpush.msra.mxu1 %v3447_v12  ;;  %v3556_v12 = vld [vmem:[#allocation2 + $0x510] sm:$0xff] }
0x165b   : > { %3408 = vmatpush.msra.mxu3 %v3368_v48 }
0x165d   : > { %3409 = vmatpush.msra.mxu3 %v3366_v50  ;;  %v3429_v50 = vld [vmem:[#allocation8 + $0x210] sm:$0xff] }
0x165f   : > { %3410 = vmatpush.msra.mxu3 %v3364_v51  ;;  %v3428_v51 = vld [vmem:[#allocation8 + $0x208] sm:$0xff] }
0x1661   : > { %3411 = vmatpush.msra.mxu3 %v3362_v53  ;;  %v3427_v53 = vld [vmem:[#allocation8 + $0x200] sm:$0xff] }
0x1663   : > { %3412 = vmatpush.msra.mxu3 %v3360_v56 }
0x1665   : > { %3413 = vmatpush.msra.mxu3 %v3358_v58 }
0x1667   : > { %3414 = vmatpush.msra.mxu3 %v3356_v60 }
0x1669   : > { %3415 = vmatpush.msra.mxu3 %v3354_v62 }
0x166b   : > { %3416 = vmatpush.msra.mxu3 %v3352_v1  ;;  %v4908_v1 = vld [vmem:[%s6160_s13 + $0x2] ss:$0 sm:$0xff] }
0x166d   : > { %3417 = vmatpush.msra.mxu3 %v3350_v4 }
0x166f   : > { %3418 = vmatpush.msra.mxu3 %v3348_v7 }
0x1671   : > { %3419 = vmatpush.msra.mxu3 %v3346_v10  ;;  %v3583_v10 = vld [vmem:[#allocation2 + $0x5e8] sm:$0xff] }
0x1672   : > { %3595 = vmatpush.msra.mxu2 %v3583_v10 }
0x1673   : > { %3615 = vmatpush.msrb.mxu3 %v3584_v11  ;;  %v4910_v11 = vld [vmem:[%s6162_s15 + $0x2] ss:$0 sm:$0xff] }
0x1674   : > { %3596 = vmatpush.msra.mxu2 %v3580_v14 }
0x1675   : > { %3616 = vmatpush.msrb.mxu3 %v3581_v15  ;;  %v4763_v15 = vld [vmem:[%s6152_s5 + $0x9] sm:$0x7] }
0x1676   : > { %3597 = vmatpush.msra.mxu2 %v3577_v20 }
0x1678   : > { %3598 = vmatpush.msra.mxu2 %v3574_v23 }
0x167a   : > { %3599 = vmatpush.msra.mxu2 %v3571_v27 }
0x167c   : > { %3600 = vmatpush.msra.mxu2 %v3568_v30 }
0x167e   : > { %3601 = vmatpush.msra.mxu2 %v3565_v33 }
0x1680   : > { %3602 = vmatpush.msra.mxu2 %v3562_v6 }
0x1682   : > { %3603 = vmatpush.msra.mxu2 %v3559_v39 }
0x1684   : > { %3604 = vmatpush.msra.mxu2 %v3556_v12 }
0x16cb   : > { %v3317_v41 = vpop.xlane.xlu0 %3316 }
0x16cc   : > { %v3318_v42 = vmul.f32 %v3317_v41, %v5616_v0 }
0x16ce   : > { %v5881_v43 = vsub.f32 %v3311_v37, %v3318_v42  ;;  %v3432_v37 = vld [vmem:[#allocation8 + $0x228] sm:$0xff]  ;;  %v3430_v42 = vld [vmem:[#allocation8 + $0x218] sm:$0xff] }
0x16cf   : > { %3474 = vmatpush.msra.mxu0 %v3432_v37  ;;  %v3564_v37 = vld [vmem:[#allocation2 + $0x550] sm:$0xff] }
0x16d0   : > { %v3320_v44 = vmul.f32 %v5881_v43, %v5881_v43 }
0x16d1   : > { %3475 = vmatpush.msra.mxu0 %v3431_v2  ;;  %v3561_v2 = vld [vmem:[#allocation2 + $0x538] sm:$0xff] }
0x16d2   : > { %3321 = vadd.xlane.f32.xlu1 %v3320_v44  ;;  %v3446_v44 = vld [vmem:[#allocation8 + $0x298] sm:$0xff] }
0x16d3   : > { %3476 = vmatpush.msra.mxu0 %v3430_v42  ;;  %3496 = vmatpush.msra.mxu1 %v3446_v44  ;;  %v3558_v42 = vld [vmem:[#allocation2 + $0x520] sm:$0xff]  ;;  %v3553_v44 = vld [vmem:[#allocation2 + $0x4f8] sm:$0xff] }
0x16d4   : > { %3605 = vmatpush.msra.mxu2 %v3553_v44 }
0x16d5   : > { %3477 = vmatpush.msra.mxu0 %v3429_v50  ;;  %3497 = vmatpush.msra.mxu1 %v3445_v38  ;;  %v3549_v50 = vld [vmem:[#allocation2 + $0x4d8] sm:$0xff]  ;;  %v3544_v38 = vld [vmem:[#allocation2 + $0x4b0] sm:$0xff] }
0x16d7   : > { %3478 = vmatpush.msra.mxu0 %v3428_v51  ;;  %3498 = vmatpush.msra.mxu1 %v3444_v52  ;;  %v3545_v51 = vld [vmem:[#allocation2 + $0x4b8] sm:$0xff]  ;;  %v3546_v52 = vld [vmem:[#allocation2 + $0x4c0] sm:$0xff] }
0x16d9   : > { %3479 = vmatpush.msra.mxu0 %v3427_v53  ;;  %3499 = vmatpush.msra.mxu1 %v3443_v54  ;;  %v3541_v53 = vld [vmem:[#allocation2 + $0x498] sm:$0xff]  ;;  %v3542_v54 = vld [vmem:[#allocation2 + $0x4a0] sm:$0xff] }
0x16db   : > { %3635 = vmatpush.msrb.mxu0 %v3585_v13 }
0x16dd   : > { %3636 = vmatpush.msrb.mxu0 %v3582_v25  ;;  %v3591_v25 = vperm.slane %v4763_v15, 2 }
0x16df   : > { %3637 = vmatpush.msrb.mxu0 %v3579_v22 }
0x16e1   : > { %3638 = vmatpush.msrb.mxu0 %v3576_v26 }
0x16e3   : > { %3639 = vmatpush.msrb.mxu0 %v3573_v29 }
0x16e5   : > { %3640 = vmatpush.msrb.mxu0 %v3570_v31 }
0x16e7   : > { %3641 = vmatpush.msrb.mxu0 %v3567_v35 }
0x16e9   : > { %3642 = vmatpush.msrb.mxu0 %v3564_v37 }
0x16eb   : > { %3643 = vmatpush.msrb.mxu0 %v3561_v2 }
0x16ed   : > { %3644 = vmatpush.msrb.mxu0 %v3558_v42 }
0x1745   : > { %v3322_v17 = vpop.xlane.xlu1 %3321 }
0x1746   : > { %v3323_v18 = vmul.f32 %v3322_v17, %v5616_v0 }
0x1748   : > { %v3324_v21 = vadd.f32 1e-05, %v3323_v18 }
0x174a   : > { %5023 = vrsqrt.f32 %v3324_v21  ;;  %vm3331_vm14 = vweird.f32 %v3324_v21 }
0x1750   : > { %v5024_v55 = vpop.eup %5023 }
0x1751   : > { %v3326_v34 = vmul.f32 %v5024_v55, %v3324_v21  ;;  %vm3332_vm13 = vweird.f32 %v5024_v55  ;;  %v3578_v21 = vld [vmem:[#allocation2 + $0x5c0] sm:$0xff] }
0x1752   : > { %vm3333_vm15 = vmor %vm3331_vm14, %vm3332_vm13  ;;  %3617 = vmatpush.msrb.mxu3 %v3578_v21 }
0x1753   : > { %v3327_v36 = vmul.f32 %v5024_v55, %v3326_v34  ;;  %v3566_v34 = vld [vmem:[#allocation2 + $0x560] sm:$0xff] }
0x1754   : > { %3618 = vmatpush.msrb.mxu3 %v3575_v24 }
0x1755   : > { %v3328_v40 = vmul.f32 0.5, %v3327_v36  ;;  %v3563_v36 = vld [vmem:[#allocation2 + $0x548] sm:$0xff] }
0x1756   : > { %3619 = vmatpush.msrb.mxu3 %v3572_v28 }
0x1757   : > { %v3329_v41 = vsub.f32 1.5, %v3328_v40  ;;  %v3560_v40 = vld [vmem:[#allocation2 + $0x530] sm:$0xff] }
0x1759   : > { %v3330_v45 = vmul.f32 %v5024_v55, %v3329_v41  ;;  %v3557_v41 = vld [vmem:[#allocation2 + $0x518] sm:$0xff] }
0x175b   : > { %v3334_v46 = vsel %vm3333_vm15, %v5024_v55, %v3330_v45  ;;  %v3569_v55 = vld [vmem:[#allocation2 + $0x578] sm:$0xff]  ;;  %v3554_v45 = vld [vmem:[#allocation2 + $0x500] sm:$0xff] }
0x175c   : > { %v3335_v32 = vmul.f32 %v3334_v46, %v5881_v43  ;;  %v4759_v43 = vld [vmem:[%s6158_s11 + $0x4] sm:$0x3]  ;;  %3620 = vmatpush.msrb.mxu3 %v3569_v55 }
0x175d   : > { %v3380_v56 = vperm.slane %v4759_v43, 0  ;;  %v3381_v57 = vperm.slane %v4759_v43, 1  ;;  %v3550_v46 = vld [vmem:[#allocation2 + $0x4e0] sm:$0xff]  ;;  %v3543_v43 = vld [vmem:[#allocation2 + $0x4a8] sm:$0xff] }
0x175e   : > { %v3339_v48 = vmul.f32 %v4906_v8, %v3335_v32  ;;  %3621 = vmatpush.msrb.mxu3 %v3566_v34  ;;  %v3555_v8 = vld [vmem:[#allocation2 + $0x508] sm:$0xff]  ;;  %3606 = vmatpush.msra.mxu2 %v3550_v46 }
0x175f   : > { %3645 = vmatpush.msrb.mxu0 %v3555_v8  ;;  %v3551_v32 = vld [vmem:[#allocation2 + $0x4e8] sm:$0xff] }
0x1760   : > { %v3343_v49 = vadd.f32 %v4907_v47, %v3339_v48  ;;  %3622 = vmatpush.msrb.mxu3 %v3563_v36  ;;  %v3552_v47 = vld [vmem:[#allocation2 + $0x4f0] sm:$0xff]  ;;  %v3547_v48 = vld [vmem:[#allocation2 + $0x4c8] sm:$0xff] }
0x1761   : > { %3646 = vmatpush.msrb.mxu0 %v3552_v47  ;;  %3607 = vmatpush.msra.mxu2 %v3547_v48 }
0x1762   : > { %3400 = vmatmul.f32.vlgmr.msrb.gmra.mxu2 %v3343_v49  ;;  %3420 = vmatmul.f32.vlgmr.msra.gmra.mxu3 %v3343_v49 }
0x1763   : > { %3623 = vmatpush.msrb.mxu3 %v3560_v40  ;;  %3647 = vmatpush.msrb.mxu0 %v3549_v50 }
0x1764   : > { %3608 = vmatpush.msra.mxu2 %v3544_v38 }
0x1765   : > { %3624 = vmatpush.msrb.mxu3 %v3557_v41  ;;  %3648 = vmatpush.msrb.mxu0 %v3546_v52 }
0x1766   : > { %3609 = vmatpush.msra.mxu2 %v3541_v53 }
0x1767   : > { %3625 = vmatpush.msrb.mxu3 %v3554_v45  ;;  %3649 = vmatpush.msrb.mxu0 %v3543_v43 }
0x1769   : > { %3626 = vmatpush.msrb.mxu3 %v3551_v32 }
0x17e5   : > { %v3401_v58 = vpop.f32.mrf.mxu2  ;;  %v3421_v59 = vpop.f32.mrf.mxu3 }
0x17e6   : > { %v3402_v60 = vadd.f32 %v3401_v58, %v3380_v56  ;;  %v3422_v61 = vadd.f32 %v3421_v59, %v3381_v57  ;;  %v3538_v56 = vld [vmem:[#allocation2 + $0x480] sm:$0xff]  ;;  %v3539_v57 = vld [vmem:[#allocation2 + $0x488] sm:$0xff]  ;;  %v3540_v58 = vld [vmem:[#allocation2 + $0x490] sm:$0xff] }
0x17e7   : > { %3610 = vmatpush.msra.mxu2 %v3538_v56  ;;  %3650 = vmatpush.msrb.mxu0 %v3540_v58 }
0x17e8   : > { %v3424_v62 = vmax.f32 %v3402_v60, 0.0  ;;  %v3425_v63 = vmax.f32 %v3422_v61, 0.0 }
0x17ea   : > { %3480 = vmatmul.f32.vlgmr.msra.gmra.mxu0 %v3424_v62  ;;  %3500 = vmatmul.f32.vlgmr.msra.gmra.mxu1 %v3425_v63 }
0x1867   : > { %v3481_v3 = vpop.f32.mrf.mxu0  ;;  %v3501_v5 = vpop.f32.mrf.mxu1 }
0x1868   : > { %v3482_v4 = vadd.f32 %v4908_v1, %v3481_v3 }
0x186a   : > { %v3502_v7 = vadd.f32 %v3501_v5, %v3482_v4 }
0x186c   : > { %v3504_v9 = vadd.f32 %v3502_v7, %v3343_v49  ;;  %v3548_v49 = vld [vmem:[#allocation2 + $0x4d0] sm:$0xff]  ;;  %v4909_v7 = vld [vmem:[%s6161_s14 + $0x2] ss:$0 sm:$0xff] }
0x186d   : > { %3627 = vmatpush.msrb.mxu3 %v3548_v49 }
0x186e   : > { %3509 = vadd.xlane.f32.xlu2 %v3504_v9 }
0x186f   : > { %3628 = vmatpush.msrb.mxu3 %v3545_v51 }
0x1871   : > { %3629 = vmatpush.msrb.mxu3 %v3542_v54 }
0x1873   : > { %3630 = vmatpush.msrb.mxu3 %v3539_v57 }
0x18e1   : > { %v3510_v16 = vpop.xlane.xlu2 %3509 }
0x18e2   : > { %v3511_v17 = vmul.f32 %v3510_v16, %v5616_v0 }
0x18e4   : > { %v5900_v18 = vsub.f32 %v3504_v9, %v3511_v17 }
0x18e6   : > { %v3513_v19 = vmul.f32 %v5900_v18, %v5900_v18 }
0x18e8   : > { %3514 = vadd.xlane.f32.xlu0 %v3513_v19  ;;  %v3590_v19 = vperm.slane %v4763_v15, 1 }
0x195b   : > { %v3515_v59 = vpop.xlane.xlu0 %3514 }
0x195c   : > { %v3516_v60 = vmul.f32 %v3515_v59, %v5616_v0 }
0x195e   : > { %v3517_v61 = vadd.f32 1e-05, %v3516_v60 }
0x1960   : > { %5025 = vrsqrt.f32 %v3517_v61  ;;  %vm3524_vm9 = vweird.f32 %v3517_v61 }
0x1966   : > { %v5026_v62 = vpop.eup %5025 }
0x1967   : > { %v3519_v63 = vmul.f32 %v5026_v62, %v3517_v61  ;;  %vm3525_vm8 = vweird.f32 %v5026_v62 }
0x1968   : > { %vm3526_vm10 = vmor %vm3524_vm9, %vm3525_vm8 }
0x1969   : > { %v3520_v1 = vmul.f32 %v5026_v62, %v3519_v63 }
0x196b   : > { %v3521_v3 = vmul.f32 0.5, %v3520_v1 }
0x196d   : > { %v3522_v4 = vsub.f32 1.5, %v3521_v3 }
0x196f   : > { %v3523_v5 = vmul.f32 %v5026_v62, %v3522_v4 }
0x1971   : > { %v3527_v9 = vsel %vm3526_vm10, %v5026_v62, %v3523_v5 }
0x1972   : > { %v3528_v10 = vmul.f32 %v3527_v9, %v5900_v18  ;;  %v3589_v18 = vperm.slane %v4763_v15, 0 }
0x1974   : > { %v3532_v13 = vmul.f32 %v4909_v7, %v3528_v10 }
0x1976   : > { %v5912_v14 = vadd.f32 %v4910_v11, %v3532_v13 }
0x1978   : > { %3611 = vmatmul.f32.vlgmr.msra.gmra.mxu2 %v5912_v14  ;;  %3631 = vmatmul.f32.vlgmr.msrb.gmra.mxu3 %v5912_v14 }
0x1979   : > { %3651 = vmatmul.f32.vlgmr.msrb.gmra.mxu0 %v5912_v14 }
0x19f6   : > { %v3652_v16 = vpop.f32.mrf.mxu0 }
0x19f7   : > { %v5920_v17 = vadd.f32 %v3652_v16, %v3591_v25 }
0x19f9   : > { %3710 = vmatpush.msrb.mxu2 %v5920_v17 }
0x19fb   : > { %v3612_v20 = vpop.f32.mrf.mxu2  ;;  %v3632_v21 = vpop.f32.mrf.mxu3 }
0x19fc   : > { %v3613_v22 = vadd.f32 %v3612_v20, %v3589_v18  ;;  %v3633_v23 = vadd.f32 %v3632_v21, %v3590_v19 }
0x19fe   : > { %3783 = vrot.lane.b32.xlu0 %v3633_v23, %s5271_s17  ;;  %3717 = vrot.lane.b32.xlu1 %v3633_v23, %s5270_s16 }
0x19ff   : > { %4764 = vmatpush.xpose.msk.msrb.mxu1 %vm698_vm0, %v3633_v23  ;;  %3715 = vrot.lane.b32.xlu2 %v3613_v22, %s5270_s16 }
0x1a02   : > { %4765 = vmatmul.msk.f32.vlgmr.msrb.gmra.mxu1 %vm698_vm0, %v3613_v22 }
0x1a06   : > { %3848 = vrot.lane.b32.xlu0 %v3633_v23, %s5269_s6  ;;  %3781 = vrot.lane.b32.xlu1 %v3613_v22, %s5271_s17 }
0x1a07   : > { %3846 = vrot.lane.b32.xlu2 %v3613_v22, %s5269_s6 }
0x1a0e   : > { %3913 = vrot.lane.b32.xlu0 %v3633_v23, %s5275_s1  ;;  %3978 = vrot.lane.b32.xlu1 %v3633_v23, %s5272_s18 }
0x1a0f   : > { %3911 = vrot.lane.b32.xlu2 %v3613_v22, %s5275_s1 }
0x1a16   : > { %3976 = vrot.lane.b32.xlu0 %v3613_v22, %s5272_s18  ;;  %4043 = vrot.lane.b32.xlu1 %v3633_v23, %s5273_s19 }
0x1a17   : > { %4108 = vrot.lane.b32.xlu2 %v3633_v23, %s5274_s20 }
0x1a1e   : > { %4041 = vrot.lane.b32.xlu0 %v3613_v22, %s5273_s19  ;;  %4106 = vrot.lane.b32.xlu1 %v3613_v22, %s5274_s20 }
0x1a59   : > { %v3716_v24 = vpop.permute.xlu2 %3715 }
0x1a61   : > { %v3847_v26 = vpop.permute.xlu2 %3846 }
0x1a69   : > { %v3912_v29 = vpop.permute.xlu2 %3911 }
0x1a70   : > { %v3784_v27 = vpop.permute.xlu0 %3783  ;;  %v3718_v28 = vpop.permute.xlu1 %3717 }
0x1a71   : > { %4767 = vmatpush.xpose.msk.msra.mxu3 %vm698_vm0, %v3718_v28  ;;  %4770 = vmatpush.xpose.msk.msra.mxu1 %vm698_vm0, %v3784_v27  ;;  %v4109_v6 = vpop.permute.xlu2 %4108 }
0x1a74   : > { %4768 = vmatmul.msk.f32.vlgmr.msra.gmra.mxu3 %vm698_vm0, %v3716_v24 }
0x1a78   : > { %v3849_v30 = vpop.permute.xlu0 %3848  ;;  %v3782_v55 = vpop.permute.xlu1 %3781 }
0x1a79   : > { %4771 = vmatmul.msk.f32.vlgmr.msra.gmra.mxu1 %vm698_vm0, %v3782_v55  ;;  %4773 = vmatpush.xpose.msk.msrb.mxu3 %vm698_vm0, %v3849_v30 }
0x1a7c   : > { %4774 = vmatmul.msk.f32.vlgmr.msrb.gmra.mxu3 %vm698_vm0, %v3847_v26 }
0x1a7f   : > { %v3678_v31 = vpop.f32.mrf.mxu1 }
0x1a80   : > { %v3914_v33 = vpop.permute.xlu0 %3913  ;;  %v3979_v34 = vpop.permute.xlu1 %3978  ;;  %v3681_v35 = vsel %vm866_vm1, %v3678_v31, -inf }
0x1a81   : > { %3682 = vmax.xlane.f32.xlu2 %v3681_v35  ;;  %4776 = vmatpush.xpose.msk.msrb.mxu1 %vm698_vm0, %v3914_v33 }
0x1a82   : > { %4779 = vmatpush.xpose.msk.msra.mxu3 %vm698_vm0, %v3979_v34 }
0x1a84   : > { %4777 = vmatmul.msk.f32.vlgmr.msrb.gmra.mxu1 %vm698_vm0, %v3912_v29 }
0x1a86   : > { %4785 = vmatpush.xpose.msk.msrb.mxu3 %vm698_vm0, %v4109_v6 }
0x1a88   : > { %v3977_v36 = vpop.permute.xlu0 %3976  ;;  %v4044_v37 = vpop.permute.xlu1 %4043 }
0x1a89   : > { %4780 = vmatmul.msk.f32.vlgmr.msra.gmra.mxu3 %vm698_vm0, %v3977_v36  ;;  %4782 = vmatpush.xpose.msk.msra.mxu1 %vm698_vm0, %v4044_v37 }
0x1a90   : > { %v4042_v39 = vpop.permute.xlu0 %4041  ;;  %v4107_v40 = vpop.permute.xlu1 %4106 }
0x1a91   : > { %4783 = vmatmul.msk.f32.vlgmr.msra.gmra.mxu1 %vm698_vm0, %v4042_v39  ;;  %4786 = vmatmul.msk.f32.vlgmr.msrb.gmra.mxu3 %vm698_vm0, %v4107_v40 }
0x1af4   : > { %v3683_v2 = vpop.xlane.xlu2 %3682 }
0x1af5   : > { %v3684_v12 = vsub.f32 %v3678_v31, %v3683_v2 }
0x1af6   : > { %v3806_v41 = vpop.f32.mrf.mxu1 }
0x1af7   : > { %v3685_v42 = vmul.f32 1.442695, %v3684_v12  ;;  %v3740_v44 = vpop.f32.mrf.mxu3  ;;  %v3809_v45 = vsel %vm866_vm1, %v3806_v41, -inf }
0x1af8   : > { %3810 = vmax.xlane.f32.xlu1 %v3809_v45  ;;  %v3743_v8 = vsel %vm866_vm1, %v3740_v44, -inf }
0x1af9   : > { %5027 = vpow2.f32 %v3685_v42  ;;  %3744 = vmax.xlane.f32.xlu0 %v3743_v8 }
0x1aff   : > { %v5028_v46 = vpop.eup %5027  ;;  %v3871_v32 = vpop.f32.mrf.mxu3 }
0x1b00   : > { %v3687_v47 = vsel %vm866_vm1, %v5028_v46, 0.0  ;;  %v3874_v48 = vsel %vm866_vm1, %v3871_v32, -inf }
0x1b01   : > { %3688 = vadd.xlane.f32.xlu1 %v3687_v47  ;;  %v3936_v49 = vpop.f32.mrf.mxu1  ;;  %3875 = vmax.xlane.f32.xlu2 %v3874_v48 }
0x1b02   : > { %v3939_v50 = vsel %vm866_vm1, %v3936_v49, -inf }
0x1b03   : > { %3940 = vmax.xlane.f32.xlu0 %v3939_v50 }
0x1b0c   : > { %v4001_v38 = vpop.f32.mrf.mxu3 }
0x1b0d   : > { %v4004_v51 = vsel %vm866_vm1, %v4001_v38, -inf }
0x1b0e   : > { %v4066_v52 = vpop.f32.mrf.mxu1  ;;  %4005 = vmax.xlane.f32.xlu1 %v4004_v51 }
0x1b0f   : > { %v4069_v53 = vsel %vm866_vm1, %v4066_v52, -inf }
0x1b10   : > { %4070 = vmax.xlane.f32.xlu2 %v4069_v53 }
0x1b14   : > { %v4131_v54 = vpop.f32.mrf.mxu3 }
0x1b15   : > { %v4134_v43 = vsel %vm866_vm1, %v4131_v54, -inf }
0x1b16   : > { %4135 = vmax.xlane.f32.xlu0 %v4134_v43 }
0x1b27   : > { %3820 = vrot.lane.b32.xlu1 %v5920_v17, %s5271_s17 }
0x1b6b   : > { %v3811_v56 = vpop.xlane.xlu1 %3810 }
0x1b6c   : > { %v3812_v57 = vsub.f32 %v3806_v41, %v3811_v56  ;;  %v3745_v58 = vpop.xlane.xlu0 %3744 }
0x1b6d   : > { %v3746_v59 = vsub.f32 %v3740_v44, %v3745_v58 }
0x1b6e   : > { %v3813_v60 = vmul.f32 1.442695, %v3812_v57 }
0x1b6f   : > { %v3747_v61 = vmul.f32 1.442695, %v3746_v59 }
0x1b70   : > { %5029 = vpow2.f32 %v3813_v60 }
0x1b71   : > { %5031 = vpow2.f32 %v3747_v61 }
0x1b74   : > { %v3689_v62 = vpop.xlane.xlu1 %3688  ;;  %v3876_v63 = vpop.xlane.xlu2 %3875 }
0x1b75   : > { %5033 = vrcp.f32 %v3689_v62  ;;  %v3877_v1 = vsub.f32 %v3871_v32, %v3876_v63 }
0x1b76   : > { %v5030_v3 = vpop.eup %5029  ;;  %v3941_v18 = vpop.xlane.xlu0 %3940 }
0x1b77   : > { %v5032_v4 = vpop.eup %5031  ;;  %v3878_v5 = vmul.f32 1.442695, %v3877_v1  ;;  %v3815_v7 = vsel %vm866_vm1, %v5030_v3, 0.0  ;;  %v3942_v19 = vsub.f32 %v3936_v49, %v3941_v18  ;;  %v4214_v18 = vld [vmem:[#allocation5 + $0x1b8] sm:$0xff] }
0x1b78   : > { %3816 = vadd.xlane.f32.xlu0 %v3815_v7  ;;  %v3749_v9 = vsel %vm866_vm1, %v5032_v4, 0.0  ;;  %v4222_v7 = vld [vmem:[#allocation5 + $0x1f8] sm:$0xff] }
0x1b79   : > { %5035 = vpow2.f32 %v3878_v5  ;;  %3750 = vadd.xlane.f32.xlu2 %v3749_v9  ;;  %v3943_v21 = vmul.f32 1.442695, %v3942_v19  ;;  %4228 = vmatpush.msrb.mxu1 %v4222_v7  ;;  %v4221_v9 = vld [vmem:[#allocation5 + $0x1f0] sm:$0xff]  ;;  %v4289_v7 = vld [vmem:[#allocation7 + $0x338] sm:$0xff] }
0x1b7a   : > { %v4213_v19 = vld [vmem:[#allocation5 + $0x1b0] sm:$0xff] }
0x1b7b   : > { %v5034_v10 = vpop.eup %5033  ;;  %5037 = vpow2.f32 %v3943_v21  ;;  %4229 = vmatpush.msrb.mxu1 %v4221_v9  ;;  %v4211_v21 = vld [vmem:[#allocation5 + $0x1a0] sm:$0xff] }
0x1b7c   : > { %v3691_v11 = vmul.f32 %v5034_v10, %v5028_v46  ;;  %v4220_v10 = vld [vmem:[#allocation5 + $0x1e8] sm:$0xff]  ;;  %v4286_v9 = vld [vmem:[#allocation7 + $0x320] sm:$0xff] }
0x1b7d   : > { %4230 = vmatpush.msrb.mxu1 %v4220_v10  ;;  %v4287_v10 = vld [vmem:[#allocation7 + $0x328] sm:$0xff] }
0x1b7e   : > { %4766 = vmatmul.msk.f32.vlgmr.msrb.gmra.mxu2 %vm866_vm1, %v3691_v11  ;;  %v4219_v11 = vld [vmem:[#allocation5 + $0x1e0] sm:$0xff] }
0x1b7f   : > { %v5036_v13 = vpop.eup %5035  ;;  %4231 = vmatpush.msrb.mxu1 %v4219_v11  ;;  %v4284_v11 = vld [vmem:[#allocation7 + $0x310] sm:$0xff] }
0x1b80   : > { %v3880_v15 = vsel %vm866_vm1, %v5036_v13, 0.0 }
0x1b81   : > { %3881 = vadd.xlane.f32.xlu1 %v3880_v15  ;;  %v4006_v25 = vpop.xlane.xlu1 %4005  ;;  %v5038_v28 = vpop.eup %5037  ;;  %v4217_v15 = vld [vmem:[#allocation5 + $0x1d0] sm:$0xff] }
0x1b82   : > { %v4007_v23 = vsub.f32 %v4001_v38, %v4006_v25  ;;  %v3945_v30 = vsel %vm866_vm1, %v5038_v28, 0.0  ;;  %v4216_v25 = vld [vmem:[#allocation5 + $0x1c8] sm:$0xff] }
0x1b83   : > { %v4071_v20 = vpop.xlane.xlu2 %4070 }
0x1b84   : > { %v4072_v22 = vsub.f32 %v4066_v52, %v4071_v20  ;;  %v4008_v27 = vmul.f32 1.442695, %v4007_v23  ;;  %v4212_v20 = vld [vmem:[#allocation5 + $0x1a8] sm:$0xff]  ;;  %v4209_v23 = vld [vmem:[#allocation5 + $0x190] sm:$0xff] }
0x1b86   : > { %v4073_v24 = vmul.f32 1.442695, %v4072_v22  ;;  %v4210_v22 = vld [vmem:[#allocation5 + $0x198] sm:$0xff] }
0x1b88   : > { %5039 = vpow2.f32 %v4073_v24  ;;  %v4208_v24 = vld [vmem:[#allocation5 + $0x188] sm:$0xff] }
0x1b89   : > { %v4136_v26 = vpop.xlane.xlu0 %4135  ;;  %5041 = vpow2.f32 %v4008_v27 }
0x1b8a   : > { %v4137_v29 = vsub.f32 %v4131_v54, %v4136_v26  ;;  %v4207_v26 = vld [vmem:[#allocation5 + $0x180] sm:$0xff] }
0x1b8c   : > { %3885 = vrot.lane.b32.xlu0 %v5920_v17, %s5269_s6  ;;  %v4138_v31 = vmul.f32 1.442695, %v4137_v29 }
0x1b8e   : > { %v5040_v55 = vpop.eup %5039  ;;  %5043 = vpow2.f32 %v4138_v31 }
0x1b8f   : > { %v4075_v33 = vsel %vm866_vm1, %v5040_v55, 0.0  ;;  %v5042_v34 = vpop.eup %5041 }
0x1b90   : > { %v4010_v35 = vsel %vm866_vm1, %v5042_v34, 0.0 }
0x1b91   : > { %3755 = vrot.lane.b32.xlu2 %v5920_v17, %s5270_s16 }
0x1b94   : > { %v5044_v6 = vpop.eup %5043 }
0x1b95   : > { %v4140_v36 = vsel %vm866_vm1, %v5044_v6, 0.0 }
0x1b99   : > { %v3821_v16 = vpop.permute.xlu1 %3820 }
0x1b9a   : > { %3841 = vmatpush.msra.mxu2 %v3821_v16  ;;  %3950 = vrot.lane.b32.xlu1 %v5920_v17, %s5275_s1  ;;  %v4215_v16 = vld [vmem:[#allocation5 + $0x1c0] sm:$0xff] }
0x1bb6   : > { %3946 = vadd.xlane.f32.xlu0 %v3945_v30 }
0x1bba   : > { %4076 = vadd.xlane.f32.xlu2 %v4075_v33 }
0x1bbe   : > { %4011 = vadd.xlane.f32.xlu0 %v4010_v35 }
0x1bc4   : > { %4141 = vadd.xlane.f32.xlu1 %v4140_v36 }
0x1bd2   : > { %4015 = vrot.lane.b32.xlu0 %v5920_v17, %s5272_s18 }
0x1bda   : > { %4080 = vrot.lane.b32.xlu0 %v5920_v17, %s5273_s19 }
0x1be2   : > { %4145 = vrot.lane.b32.xlu0 %v5920_v17, %s5274_s20 }
0x1beb   : > { %v3817_v37 = vpop.xlane.xlu0 %3816 }
0x1bec   : > { %5045 = vrcp.f32 %v3817_v37  ;;  %v3751_v39 = vpop.xlane.xlu2 %3750 }
0x1bed   : > { %5047 = vrcp.f32 %v3751_v39 }
0x1bf2   : > { %v5046_v40 = vpop.eup %5045 }
0x1bf3   : > { %v5048_v2 = vpop.eup %5047  ;;  %v3819_v12 = vmul.f32 %v5046_v40, %v5030_v3 }
0x1bf4   : > { %v3753_v41 = vmul.f32 %v5048_v2, %v5032_v4  ;;  %v3882_v42 = vpop.xlane.xlu1 %3881  ;;  %v3756_v44 = vpop.permute.xlu2 %3755  ;;  %v4911_v2 = vld [vmem:[%s6154_s7 + $0x3] ss:$0 sm:$0xff] }
0x1bf5   : > { %5049 = vrcp.f32 %v3882_v42  ;;  %3776 = vmatpush.msra.mxu0 %v3756_v44  ;;  %4772 = vmatmul.msk.f32.vlgmr.msra.gmra.mxu2 %vm866_vm1, %v3819_v12  ;;  %v4312_v44 = vld [vmem:[#allocation7 + $0x3f0] sm:$0xff] }
0x1bf6   : > { %4769 = vmatmul.msk.f32.vlgmr.msra.gmra.mxu0 %vm866_vm1, %v3753_v41 }
0x1bfb   : > { %v5050_v45 = vpop.eup %5049 }
0x1bfc   : > { %v3884_v8 = vmul.f32 %v5050_v45, %v5036_v13  ;;  %v4218_v13 = vld [vmem:[#allocation5 + $0x1d8] sm:$0xff] }
0x1bfd   : > { %4232 = vmatpush.msrb.mxu1 %v4218_v13  ;;  %v4313_v45 = vld [vmem:[#allocation7 + $0x3f8] sm:$0xff] }
0x1bfe   : > { %v3886_v46 = vpop.permute.xlu0 %3885  ;;  %4341 = vmatpush.msra.mxu3 %v4313_v45  ;;  %v4285_v13 = vld [vmem:[#allocation7 + $0x318] sm:$0xff] }
0x1bff   : > { %3906 = vmatpush.msrb.mxu0 %v3886_v46  ;;  %4233 = vmatpush.msrb.mxu1 %v4217_v15  ;;  %v4311_v46 = vld [vmem:[#allocation7 + $0x3e8] sm:$0xff]  ;;  %v4282_v15 = vld [vmem:[#allocation7 + $0x300] sm:$0xff] }
0x1c00   : > { %4775 = vmatmul.msk.f32.vlgmr.msrb.gmra.mxu0 %vm866_vm1, %v3884_v8  ;;  %v4310_v8 = vld [vmem:[#allocation7 + $0x3e0] sm:$0xff]  ;;  %4342 = vmatpush.msra.mxu3 %v4311_v46 }
0x1c01   : > { %v3712_v60 = vpop.f32.mrf.mxu2  ;;  %4234 = vmatpush.msrb.mxu1 %v4216_v25  ;;  %v4283_v25 = vld [vmem:[#allocation7 + $0x308] sm:$0xff]  ;;  %v4384_v46 = vld [vmem:[#allocation8 + $0x3a0] sm:$0xff] }
0x1c03   : > { %4235 = vmatpush.msrb.mxu1 %v4215_v16  ;;  %v4379_v16 = vld [vmem:[#allocation8 + $0x378] sm:$0xff] }
0x1c05   : > { %4236 = vmatpush.msrb.mxu1 %v4214_v18  ;;  %v4395_v18 = vld [vmem:[#allocation8 + $0x3f8] sm:$0xff] }
0x1c07   : > { %4237 = vmatpush.msrb.mxu1 %v4213_v19  ;;  %v4378_v19 = vld [vmem:[#allocation8 + $0x370] sm:$0xff] }
0x1c09   : > { %4238 = vmatpush.msrb.mxu1 %v4212_v20  ;;  %v4394_v20 = vld [vmem:[#allocation8 + $0x3f0] sm:$0xff] }
0x1c0b   : > { %4239 = vmatpush.msrb.mxu1 %v4211_v21  ;;  %v4377_v21 = vld [vmem:[#allocation8 + $0x368] sm:$0xff] }
0x1c0c   : > { %v3951_v17 = vpop.permute.xlu1 %3950 }
0x1c0d   : > { %3971 = vmatpush.msrb.mxu2 %v3951_v17  ;;  %4240 = vmatpush.msrb.mxu1 %v4210_v22  ;;  %v4393_v22 = vld [vmem:[#allocation8 + $0x3e8] sm:$0xff] }
0x1c0f   : > { %4241 = vmatpush.msrb.mxu1 %v4209_v23 }
0x1c11   : > { %4242 = vmatpush.msrb.mxu1 %v4208_v24 }
0x1c13   : > { %4243 = vmatpush.msrb.mxu1 %v4207_v26  ;;  %v4376_v26 = vld [vmem:[#allocation8 + $0x360] sm:$0xff] }
0x1c15   : > { %4421 = vmatpush.msra.mxu1 %v4395_v18 }
0x1c17   : > { %4422 = vmatpush.msra.mxu1 %v4394_v20  ;;  %v4496_v20 = vld [vmem:[%s6210_s21 + $0x78] sm:$0xff] }
0x1c19   : > { %4423 = vmatpush.msra.mxu1 %v4393_v22  ;;  %v4494_v22 = vld [vmem:[%s6210_s21 + $0x68] sm:$0xff] }
0x1c29   : > { %v3947_v32 = vpop.xlane.xlu0 %3946 }
0x1c2a   : > { %5051 = vrcp.f32 %v3947_v32 }
0x1c2d   : > { %v4077_v50 = vpop.xlane.xlu2 %4076 }
0x1c30   : > { %v5052_v47 = vpop.eup %5051 }
0x1c31   : > { %v3949_v48 = vmul.f32 %v5052_v47, %v5038_v28  ;;  %v4012_v49 = vpop.xlane.xlu0 %4011 }
0x1c32   : > { %5053 = vrcp.f32 %v4012_v49  ;;  %v4308_v49 = vld [vmem:[#allocation7 + $0x3d0] sm:$0xff] }
0x1c33   : > { %4778 = vmatmul.msk.f32.vlgmr.msrb.gmra.mxu2 %vm866_vm1, %v3949_v48  ;;  %5055 = vrcp.f32 %v4077_v50  ;;  %v4306_v50 = vld [vmem:[#allocation7 + $0x3c0] sm:$0xff] }
0x1c37   : > { %v4142_v53 = vpop.xlane.xlu1 %4141 }
0x1c38   : > { %v5054_v38 = vpop.eup %5053  ;;  %5057 = vrcp.f32 %v4142_v53  ;;  %v4302_v53 = vld [vmem:[#allocation7 + $0x3a0] sm:$0xff] }
0x1c39   : > { %v4014_v51 = vmul.f32 %v5054_v38, %v5042_v34  ;;  %v5056_v54 = vpop.eup %5055  ;;  %v4307_v38 = vld [vmem:[#allocation7 + $0x3c8] sm:$0xff] }
0x1c3a   : > { %v4079_v43 = vmul.f32 %v5056_v54, %v5040_v55  ;;  %v4303_v54 = vld [vmem:[#allocation7 + $0x3a8] sm:$0xff] }
0x1c3e   : > { %v5058_v57 = vpop.eup %5057 }
0x1c3f   : > { %v4144_v58 = vmul.f32 %v5058_v57, %v5044_v6  ;;  %v4298_v57 = vld [vmem:[#allocation7 + $0x380] sm:$0xff] }
0x1c44   : > { %v4016_v52 = vpop.permute.xlu0 %4015 }
0x1c45   : > { %4036 = vmatpush.msra.mxu0 %v4016_v52  ;;  %v4305_v52 = vld [vmem:[#allocation7 + $0x3b8] sm:$0xff] }
0x1c46   : > { %4781 = vmatmul.msk.f32.vlgmr.msra.gmra.mxu0 %vm866_vm1, %v4014_v51  ;;  %v4304_v51 = vld [vmem:[#allocation7 + $0x3b0] sm:$0xff] }
0x1c4c   : > { %v4081_v56 = vpop.permute.xlu0 %4080 }
0x1c4d   : > { %4101 = vmatpush.msra.mxu2 %v4081_v56  ;;  %v4301_v56 = vld [vmem:[#allocation7 + $0x398] sm:$0xff] }
0x1c4e   : > { %4784 = vmatmul.msk.f32.vlgmr.msra.gmra.mxu2 %vm866_vm1, %v4079_v43  ;;  %v4300_v43 = vld [vmem:[#allocation7 + $0x390] sm:$0xff] }
0x1c4f   : > { %4321 = vmatpush.msrb.mxu2 %v4312_v44  ;;  %v4385_v44 = vld [vmem:[#allocation8 + $0x3a8] sm:$0xff] }
0x1c51   : > { %4322 = vmatpush.msrb.mxu2 %v4310_v8  ;;  %v4368_v8 = vld [vmem:[#allocation8 + $0x320] sm:$0xff] }
0x1c53   : > { %4323 = vmatpush.msrb.mxu2 %v4308_v49 }
0x1c54   : > { %v4146_v59 = vpop.permute.xlu0 %4145 }
0x1c55   : > { %4166 = vmatpush.msrb.mxu0 %v4146_v59  ;;  %4324 = vmatpush.msrb.mxu2 %v4306_v50  ;;  %v4296_v59 = vld [vmem:[#allocation7 + $0x370] sm:$0xff] }
0x1c56   : > { %4787 = vmatmul.msk.f32.vlgmr.msrb.gmra.mxu0 %vm866_vm1, %v4144_v58  ;;  %v4299_v58 = vld [vmem:[#allocation7 + $0x388] sm:$0xff] }
0x1c57   : > { %4325 = vmatpush.msrb.mxu2 %v4304_v51  ;;  %4401 = vmatpush.msra.mxu0 %v4379_v16  ;;  %v4913_v51 = vld [vmem:[%s6156_s9 + $0x3] ss:$0 sm:$0xff] }
0x1c59   : > { %4326 = vmatpush.msrb.mxu2 %v4302_v53  ;;  %4402 = vmatpush.msra.mxu0 %v4378_v19 }
0x1c5b   : > { %4327 = vmatpush.msrb.mxu2 %v4300_v43  ;;  %4403 = vmatpush.msra.mxu0 %v4377_v21  ;;  %v4382_v43 = vld [vmem:[#allocation8 + $0x390] sm:$0xff] }
0x1c5c   : > { %v4495_v21 = vld [vmem:[%s6210_s21 + $0x70] sm:$0xff] }
0x1c5d   : > { %4328 = vmatpush.msrb.mxu2 %v4298_v57  ;;  %4404 = vmatpush.msra.mxu0 %v4376_v26  ;;  %v4381_v57 = vld [vmem:[#allocation8 + $0x388] sm:$0xff]  ;;  %v4491_v26 = vld [vmem:[%s6210_s21 + $0x50] sm:$0xff] }
0x1c5f   : > { %4329 = vmatpush.msrb.mxu2 %v4296_v59  ;;  %v4380_v59 = vld [vmem:[#allocation8 + $0x380] sm:$0xff] }
0x1c73   : > { %v3778_v61 = vpop.f32.mrf.mxu0 }
0x1c74   : > { %4172 = vrot.lane.b32.xlu2 %v3778_v61, %s5274_s20  ;;  %v4294_v61 = vld [vmem:[#allocation7 + $0x360] sm:$0xff] }
0x1c75   : > { %4330 = vmatpush.msrb.mxu2 %v4294_v61 }
0x1c78   : > { %v3843_v62 = vpop.f32.mrf.mxu2 }
0x1c79   : > { %4176 = vrot.lane.b32.xlu0 %v3843_v62, %s5273_s19  ;;  %v4295_v62 = vld [vmem:[#allocation7 + $0x368] sm:$0xff]  ;;  %s6213_s19 = sld [smem:[#allocation16_spill]] }
0x1c7d   : > { %v3908_v63 = vpop.f32.mrf.mxu0 }
0x1c7f   : > { %s685_s29 = sand.u32 1, %s6213_s19  }
0x1c80   : > { %s686_s22 = scalar_lea.vmem [#allocation10], %s685_s29  ;;  %s4553_s0 = scalar_lea.sflag [#allocation4], %s685_s29 }
0x1c81   : > { %4180 = vrot.lane.b32.xlu0 %v3908_v63, %s5272_s18  ;;  %v4292_v63 = vld [vmem:[#allocation7 + $0x350] sm:$0xff] }
0x1c82   : > { %4331 = vmatpush.msrb.mxu2 %v4292_v63 }
0x1cb6   : > { %v3973_v1 = vpop.f32.mrf.mxu2 }
0x1cb7   : > { %4184 = vrot.lane.b32.xlu1 %v3973_v1, %s5275_s1  ;;  %v4293_v1 = vld [vmem:[#allocation7 + $0x358] sm:$0xff]  ;;  %s6217_s1 = sld [smem:[#allocation32_spill]] }
0x1cc3   : > { %v4038_v3 = vpop.f32.mrf.mxu0 }
0x1cc4   : > { %4188 = vrot.lane.b32.xlu0 %v4038_v3, %s5269_s6  ;;  %v4290_v3 = vld [vmem:[#allocation7 + $0x340] sm:$0xff]  ;;  %s6215_s6 = sld [smem:[#allocation33_spill]] }
0x1cc5   : > { %4332 = vmatpush.msrb.mxu2 %v4290_v3 }
0x1cce   : > { %v4173_v29 = vpop.permute.xlu2 %4172 }
0x1ccf   : > { %v4199_v55 = vsel %vm698_vm0, %v3712_v60, %v4173_v29  ;;  %v4297_v60 = vld [vmem:[#allocation7 + $0x378] sm:$0xff] }
0x1cd0   : > { %v4375_v29 = vld [vmem:[#allocation8 + $0x358] sm:$0xff] }
0x1cd1   : > { %v4103_v4 = vpop.f32.mrf.mxu2  ;;  %4405 = vmatpush.msra.mxu0 %v4375_v29  ;;  %v4488_v29 = vld [vmem:[%s6210_s21 + $0x38] sm:$0xff] }
0x1cd2   : > { %4192 = vrot.lane.b32.xlu2 %v4103_v4, %s5271_s17  ;;  %v4291_v4 = vld [vmem:[#allocation7 + $0x348] sm:$0xff]  ;;  %s4561_s17 = scalar_lea.hbm %s6215_s6, %s5403_s2 }
0x1cd3   : > { %v4168_v5 = vpop.f32.mrf.mxu0  ;;  %s4565_s30 = sshll.u32 %s4561_s17, 4  ;;  %s4566_s30 = int_to_ptr.hbm [resolvable:$true] %s4565_s30 }
0x1cd4   : > { %4196 = vrot.lane.b32.xlu0 %v4168_v5, %s5270_s16  ;;  %v4288_v5 = vld [vmem:[#allocation7 + $0x330] sm:$0xff]  ;;  %s5197_s26 = sshra.s32 %s4566_s30, 4  ;;  %s5198_s26 = int_to_ptr.hbm [resolvable:$true] %s5197_s26 }
0x1cd5   : > { %4333 = vmatpush.msrb.mxu2 %v4288_v5  ;;  %s5199_s19 = scalar_lea.hbm %s5198_s26, 1  ;;  %p5204_p3 = scmp.lt.s32.totalorder %s5198_s26, %s6215_s6 }
0x1cd6   : > { %p5200_p0 = scmp.ne.s32.totalorder %s5198_s26, %s5199_s19 }
0x1cd7   : > { %4334 = vmatpush.msrb.mxu2 %v4286_v9 }
0x1cd8   : > { %p5201_p1 = pnand %p5200_p0, %p5420_p5 }
0x1cd9   : > { %4335 = vmatpush.msrb.mxu2 %v4284_v11 }
0x1cda   : > { %p5202_p2 = pneg %p5201_p1 }
0x1cdb   : > { %4336 = vmatpush.msrb.mxu2 %v4282_v15 }
0x1cdd   : > { %4498 = vmatpush.msra.mxu2 %v4496_v20 }
0x1cdf   : > { %4499 = vmatpush.msra.mxu2 %v4495_v21 }
0x1ce1   : > { %4500 = vmatpush.msra.mxu2 %v4494_v22 }
0x1ceb   : > { %v4177_v27 = vpop.permute.xlu0 %4176 }
0x1cec   : > { %v4200_v33 = vsel %vm1386_vm2, %v4199_v55, %v4177_v27  ;;  %v4392_v27 = vld [vmem:[#allocation8 + $0x3e0] sm:$0xff]  ;;  %v4374_v55 = vld [vmem:[#allocation8 + $0x350] sm:$0xff] }
0x1ced   : > { %4424 = vmatpush.msra.mxu1 %v4392_v27  ;;  %4406 = vmatpush.msra.mxu0 %v4374_v55  ;;  %v4490_v27 = vld [vmem:[%s6210_s21 + $0x48] sm:$0xff] }
0x1cee   : > { %v4486_v55 = vld [vmem:[%s6210_s21 + $0x28] sm:$0xff] }
0x1cf3   : > { %v4181_v28 = vpop.permute.xlu0 %4180 }
0x1cf4   : > { %v4201_v34 = vsel %vm1388_vm3, %v4200_v33, %v4181_v28  ;;  %v4373_v33 = vld [vmem:[#allocation8 + $0x348] sm:$0xff] }
0x1cf5   : > { %4407 = vmatpush.msra.mxu0 %v4373_v33  ;;  %v4485_v33 = vld [vmem:[%s6210_s21 + $0x20] sm:$0xff] }
0x1d29   : > { %v4185_v31 = vpop.permute.xlu1 %4184 }
0x1d2a   : > { %v4202_v35 = vsel %vm1390_vm4, %v4201_v34, %v4185_v31  ;;  %v4390_v31 = vld [vmem:[#allocation8 + $0x3d0] sm:$0xff]  ;;  %v4389_v34 = vld [vmem:[#allocation8 + $0x3c8] sm:$0xff] }
0x1d2c   : > { %v4193_v36 = vpop.permute.xlu2 %4192 }
0x1d36   : > { %v4189_v30 = vpop.permute.xlu0 %4188 }
0x1d37   : > { %v4203_v6 = vsel %vm1392_vm5, %v4202_v35, %v4189_v30  ;;  %v4391_v30 = vld [vmem:[#allocation8 + $0x3d8] sm:$0xff]  ;;  %v4372_v35 = vld [vmem:[#allocation8 + $0x340] sm:$0xff] }
0x1d38   : > { %v4204_v39 = vsel %vm1394_vm6, %v4203_v6, %v4193_v36  ;;  %4425 = vmatpush.msra.mxu1 %v4391_v30  ;;  %v4388_v6 = vld [vmem:[#allocation8 + $0x3c0] sm:$0xff]  ;;  %4408 = vmatpush.msra.mxu0 %v4372_v35  ;;  %v4487_v30 = vld [vmem:[%s6210_s21 + $0x30] sm:$0xff]  ;;  %v4484_v35 = vld [vmem:[%s6210_s21 + $0x18] sm:$0xff] }
0x1d3a   : > { %4426 = vmatpush.msra.mxu1 %v4390_v31 }
0x1d3c   : > { %4427 = vmatpush.msra.mxu1 %v4389_v34 }
0x1d3e   : > { %4428 = vmatpush.msra.mxu1 %v4388_v6 }
0x1d46   : > { %v4197_v37 = vpop.permute.xlu0 %4196 }
0x1d47   : > { %v4205_v40 = vsel %vm1396_vm7, %v4204_v39, %v4197_v37  ;;  %v4371_v37 = vld [vmem:[#allocation8 + $0x338] sm:$0xff] }
0x1d48   : > { %4244 = vmatmul.f32.vlgmr.msrb.gmra.mxu1 %v4205_v40  ;;  %v4387_v39 = vld [vmem:[#allocation8 + $0x3b8] sm:$0xff]  ;;  %4409 = vmatpush.msra.mxu0 %v4371_v37  ;;  %v4482_v37 = vld [vmem:[%s6210_s21 + $0x8] sm:$0xff] }
0x1d49   : > { %4429 = vmatpush.msra.mxu1 %v4387_v39 }
0x1dc5   : > { %v4245_v12 = vpop.f32.mrf.mxu1 }
0x1dc6   : > { %v4246_v41 = vadd.f32 %v4911_v2, %v4245_v12  ;;  %v4370_v2 = vld [vmem:[#allocation8 + $0x330] sm:$0xff] }
0x1dc7   : > { %v4386_v12 = vld [vmem:[#allocation8 + $0x3b0] sm:$0xff]  ;;  %4410 = vmatpush.msra.mxu0 %v4370_v2 }
0x1dc8   : > { %v4248_v42 = vadd.f32 %v4246_v41, %v5912_v14  ;;  %v4309_v14 = vld [vmem:[#allocation7 + $0x3d8] sm:$0xff]  ;;  %4430 = vmatpush.msra.mxu1 %v4386_v12  ;;  %v4525_v2 = vld [vmem:[%s6212_s4 + $0x30] sm:$0xff] }
0x1dc9   : > { %4343 = vmatpush.msra.mxu3 %v4309_v14  ;;  %v4912_v14 = vld [vmem:[%s6155_s8 + $0x3] ss:$0 sm:$0xff] }
0x1dca   : > { %4253 = vadd.xlane.f32.xlu2 %v4248_v42  ;;  %4431 = vmatpush.msra.mxu1 %v4385_v44  ;;  %v4523_v44 = vld [vmem:[%s6212_s4 + $0x20] sm:$0xff] }
0x1dcb   : > { %4344 = vmatpush.msra.mxu3 %v4307_v38 }
0x1dcc   : > { %4432 = vmatpush.msra.mxu1 %v4384_v46 }
0x1dcd   : > { %4345 = vmatpush.msra.mxu3 %v4305_v52 }
0x1dcf   : > { %4346 = vmatpush.msra.mxu3 %v4303_v54  ;;  %v4366_v54 = vld [vmem:[#allocation8 + $0x310] sm:$0xff] }
0x1dd1   : > { %4347 = vmatpush.msra.mxu3 %v4301_v56  ;;  %v4365_v56 = vld [vmem:[#allocation8 + $0x308] sm:$0xff] }
0x1dd3   : > { %4348 = vmatpush.msra.mxu3 %v4299_v58  ;;  %v4364_v58 = vld [vmem:[#allocation8 + $0x300] sm:$0xff] }
0x1dd5   : > { %4349 = vmatpush.msra.mxu3 %v4297_v60 }
0x1dd7   : > { %4350 = vmatpush.msra.mxu3 %v4295_v62 }
0x1dd9   : > { %4351 = vmatpush.msra.mxu3 %v4293_v1 }
0x1ddb   : > { %4352 = vmatpush.msra.mxu3 %v4291_v4 }
0x1ddd   : > { %4353 = vmatpush.msra.mxu3 %v4289_v7  ;;  %v4914_v7 = vld [vmem:[%s6160_s13 + $0x3] ss:$0 sm:$0xff] }
0x1ddf   : > { %4354 = vmatpush.msra.mxu3 %v4287_v10 }
0x1de1   : > { %4355 = vmatpush.msra.mxu3 %v4285_v13 }
0x1de3   : > { %4356 = vmatpush.msra.mxu3 %v4283_v25 }
0x1e3d   : > { %v4254_v17 = vpop.xlane.xlu2 %4253 }
0x1e3e   : > { %v4255_v32 = vmul.f32 %v4254_v17, %v5616_v0 }
0x1e40   : > { %v6010_v47 = vsub.f32 %v4248_v42, %v4255_v32  ;;  %v4369_v42 = vld [vmem:[#allocation8 + $0x328] sm:$0xff]  ;;  %v4367_v32 = vld [vmem:[#allocation8 + $0x318] sm:$0xff] }
0x1e41   : > { %4411 = vmatpush.msra.mxu0 %v4369_v42 }
0x1e42   : > { %v4257_v48 = vmul.f32 %v6010_v47, %v6010_v47 }
0x1e43   : > { %4412 = vmatpush.msra.mxu0 %v4368_v8  ;;  %v4522_v8 = vld [vmem:[%s6212_s4 + $0x18] sm:$0xff] }
0x1e44   : > { %4258 = vadd.xlane.f32.xlu0 %v4257_v48  ;;  %v4383_v48 = vld [vmem:[#allocation8 + $0x398] sm:$0xff] }
0x1e45   : > { %4413 = vmatpush.msra.mxu0 %v4367_v32  ;;  %4433 = vmatpush.msra.mxu1 %v4383_v48  ;;  %v4915_v32 = vld [vmem:[%s6161_s14 + $0x3] ss:$0 sm:$0xff] }
0x1e47   : > { %4414 = vmatpush.msra.mxu0 %v4366_v54  ;;  %4434 = vmatpush.msra.mxu1 %v4382_v43 }
0x1e49   : > { %4415 = vmatpush.msra.mxu0 %v4365_v56  ;;  %4435 = vmatpush.msra.mxu1 %v4381_v57 }
0x1e4b   : > { %4416 = vmatpush.msra.mxu0 %v4364_v58  ;;  %4436 = vmatpush.msra.mxu1 %v4380_v59  ;;  %v4521_v58 = vld [vmem:[%s6212_s4 + $0x10] sm:$0xff]  ;;  %v4520_v59 = vld [vmem:[%s6212_s4 + $0x8] sm:$0xff] }
0x1eb7   : > { %v4259_v23 = vpop.xlane.xlu0 %4258 }
0x1eb8   : > { %v4260_v24 = vmul.f32 %v4259_v23, %v5616_v0  ;;  %v4493_v23 = vld [vmem:[%s6210_s21 + $0x60] sm:$0xff] }
0x1eb9   : > { %4501 = vmatpush.msra.mxu2 %v4493_v23 }
0x1eba   : > { %v4261_v28 = vadd.f32 1e-05, %v4260_v24  ;;  %v4492_v24 = vld [vmem:[%s6210_s21 + $0x58] sm:$0xff] }
0x1ebb   : > { %4502 = vmatpush.msra.mxu2 %v4492_v24 }
0x1ebc   : > { %5059 = vrsqrt.f32 %v4261_v28  ;;  %vm4268_vm1 = vweird.f32 %v4261_v28 }
0x1ebd   : > { %4503 = vmatpush.msra.mxu2 %v4491_v26 }
0x1ebf   : > { %4504 = vmatpush.msra.mxu2 %v4490_v27 }
0x1ec2   : > { %v5060_v36 = vpop.eup %5059 }
0x1ec3   : > { %v4263_v40 = vmul.f32 %v5060_v36, %v4261_v28  ;;  %vm4269_vm0 = vweird.f32 %v5060_v36  ;;  %v4489_v28 = vld [vmem:[%s6210_s21 + $0x40] sm:$0xff] }
0x1ec4   : > { %vm4270_vm2 = vmor %vm4268_vm1, %vm4269_vm0  ;;  %4505 = vmatpush.msra.mxu2 %v4489_v28 }
0x1ec5   : > { %v4264_v41 = vmul.f32 %v5060_v36, %v4263_v40  ;;  %v4526_v40 = vld [vmem:[%s6211_s24 + $0x38] sm:$0xff]  ;;  %s4563_s24 = sshll.u32 %s686_s22, 4  ;;  %s4564_s24 = int_to_ptr.vmem [resolvable:$true] %s4563_s24 }
0x1ec6   : > { %4506 = vmatpush.msra.mxu2 %v4488_v29  ;;  %4539 = vmatpush.msrb.mxu3 %v4526_v40 }
0x1ec7   : > { %v4265_v45 = vmul.f32 0.5, %v4264_v41  ;;  %v4524_v41 = vld [vmem:[%s6212_s4 + $0x28] sm:$0xff] }
0x1ec8   : > { %4507 = vmatpush.msra.mxu2 %v4487_v30  ;;  %4540 = vmatpush.msrb.mxu3 %v4525_v2 }
0x1ec9   : > { %v4266_v17 = vsub.f32 1.5, %v4265_v45 }
0x1eca   : > { %4508 = vmatpush.msra.mxu2 %v4486_v55  ;;  %4541 = vmatpush.msrb.mxu3 %v4524_v41 }
0x1ecb   : > { %v4267_v49 = vmul.f32 %v5060_v36, %v4266_v17 }
0x1ecc   : > { %4509 = vmatpush.msra.mxu2 %v4485_v33  ;;  %4542 = vmatpush.msrb.mxu3 %v4523_v44 }
0x1ecd   : > { %v4271_v50 = vsel %vm4270_vm2, %v5060_v36, %v4267_v49  ;;  %v4483_v36 = vld [vmem:[%s6210_s21 + $0x10] sm:$0xff]  ;;  %v4916_v49 = vld [vmem:[%s6162_s15 + $0x3] ss:$0 sm:$0xff] }
0x1ece   : > { %v4272_v38 = vmul.f32 %v4271_v50, %v6010_v47  ;;  %v4791_v47 = vld [vmem:[%s6158_s11 + $0x6] sm:$0x3]  ;;  %4510 = vmatpush.msra.mxu2 %v4484_v35  ;;  %4543 = vmatpush.msrb.mxu3 %v4522_v8 }
0x1ecf   : > { %v4317_v60 = vperm.slane %v4791_v47, 0  ;;  %v4318_v61 = vperm.slane %v4791_v47, 1  ;;  %v4519_v47 = vld [vmem:[%s6212_s4] sm:$0xff] }
0x1ed0   : > { %v4276_v52 = vmul.f32 %v4912_v14, %v4272_v38  ;;  %4511 = vmatpush.msra.mxu2 %v4483_v36  ;;  %4544 = vmatpush.msrb.mxu3 %v4521_v58 }
0x1ed2   : > { %v4280_v53 = vadd.f32 %v4913_v51, %v4276_v52  ;;  %4512 = vmatpush.msra.mxu2 %v4482_v37  ;;  %4545 = vmatpush.msrb.mxu3 %v4520_v59 }
0x1ed4   : > { %4337 = vmatmul.f32.vlgmr.msrb.gmra.mxu2 %v4280_v53  ;;  %4357 = vmatmul.f32.vlgmr.msra.gmra.mxu3 %v4280_v53 }
0x1ed5   : > { %4546 = vmatpush.msrb.mxu3 %v4519_v47 }
0x1f57   : > { %v4338_v62 = vpop.f32.mrf.mxu2  ;;  %v4358_v63 = vpop.f32.mrf.mxu3 }
0x1f58   : > { %v4339_v1 = vadd.f32 %v4338_v62, %v4317_v60  ;;  %v4359_v3 = vadd.f32 %v4358_v63, %v4318_v61  ;;  %v4497_v60 = vld [vmem:[%s6214_s3] sm:$0x1]  ;;  %s5203_s3 = scalar_lea.hbm %s6215_s6, 2 }
0x1f59   : > { %p5205_p4 = scmp.lt.s32.totalorder %s5203_s3, %s5199_s19 }
0x1f5a   : > { %v4361_v4 = vmax.f32 %v4339_v1, 0.0  ;;  %v4362_v5 = vmax.f32 %v4359_v3, 0.0  ;;  %v4527_v1 = vld [vmem:[%s6217_s1] sm:$0x1] }
0x1f5b   : > { %p5206_p7 = por %p5205_p4, %p5204_p3 }
0x1f5c   : > { %4417 = vmatmul.f32.vlgmr.msra.gmra.mxu0 %v4361_v4  ;;  %4437 = vmatmul.f32.vlgmr.msra.gmra.mxu1 %v4362_v5 }
0x1f5d   : > { %p5207_p8 = pnand %p5206_p7, %p5202_p2 }
0x1fd9   : > { %v4418_v9 = vpop.f32.mrf.mxu0  ;;  %v4438_v11 = vpop.f32.mrf.mxu1 }
0x1fda   : > { %v4419_v10 = vadd.f32 %v4914_v7, %v4418_v9 }
0x1fdc   : > { %v4439_v13 = vadd.f32 %v4438_v11, %v4419_v10 }
0x1fde   : > { %v4441_v15 = vadd.f32 %v4439_v13, %v4280_v53 }
0x1fe0   : > { %4446 = vadd.xlane.f32.xlu1 %v4441_v15 }
0x2053   : > { %v4447_v25 = vpop.xlane.xlu1 %4446 }
0x2054   : > { %v4448_v16 = vmul.f32 %v4447_v25, %v5616_v0 }
0x2056   : > { %v4449_v18 = vsub.f32 %v4441_v15, %v4448_v16 }
0x2058   : > { %v4450_v19 = vmul.f32 %v4449_v18, %v4449_v18 }
0x205a   : > { %4451 = vadd.xlane.f32.xlu2 %v4450_v19 }
0x20cd   : > { %v4452_v31 = vpop.xlane.xlu2 %4451 }
0x20ce   : > { %v4453_v34 = vmul.f32 %v4452_v31, %v5616_v0  ;;  %v4481_v0 = vld [vmem:[%s6210_s21] sm:$0xff] }
0x20cf   : > { %4513 = vmatpush.msra.mxu2 %v4481_v0 }
0x20d0   : > { %v4454_v6 = vadd.f32 1e-05, %v4453_v34 }
0x20d2   : > { %5061 = vrsqrt.f32 %v4454_v6  ;;  %vm4461_vm5 = vweird.f32 %v4454_v6 }
0x20d8   : > { %v5062_v39 = vpop.eup %5061 }
0x20d9   : > { %v4456_v12 = vmul.f32 %v5062_v39, %v4454_v6  ;;  %vm4462_vm3 = vweird.f32 %v5062_v39 }
0x20da   : > { %vm4463_vm6 = vmor %vm4461_vm5, %vm4462_vm3 }
0x20db   : > { %v4457_v42 = vmul.f32 %v5062_v39, %v4456_v12 }
0x20dd   : > { %v4458_v45 = vmul.f32 0.5, %v4457_v42 }
0x20df   : > { %v4459_v46 = vsub.f32 1.5, %v4458_v45 }
0x20e1   : > { %v4460_v17 = vmul.f32 %v5062_v39, %v4459_v46 }
0x20e3   : > { %v4464_v48 = vsel %vm4463_vm6, %v5062_v39, %v4460_v17 }
0x20e4   : > { %v4465_v14 = vmul.f32 %v4464_v48, %v4449_v18 }
0x20e6   : > { %v4469_v50 = vmul.f32 %v4915_v32, %v4465_v14 }
0x20e8   : > { %v4473_v38 = vadd.f32 %v4916_v49, %v4469_v50 }
0x20ea   : > { %v4474_v51 = vrot.slane %v4473_v38, 4 }
0x20ec   : > { %v4475_v52 = vadd.f32 %v4474_v51, %v4473_v38 }
0x20ee   : > { %v4476_v53 = vrot.slane %v4475_v52, 2 }
0x20f0   : > { %v4477_v54 = vadd.f32 %v4476_v53, %v4475_v52 }
0x20f2   : > { %v4478_v43 = vrot.slane %v4477_v54, 1 }
0x20f4   : > { %v4479_v56 = vadd.f32 %v4478_v43, %v4477_v54 }
0x20f6   : > { %v4480_v57 = vmul.f32 0.125, %v4479_v56 }
0x20f8   : > { %4514 = vmatmul.f32.vlgmr.msra.gmra.mxu2 %v4480_v57 }
0x217b   : > { %v4515_v61 = vpop.f32.mrf.mxu2 }
0x217c   : > { %v4516_v62 = vadd.f32 %v4515_v61, %v4497_v60 }
0x217e   : > { %v4518_v63 = vmax.f32 %v4516_v62, 0.0 }
0x2180   : > { %4795 = vmatmul.msk.f32.vlgmr.msrb.gmra.mxu3 %vm1390_vm4, %v4518_v63 }
0x2203   : > { %v4548_v3 = vpop.f32.mrf.mxu3 }
0x2204   : > { %v4549_v4 = vadd.f32 %v4548_v3, %v4527_v1 }
0x2206   : > { %4551 = vst [vmem:[%s686_s22] sm:$0x1] %v4549_v4 }
0x2207   : > { %5210 = shalt.err (!%p5207_p8)
}
0x2208   : > { %4814 = dma.vmem_to_hbm [thread:$0]  (%p5420_p5), %s4564_s24, 16, %s4566_s30, %s4553_s0  }
0x2209 PF: > { %s6218_s29 = sld [smem:[#allocation18_spill]] }
0x220a   : > { %s6219_s17 = sld [smem:[#allocation15_spill]] }
0x220f   : > { %p4841_p9 = scmp.ge.s32.totalorder %s6218_s29, 2 }
0x2210   : > { %s4577_s20 = sand.u32 1, %s6219_s17  }
0x2211   : > { %p4830_p10 = pnand %p4841_p9, %p5424_p6  ;;  %s4578_s1 = scalar_lea.sflag [#allocation4], %s4577_s20 }
0x2213   : > { %p4831_p11 = pneg %p4830_p10 }
0x2215   : > { %5240 = dma.done.wait (%p4831_p11), %s4578_s1, 16  }
0x2216   : > { %5242 = vsyncadd (%p4831_p11), %s4578_s1, 4294967280  ;;  %s6221_s24 = sld [smem:[#allocation19_spill]] }
0x2217   : > { %s6222_s1 = sld [smem:[#allocation16_spill]] }
0x2218   : > { %s6223_s22 = sld [smem:[#allocation17_spill]] }
0x2219   : > { %s6224_s23 = sld [smem:[#allocation20_spill]] }
0x221c   : > { %p33_p12 = scmp.ge.s32.totalorder %s6221_s24, 4  }
0x221e   :  { %35 = sbr.rel (!%p33_p12) target bundleno = 18 (0x12), region = 188 }
0x2223   :  { %4583 = vsyncpa [#allocation3], 1 }
0x2224   :  { %4585 = vsyncpa [#allocation3 + $0x1], 1 }
0x2225   :  { %4586 = vsyncpa [#allocation6], 1 }
0x2226   :  { %4587 = vsyncpa [#allocation9], 1 }
0x2227   :  { %4588 = vsyncpa [#allocation4], 1 }
0x2228   :  { %4590 = vsyncpa [#allocation4 + $0x1], 1 }

</bundles_post_ra>
